<compile_context>
chip_gen: v6e
topology: v6e:2x2x1
jax: 0.10.0
libtpu: 0.0.40
codegen_flags: <defaults>
</compile_context>

<pallas_src>
import functools

import jax
import jax.numpy as jnp
from jax.experimental import pallas as pl
from jax.experimental.pallas import tpu as pltpu

LANE = 128


def _round_up(x, m):
    return (x + m - 1) // m * m


def _pick_block(total, max_units):
    """Largest multiple of 128 that divides `total` and is <= 128*max_units."""
    units = total // LANE
    for d in range(min(max_units, units), 0, -1):
        if units % d == 0:
            return LANE * d
    return LANE


# ------------------- fused matmul + BatchNorm statistics -------------------- #

def _matmul_bn_kernel(a_ref, b_ref, o_ref, stats_ref, acc_ref):
    k = pl.program_id(2)

    @pl.when(k == 0)
    def _init():
        acc_ref[...] = jnp.zeros_like(acc_ref)

    acc_ref[...] += jnp.dot(a_ref[...], b_ref[...],
                            preferred_element_type=jnp.float32)

    @pl.when(k == pl.num_programs(2) - 1)
    def _finalize():
        acc = acc_ref[...]
        o_ref[...] = acc
        # per-channel partial sums for BatchNorm (one row-block's contribution)
        stats_ref[0:1, :] = jnp.sum(acc, axis=0, keepdims=True)
        stats_ref[1:2, :] = jnp.sum(acc * acc, axis=0, keepdims=True)
        stats_ref[2:8, :] = jnp.zeros((6, acc.shape[1]), jnp.float32)


def matmul_bn(a_bf16, b_bf16, *, tm):
    """(Mp,Kp)x(Kp,Np) bf16 MXU matmul with f32 accumulation.

    Returns (out_f32, stats) where stats[8*i + 0/1, :] are the per-M-tile
    column sum / sum-of-squares of the output.
    """
    Mp, Kp = a_bf16.shape
    Kp2, Np = b_bf16.shape
    assert Kp == Kp2
    tk = _pick_block(Kp, 4)
    tn = _pick_block(Np, 2)
    ni, nj, nk = Mp // tm, Np // tn, Kp // tk
    out, stats = pl.pallas_call(
        _matmul_bn_kernel,
        out_shape=(jax.ShapeDtypeStruct((Mp, Np), jnp.float32),
                   jax.ShapeDtypeStruct((8 * ni, Np), jnp.float32)),
        grid=(ni, nj, nk),
        in_specs=[pl.BlockSpec((tm, tk), lambda i, j, k: (i, k)),
                  pl.BlockSpec((tk, tn), lambda i, j, k: (k, j))],
        out_specs=(pl.BlockSpec((tm, tn), lambda i, j, k: (i, j)),
                   pl.BlockSpec((8, tn), lambda i, j, k: (i, j))),
        scratch_shapes=[pltpu.VMEM((tm, tn), jnp.float32)],
        compiler_params=pltpu.CompilerParams(
            dimension_semantics=("parallel", "parallel", "arbitrary")),
    )(a_bf16, b_bf16)
    return out, stats


def _bn_coeffs(stats, count, gamma, beta, eps):
    """Fold per-tile sums into per-channel affine (scale, shift) for BN."""
    st = stats.reshape(-1, 8, stats.shape[-1])
    s = jnp.sum(st[:, 0, :], axis=0)
    sq = jnp.sum(st[:, 1, :], axis=0)
    mean = s / count
    var = jnp.maximum(sq / count - mean * mean, 0.0)
    scale = gamma * jax.lax.rsqrt(var + eps)
    shift = beta - mean * scale
    return (scale.reshape(1, -1).astype(jnp.float32),
            shift.reshape(1, -1).astype(jnp.float32))


# ----------------- fused normalize / add / ReLU (M-tiled) ------------------- #

def _affine_relu_kernel(x_ref, s_ref, h_ref, o_ref):
    y = x_ref[...] * s_ref[...] + h_ref[...]
    o_ref[...] = jnp.maximum(y, 0.0).astype(o_ref.dtype)


def affine_relu(x, scale, shift, *, tm, out_dtype):
    Mp, Np = x.shape
    return pl.pallas_call(
        _affine_relu_kernel,
        out_shape=jax.ShapeDtypeStruct((Mp, Np), out_dtype),
        grid=(Mp // tm,),
        in_specs=[pl.BlockSpec((tm, Np), lambda i: (i, 0)),
                  pl.BlockSpec((1, Np), lambda i: (0, 0)),
                  pl.BlockSpec((1, Np), lambda i: (0, 0))],
        out_specs=pl.BlockSpec((tm, Np), lambda i: (i, 0)),
        compiler_params=pltpu.CompilerParams(
            dimension_semantics=("parallel",)),
    )(x, scale, shift)


def _affine_add_relu_kernel(x_ref, r_ref, sx_ref, hx_ref, sr_ref, hr_ref, o_ref):
    y = (x_ref[...] * sx_ref[...] + hx_ref[...]
         + r_ref[...] * sr_ref[...] + hr_ref[...])
    o_ref[...] = jnp.maximum(y, 0.0)


def affine_add_relu(x, res, sx, hx, sr, hr, *, tm):
    Mp, Np = x.shape
    return pl.pallas_call(
        _affine_add_relu_kernel,
        out_shape=jax.ShapeDtypeStruct((Mp, Np), jnp.float32),
        grid=(Mp // tm,),
        in_specs=[pl.BlockSpec((tm, Np), lambda i: (i, 0)),
                  pl.BlockSpec((tm, Np), lambda i: (i, 0)),
                  pl.BlockSpec((1, Np), lambda i: (0, 0)),
                  pl.BlockSpec((1, Np), lambda i: (0, 0)),
                  pl.BlockSpec((1, Np), lambda i: (0, 0)),
                  pl.BlockSpec((1, Np), lambda i: (0, 0))],
        out_specs=pl.BlockSpec((tm, Np), lambda i: (i, 0)),
        compiler_params=pltpu.CompilerParams(
            dimension_semantics=("parallel",)),
    )(x, res, sx, hx, sr, hr)


# ------------------------------ glue (JAX) --------------------------------- #

def _im2col_3x3(x_nhwc, stride):
    """3x3 patches with padding=1. Returns ((M, 9*C), (N, Ho, Wo))."""
    N, H, W, C = x_nhwc.shape
    xp = jnp.pad(x_nhwc, ((0, 0), (1, 1), (1, 1), (0, 0)))
    Ho = (H - 1) // stride + 1
    Wo = (W - 1) // stride + 1
    cols = []
    for kh in range(3):
        for kw in range(3):
            cols.append(xp[:, kh:kh + stride * (Ho - 1) + 1:stride,
                           kw:kw + stride * (Wo - 1) + 1:stride, :])
    patches = jnp.concatenate(cols, axis=-1)          # (N, Ho, Wo, 9*C)
    return patches.reshape(N * Ho * Wo, 9 * C), (N, Ho, Wo)


def _prep_w3x3(w, cin_p, cout_p):
    cout, cin = w.shape[0], w.shape[1]
    wp = jnp.pad(w, ((0, cout_p - cout), (0, cin_p - cin), (0, 0), (0, 0)))
    return jnp.transpose(wp, (2, 3, 1, 0)).reshape(9 * cin_p, cout_p)


def _prep_w1x1(w, cin_p, cout_p):
    cout, cin = w.shape[0], w.shape[1]
    wp = jnp.pad(w, ((0, cout_p - cout), (0, cin_p - cin), (0, 0), (0, 0)))
    return jnp.transpose(wp, (2, 3, 1, 0)).reshape(cin_p, cout_p)


def _pad_rows(a, mp):
    return jnp.pad(a, ((0, mp - a.shape[0]), (0, 0)))


def _pad_vec(v, cp):
    return jnp.pad(v, (0, cp - v.shape[0])).astype(jnp.float32)


def residual_forward(x_nchw, params, *, stride=1, eps=1e-5):
    x = jnp.transpose(x_nchw, (0, 2, 3, 1)).astype(jnp.float32)   # NHWC
    N, H, W, Cin = x.shape
    Cout = params["w1"].shape[0]
    has_proj = "ws" in params
    if not has_proj and (stride != 1 or Cin != Cout):
        raise ValueError("identity skip requires stride == 1 and inp_dim == out_dim")

    cin_p = _round_up(Cin, LANE)     # lane-dense channels
    cout_p = _round_up(Cout, LANE)
    x_p = jnp.pad(x, ((0, 0), (0, 0), (0, 0), (0, cin_p - Cin)))

    # ---- conv1 (3x3, stride, pad 1) as im2col matmul; BN1 stats fused ----
    a1, (n, ho, wo) = _im2col_3x3(x_p, stride)
    M = n * ho * wo
    tm = min(512, _round_up(M, 16))
    Mp = _round_up(M, tm)
    a1 = _pad_rows(a1, Mp).astype(jnp.bfloat16)
    w1m = _prep_w3x3(params["w1"], cin_p, cout_p).astype(jnp.bfloat16)
    c1, st1 = matmul_bn(a1, w1m, tm=tm)
    s1, h1 = _bn_coeffs(st1, M, _pad_vec(params["g1"], cout_p),
                        _pad_vec(params["b1"], cout_p), eps)

    # ---- BN1 normalize + ReLU (tiled streaming); bf16 output feeds conv2 ----
    r1 = affine_relu(c1, s1, h1, tm=tm, out_dtype=jnp.bfloat16)

    # ---- conv2 (3x3, stride 1, pad 1); BN2 stats fused ----
    r1_img = r1[:M].reshape(n, ho, wo, cout_p)
    a2, _ = _im2col_3x3(r1_img, 1)
    a2 = _pad_rows(a2, Mp).astype(jnp.bfloat16)
    w2m = _prep_w3x3(params["w2"], cout_p, cout_p).astype(jnp.bfloat16)
    c2, st2 = matmul_bn(a2, w2m, tm=tm)
    s2, h2 = _bn_coeffs(st2, M, _pad_vec(params["g2"], cout_p),
                        _pad_vec(params["b2"], cout_p), eps)

    # ---- skip path: 1x1 conv + BN (stats fused) or identity ----
    if has_proj:
        xs = x_p[:, ::stride, ::stride, :].reshape(M, cin_p)
        xs = _pad_rows(xs, Mp).astype(jnp.bfloat16)
        wsm = _prep_w1x1(params["ws"], cin_p, cout_p).astype(jnp.bfloat16)
        cs, sts = matmul_bn(xs, wsm, tm=tm)
        ss, hs = _bn_coeffs(sts, M, _pad_vec(params["gs"], cout_p),
                            _pad_vec(params["bs"], cout_p), eps)
        res = cs
    else:
        res = _pad_rows(x_p.reshape(M, cin_p), Mp)       # cin_p == cout_p
        ss = jnp.ones((1, cout_p), jnp.float32)
        hs = jnp.zeros((1, cout_p), jnp.float32)

    # ---- BN2 + skip-BN + residual add + ReLU fused, tiled over M ----
    out = affine_add_relu(c2, res, s2, h2, ss, hs, tm=tm)
    out = out[:M, :Cout].reshape(n, ho, wo, Cout)
    return jnp.transpose(out, (0, 3, 1, 2))              # back to NCHW


# --------------------------- pure-JAX reference ----------------------------- #

def _reference(x_nchw, params, *, stride=1, eps=1e-5):
    def conv(x, w, s, pad):
        return jax.lax.conv_general_dilated(
            x, w, (s, s), ((pad, pad), (pad, pad)),
            dimension_numbers=("NCHW", "OIHW", "NCHW"))

    def bn(x, g, b):
        mean = x.mean(axis=(0, 2, 3), keepdims=True)
        var = jnp.square(x - mean).mean(axis=(0, 2, 3), keepdims=True)
        return ((x - mean) * jax.lax.rsqrt(var + eps)
                * g.reshape(1, -1, 1, 1) + b.reshape(1, -1, 1, 1))

    c1 = conv(x_nchw, params["w1"], stride, 1)
    r1 = jnp.maximum(bn(c1, params["g1"], params["b1"]), 0.0)
    c2 = conv(r1, params["w2"], 1, 1)
    b2 = bn(c2, params["g2"], params["b2"])
    if "ws" in params:
        s = bn(conv(x_nchw, params["ws"], stride, 0), params["gs"], params["bs"])
    else:
        s = x_nchw
    return jnp.maximum(b2 + s, 0.0)


# ---------------------------------- main ------------------------------------ #

def make_params(key, inp_dim, out_dim, stride):
    keys = jax.random.split(key, 9)
    params = {
        "w1": 0.1 * jax.random.normal(keys[0], (out_dim, inp_dim, 3, 3), jnp.float32),
        "g1": 1.0 + 0.1 * jax.random.normal(keys[1], (out_dim,), jnp.float32),
        "b1": 0.1 * jax.random.normal(keys[2], (out_dim,), jnp.float32),
        "w2": 0.1 * jax.random.normal(keys[3], (out_dim, out_dim, 3, 3), jnp.float32),
        "g2": 1.0 + 0.1 * jax.random.normal(keys[4], (out_dim,), jnp.float32),
        "b2": 0.1 * jax.random.normal(keys[5], (out_dim,), jnp.float32),
    }
    if stride != 1 or inp_dim != out_dim:
        params["ws"] = 0.1 * jax.random.normal(keys[6], (out_dim, inp_dim, 1, 1), jnp.float32)
        params["gs"] = 1.0 + 0.1 * jax.random.normal(keys[7], (out_dim,), jnp.float32)
        params["bs"] = 0.1 * jax.random.normal(keys[8], (out_dim,), jnp.float32)
    return params


if __name__ == "__main__":
    N, H, W = 2, 16, 16
    configs = [
        ("projection skip", 4, 8, 1),
        ("identity skip", 8, 8, 1),
        ("strided projection skip", 4, 8, 2),
    ]
    key = jax.random.PRNGKey(0)
    for name, inp_dim, out_dim, stride in configs:
        key, pkey, xkey = jax.random.split(key, 3)
        params = make_params(pkey, inp_dim, out_dim, stride)
        x = jax.random.normal(xkey, (N, inp_dim, H, W), jnp.float32)

        fwd = jax.jit(functools.partial(residual_forward, stride=stride))
        out = jax.block_until_ready(fwd(x, params))

        ref = _reference(x, params, stride=stride)
        ho = (H - 1) // stride + 1
        wo = (W - 1) // stride + 1
        assert out.shape == ref.shape == (N, out_dim, ho, wo)
        # bf16 MXU operands (vs f32 reference convs) -> loosened tolerance.
        assert jnp.allclose(out, ref, rtol=5e-2, atol=5e-2), f"mismatch vs reference ({name})"

    print("KERNEL_OK")
</pallas_src>

<mosaic_0001>
module attributes {stable_mosaic.version = 11 : i64} {
  func.func @_matmul_bn_kernel(%arg0: i32, %arg1: i32, %arg2: i32, %arg3: memref<512x384xbf16, #tpu.memory_space<vmem>>, %arg4: memref<384x128xbf16, #tpu.memory_space<vmem>>, %arg5: memref<512x128xf32, #tpu.memory_space<vmem>>, %arg6: memref<8x128xf32, #tpu.memory_space<vmem>>, %arg7: memref<512x128xf32, #tpu.memory_space<vmem>>) attributes {dimension_semantics = [#tpu.dimension_semantics<parallel>, #tpu.dimension_semantics<parallel>, #tpu.dimension_semantics<arbitrary>], iteration_bounds = array<i64: 1, 1, 3>, scalar_prefetch = 0 : i64, scratch_operands = 1 : i64, tpu.core_type = #tpu.core_type<tc>, window_params = [{transform_indices = @transform_0, window_bounds = array<i64: 512, 384>}, {transform_indices = @transform_1, window_bounds = array<i64: 384, 128>}, {transform_indices = @transform_2, window_bounds = array<i64: 512, 128>}, {transform_indices = @transform_3, window_bounds = array<i64: 8, 128>}]} {
    %c0_i32 = arith.constant 0 : i32
    %0 = arith.cmpi eq, %arg2, %c0_i32 : i32
    %1 = arith.extui %0 : i1 to i32
    %c0_i32_0 = arith.constant 0 : i32
    %2 = arith.cmpi ne, %1, %c0_i32_0 : i32
    scf.if %2 {
      %cst_9 = arith.constant 0.000000e+00 : f32
      %12 = vector.broadcast %cst_9 : f32 to vector<512x128xf32>
      %c0_10 = arith.constant 0 : index
      %c0_11 = arith.constant 0 : index
      %13 = vector.load %arg7[%c0_10, %c0_11] : memref<512x128xf32, #tpu.memory_space<vmem>>, vector<512x128xf32>
      tpu.vector_store %arg7[%c0_10, %c0_11], %12 {strides = array<i32>} : memref<512x128xf32, #tpu.memory_space<vmem>>, vector<512x128xf32>,
    } else {
    }
    %c0 = arith.constant 0 : index
    %c0_1 = arith.constant 0 : index
    %3 = vector.load %arg7[%c0, %c0_1] : memref<512x128xf32, #tpu.memory_space<vmem>>, vector<512x128xf32>
    %c0_2 = arith.constant 0 : index
    %c0_3 = arith.constant 0 : index
    %4 = vector.load %arg3[%c0_2, %c0_3] : memref<512x384xbf16, #tpu.memory_space<vmem>>, vector<512x384xbf16>
    %c0_4 = arith.constant 0 : index
    %c0_5 = arith.constant 0 : index
    %5 = vector.load %arg4[%c0_4, %c0_5] : memref<384x128xbf16, #tpu.memory_space<vmem>>, vector<384x128xbf16>
    %cst = arith.constant dense<0.000000e+00> : vector<512x128xf32>
    %6 = tpu.matmul %4, %5, %cst {dimension_numbers = #tpu.dot_dimension_numbers<[1], [0], [0], [1], [0, 0, 1, 1], [], []>} : vector<512x384xbf16>, vector<384x128xbf16>, vector<512x128xf32> -> vector<512x128xf32>
    %7 = arith.addf %3, %6 : vector<512x128xf32>
    %c0_6 = arith.constant 0 : index
    %c0_7 = arith.constant 0 : index
    %8 = vector.load %arg7[%c0_6, %c0_7] : memref<512x128xf32, #tpu.memory_space<vmem>>, vector<512x128xf32>
    tpu.vector_store %arg7[%c0_6, %c0_7], %7 {strides = array<i32>} : memref<512x128xf32, #tpu.memory_space<vmem>>, vector<512x128xf32>,
    %c2_i32 = arith.constant 2 : i32
    %9 = arith.cmpi eq, %arg2, %c2_i32 : i32
    %10 = arith.extui %9 : i1 to i32
    %c0_i32_8 = arith.constant 0 : i32
    %11 = arith.cmpi ne, %10, %c0_i32_8 : i32
    scf.if %11 {
      %c0_9 = arith.constant 0 : index
      %c0_10 = arith.constant 0 : index
      %12 = vector.load %arg7[%c0_9, %c0_10] : memref<512x128xf32, #tpu.memory_space<vmem>>, vector<512x128xf32>
      %c0_11 = arith.constant 0 : index
      %c0_12 = arith.constant 0 : index
      %13 = vector.load %arg5[%c0_11, %c0_12] : memref<512x128xf32, #tpu.memory_space<vmem>>, vector<512x128xf32>
      tpu.vector_store %arg5[%c0_11, %c0_12], %12 {strides = array<i32>} : memref<512x128xf32, #tpu.memory_space<vmem>>, vector<512x128xf32>,
      %cst_13 = arith.constant dense<0.000000e+00> : vector<128xf32>
      %14 = vector.multi_reduction <add>, %12, %cst_13 [0] : vector<512x128xf32> to vector<128xf32>
      %15 = vector.shape_cast %14 : vector<128xf32> to vector<1x128xf32>
      %c0_14 = arith.constant 0 : index
      %c0_15 = arith.constant 0 : index
      %16 = vector.load %arg6[%c0_14, %c0_15] : memref<8x128xf32, #tpu.memory_space<vmem>>, vector<1x128xf32>
      tpu.vector_store %arg6[%c0_14, %c0_15], %15 {strides = array<i32>} : memref<8x128xf32, #tpu.memory_space<vmem>>, vector<1x128xf32>,
      %17 = arith.mulf %12, %12 : vector<512x128xf32>
      %cst_16 = arith.constant dense<0.000000e+00> : vector<128xf32>
      %18 = vector.multi_reduction <add>, %17, %cst_16 [0] : vector<512x128xf32> to vector<128xf32>
      %19 = vector.shape_cast %18 : vector<128xf32> to vector<1x128xf32>
      %c1 = arith.constant 1 : index
      %c0_17 = arith.constant 0 : index
      %20 = vector.load %arg6[%c1, %c0_17] : memref<8x128xf32, #tpu.memory_space<vmem>>, vector<1x128xf32>
      tpu.vector_store %arg6[%c1, %c0_17], %19 {strides = array<i32>} : memref<8x128xf32, #tpu.memory_space<vmem>>, vector<1x128xf32>,
      %cst_18 = arith.constant 0.000000e+00 : f32
      %21 = vector.broadcast %cst_18 : f32 to vector<6x128xf32>
      %c2 = arith.constant 2 : index
      %c0_19 = arith.constant 0 : index
      %22 = vector.load %arg6[%c2, %c0_19] : memref<8x128xf32, #tpu.memory_space<vmem>>, vector<6x128xf32>
      tpu.vector_store %arg6[%c2, %c0_19], %21 {strides = array<i32>} : memref<8x128xf32, #tpu.memory_space<vmem>>, vector<6x128xf32>,
    } else {
    }
    return
  }
  func.func @transform_0(%arg0: i32, %arg1: i32, %arg2: i32) -> (i32, i32) {
    %c0_i32 = arith.constant 0 : i32
    return %arg0, %arg2 : i32, i32
  }
  func.func @transform_1(%arg0: i32, %arg1: i32, %arg2: i32) -> (i32, i32) {
    %c0_i32 = arith.constant 0 : i32
    return %arg2, %arg1 : i32, i32
  }
  func.func @transform_2(%arg0: i32, %arg1: i32, %arg2: i32) -> (i32, i32) {
    %c0_i32 = arith.constant 0 : i32
    return %arg0, %arg1 : i32, i32
  }
  func.func @transform_3(%arg0: i32, %arg1: i32, %arg2: i32) -> (i32, i32) {
    %c0_i32 = arith.constant 0 : i32
    return %arg0, %arg1 : i32, i32
  }
}

module attributes {stable_mosaic.version = 11 : i64} {
  func.func @_affine_relu_kernel(%arg0: i32, %arg1: memref<512x128xf32, #tpu.memory_space<vmem>>, %arg2: memref<1x128xf32, #tpu.memory_space<vmem>>, %arg3: memref<1x128xf32, #tpu.memory_space<vmem>>, %arg4: memref<512x128xbf16, #tpu.memory_space<vmem>>) attributes {dimension_semantics = [#tpu.dimension_semantics<parallel>], iteration_bounds = array<i64: 1>, scalar_prefetch = 0 : i64, scratch_operands = 0 : i64, tpu.core_type = #tpu.core_type<tc>, window_params = [{transform_indices = @transform_0, window_bounds = array<i64: 512, 128>}, {pipeline_mode = #tpu.pipeline_mode<synchronous>, transform_indices = @transform_1, window_bounds = array<i64: 1, 128>}, {pipeline_mode = #tpu.pipeline_mode<synchronous>, transform_indices = @transform_2, window_bounds = array<i64: 1, 128>}, {transform_indices = @transform_3, window_bounds = array<i64: 512, 128>}]} {
    %c0 = arith.constant 0 : index
    %c0_0 = arith.constant 0 : index
    %0 = vector.load %arg1[%c0, %c0_0] : memref<512x128xf32, #tpu.memory_space<vmem>>, vector<512x128xf32>
    %c0_1 = arith.constant 0 : index
    %c0_2 = arith.constant 0 : index
    %1 = vector.load %arg2[%c0_1, %c0_2] : memref<1x128xf32, #tpu.memory_space<vmem>>, vector<1x128xf32>
    %2 = vector.broadcast %1 : vector<1x128xf32> to vector<512x128xf32>
    %3 = arith.mulf %0, %2 : vector<512x128xf32>
    %c0_3 = arith.constant 0 : index
    %c0_4 = arith.constant 0 : index
    %4 = vector.load %arg3[%c0_3, %c0_4] : memref<1x128xf32, #tpu.memory_space<vmem>>, vector<1x128xf32>
    %5 = vector.broadcast %4 : vector<1x128xf32> to vector<512x128xf32>
    %6 = arith.addf %3, %5 : vector<512x128xf32>
    %cst = arith.constant 0.000000e+00 : f32
    %7 = vector.broadcast %cst : f32 to vector<512x128xf32>
    %8 = arith.maximumf %6, %7 : vector<512x128xf32>
    %9 = arith.truncf %8 : vector<512x128xf32> to vector<512x128xbf16>
    %c0_5 = arith.constant 0 : index
    %c0_6 = arith.constant 0 : index
    %10 = vector.load %arg4[%c0_5, %c0_6] : memref<512x128xbf16, #tpu.memory_space<vmem>>, vector<512x128xbf16>
    tpu.vector_store %arg4[%c0_5, %c0_6], %9 {strides = array<i32>} : memref<512x128xbf16, #tpu.memory_space<vmem>>, vector<512x128xbf16>,
    return
  }
  func.func @transform_0(%arg0: i32) -> (i32, i32) {
    %c0_i32 = arith.constant 0 : i32
    %c0_i32_0 = arith.constant 0 : i32
    return %arg0, %c0_i32 : i32, i32
  }
  func.func @transform_1(%arg0: i32) -> (i32, i32) {
    %c0_i32 = arith.constant 0 : i32
    %c0_i32_0 = arith.constant 0 : i32
    %c0_i32_1 = arith.constant 0 : i32
    return %c0_i32, %c0_i32_0 : i32, i32
  }
  func.func @transform_2(%arg0: i32) -> (i32, i32) {
    %c0_i32 = arith.constant 0 : i32
    %c0_i32_0 = arith.constant 0 : i32
    %c0_i32_1 = arith.constant 0 : i32
    return %c0_i32, %c0_i32_0 : i32, i32
  }
  func.func @transform_3(%arg0: i32) -> (i32, i32) {
    %c0_i32 = arith.constant 0 : i32
    %c0_i32_0 = arith.constant 0 : i32
    return %arg0, %c0_i32 : i32, i32
  }
}

module attributes {stable_mosaic.version = 11 : i64} {
  func.func @_affine_add_relu_kernel(%arg0: i32, %arg1: memref<512x128xf32, #tpu.memory_space<vmem>>, %arg2: memref<512x128xf32, #tpu.memory_space<vmem>>, %arg3: memref<1x128xf32, #tpu.memory_space<vmem>>, %arg4: memref<1x128xf32, #tpu.memory_space<vmem>>, %arg5: memref<1x128xf32, #tpu.memory_space<vmem>>, %arg6: memref<1x128xf32, #tpu.memory_space<vmem>>, %arg7: memref<512x128xf32, #tpu.memory_space<vmem>>) attributes {dimension_semantics = [#tpu.dimension_semantics<parallel>], iteration_bounds = array<i64: 1>, scalar_prefetch = 0 : i64, scratch_operands = 0 : i64, tpu.core_type = #tpu.core_type<tc>, window_params = [{transform_indices = @transform_0, window_bounds = array<i64: 512, 128>}, {transform_indices = @transform_1, window_bounds = array<i64: 512, 128>}, {pipeline_mode = #tpu.pipeline_mode<synchronous>, transform_indices = @transform_2, window_bounds = array<i64: 1, 128>}, {pipeline_mode = #tpu.pipeline_mode<synchronous>, transform_indices = @transform_3, window_bounds = array<i64: 1, 128>}, {pipeline_mode = #tpu.pipeline_mode<synchronous>, transform_indices = @transform_4, window_bounds = array<i64: 1, 128>}, {pipeline_mode = #tpu.pipeline_mode<synchronous>, transform_indices = @transform_5, window_bounds = array<i64: 1, 128>}, {transform_indices = @transform_6, window_bounds = array<i64: 512, 128>}]} {
    %c0 = arith.constant 0 : index
    %c0_0 = arith.constant 0 : index
    %0 = vector.load %arg1[%c0, %c0_0] : memref<512x128xf32, #tpu.memory_space<vmem>>, vector<512x128xf32>
    %c0_1 = arith.constant 0 : index
    %c0_2 = arith.constant 0 : index
    %1 = vector.load %arg3[%c0_1, %c0_2] : memref<1x128xf32, #tpu.memory_space<vmem>>, vector<1x128xf32>
    %2 = vector.broadcast %1 : vector<1x128xf32> to vector<512x128xf32>
    %3 = arith.mulf %0, %2 : vector<512x128xf32>
    %c0_3 = arith.constant 0 : index
    %c0_4 = arith.constant 0 : index
    %4 = vector.load %arg4[%c0_3, %c0_4] : memref<1x128xf32, #tpu.memory_space<vmem>>, vector<1x128xf32>
    %5 = vector.broadcast %4 : vector<1x128xf32> to vector<512x128xf32>
    %6 = arith.addf %3, %5 : vector<512x128xf32>
    %c0_5 = arith.constant 0 : index
    %c0_6 = arith.constant 0 : index
    %7 = vector.load %arg2[%c0_5, %c0_6] : memref<512x128xf32, #tpu.memory_space<vmem>>, vector<512x128xf32>
    %c0_7 = arith.constant 0 : index
    %c0_8 = arith.constant 0 : index
    %8 = vector.load %arg5[%c0_7, %c0_8] : memref<1x128xf32, #tpu.memory_space<vmem>>, vector<1x128xf32>
    %9 = vector.broadcast %8 : vector<1x128xf32> to vector<512x128xf32>
    %10 = arith.mulf %7, %9 : vector<512x128xf32>
    %11 = arith.addf %6, %10 : vector<512x128xf32>
    %c0_9 = arith.constant 0 : index
    %c0_10 = arith.constant 0 : index
    %12 = vector.load %arg6[%c0_9, %c0_10] : memref<1x128xf32, #tpu.memory_space<vmem>>, vector<1x128xf32>
    %13 = vector.broadcast %12 : vector<1x128xf32> to vector<512x128xf32>
    %14 = arith.addf %11, %13 : vector<512x128xf32>
    %cst = arith.constant 0.000000e+00 : f32
    %15 = vector.broadcast %cst : f32 to vector<512x128xf32>
    %16 = arith.maximumf %14, %15 : vector<512x128xf32>
    %c0_11 = arith.constant 0 : index
    %c0_12 = arith.constant 0 : index
    %17 = vector.load %arg7[%c0_11, %c0_12] : memref<512x128xf32, #tpu.memory_space<vmem>>, vector<512x128xf32>
    tpu.vector_store %arg7[%c0_11, %c0_12], %16 {strides = array<i32>} : memref<512x128xf32, #tpu.memory_space<vmem>>, vector<512x128xf32>,
    return
  }
  func.func @transform_0(%arg0: i32) -> (i32, i32) {
    %c0_i32 = arith.constant 0 : i32
    %c0_i32_0 = arith.constant 0 : i32
    return %arg0, %c0_i32 : i32, i32
  }
  func.func @transform_1(%arg0: i32) -> (i32, i32) {
    %c0_i32 = arith.constant 0 : i32
    %c0_i32_0 = arith.constant 0 : i32
    return %arg0, %c0_i32 : i32, i32
  }
  func.func @transform_2(%arg0: i32) -> (i32, i32) {
    %c0_i32 = arith.constant 0 : i32
    %c0_i32_0 = arith.constant 0 : i32
    %c0_i32_1 = arith.constant 0 : i32
    return %c0_i32, %c0_i32_0 : i32, i32
  }
  func.func @transform_3(%arg0: i32) -> (i32, i32) {
    %c0_i32 = arith.constant 0 : i32
    %c0_i32_0 = arith.constant 0 : i32
    %c0_i32_1 = arith.constant 0 : i32
    return %c0_i32, %c0_i32_0 : i32, i32
  }
  func.func @transform_4(%arg0: i32) -> (i32, i32) {
    %c0_i32 = arith.constant 0 : i32
    %c0_i32_0 = arith.constant 0 : i32
    %c0_i32_1 = arith.constant 0 : i32
    return %c0_i32, %c0_i32_0 : i32, i32
  }
  func.func @transform_5(%arg0: i32) -> (i32, i32) {
    %c0_i32 = arith.constant 0 : i32
    %c0_i32_0 = arith.constant 0 : i32
    %c0_i32_1 = arith.constant 0 : i32
    return %c0_i32, %c0_i32_0 : i32, i32
  }
  func.func @transform_6(%arg0: i32) -> (i32, i32) {
    %c0_i32 = arith.constant 0 : i32
    %c0_i32_0 = arith.constant 0 : i32
    return %arg0, %c0_i32 : i32, i32
  }
}

module attributes {stable_mosaic.version = 11 : i64} {
  func.func @_matmul_bn_kernel(%arg0: i32, %arg1: i32, %arg2: i32, %arg3: memref<512x128xbf16, #tpu.memory_space<vmem>>, %arg4: memref<128x128xbf16, #tpu.memory_space<vmem>>, %arg5: memref<512x128xf32, #tpu.memory_space<vmem>>, %arg6: memref<8x128xf32, #tpu.memory_space<vmem>>, %arg7: memref<512x128xf32, #tpu.memory_space<vmem>>) attributes {dimension_semantics = [#tpu.dimension_semantics<parallel>, #tpu.dimension_semantics<parallel>, #tpu.dimension_semantics<arbitrary>], iteration_bounds = array<i64: 1, 1, 1>, scalar_prefetch = 0 : i64, scratch_operands = 1 : i64, tpu.core_type = #tpu.core_type<tc>, window_params = [{transform_indices = @transform_0, window_bounds = array<i64: 512, 128>}, {transform_indices = @transform_1, window_bounds = array<i64: 128, 128>}, {transform_indices = @transform_2, window_bounds = array<i64: 512, 128>}, {transform_indices = @transform_3, window_bounds = array<i64: 8, 128>}]} {
    %c0_i32 = arith.constant 0 : i32
    %0 = arith.cmpi eq, %arg2, %c0_i32 : i32
    %1 = arith.extui %0 : i1 to i32
    %c0_i32_0 = arith.constant 0 : i32
    %2 = arith.cmpi ne, %1, %c0_i32_0 : i32
    scf.if %2 {
      %cst_10 = arith.constant 0.000000e+00 : f32
      %12 = vector.broadcast %cst_10 : f32 to vector<512x128xf32>
      %c0_11 = arith.constant 0 : index
      %c0_12 = arith.constant 0 : index
      %13 = vector.load %arg7[%c0_11, %c0_12] : memref<512x128xf32, #tpu.memory_space<vmem>>, vector<512x128xf32>
      tpu.vector_store %arg7[%c0_11, %c0_12], %12 {strides = array<i32>} : memref<512x128xf32, #tpu.memory_space<vmem>>, vector<512x128xf32>,
    } else {
    }
    %c0 = arith.constant 0 : index
    %c0_1 = arith.constant 0 : index
    %3 = vector.load %arg7[%c0, %c0_1] : memref<512x128xf32, #tpu.memory_space<vmem>>, vector<512x128xf32>
    %c0_2 = arith.constant 0 : index
    %c0_3 = arith.constant 0 : index
    %4 = vector.load %arg3[%c0_2, %c0_3] : memref<512x128xbf16, #tpu.memory_space<vmem>>, vector<512x128xbf16>
    %c0_4 = arith.constant 0 : index
    %c0_5 = arith.constant 0 : index
    %5 = vector.load %arg4[%c0_4, %c0_5] : memref<128x128xbf16, #tpu.memory_space<vmem>>, vector<128x128xbf16>
    %cst = arith.constant dense<0.000000e+00> : vector<512x128xf32>
    %6 = tpu.matmul %4, %5, %cst {dimension_numbers = #tpu.dot_dimension_numbers<[1], [0], [0], [1], [0, 0, 1, 1], [], []>} : vector<512x128xbf16>, vector<128x128xbf16>, vector<512x128xf32> -> vector<512x128xf32>
    %7 = arith.addf %3, %6 : vector<512x128xf32>
    %c0_6 = arith.constant 0 : index
    %c0_7 = arith.constant 0 : index
    %8 = vector.load %arg7[%c0_6, %c0_7] : memref<512x128xf32, #tpu.memory_space<vmem>>, vector<512x128xf32>
    tpu.vector_store %arg7[%c0_6, %c0_7], %7 {strides = array<i32>} : memref<512x128xf32, #tpu.memory_space<vmem>>, vector<512x128xf32>,
    %c0_i32_8 = arith.constant 0 : i32
    %9 = arith.cmpi eq, %arg2, %c0_i32_8 : i32
    %10 = arith.extui %9 : i1 to i32
    %c0_i32_9 = arith.constant 0 : i32
    %11 = arith.cmpi ne, %10, %c0_i32_9 : i32
    scf.if %11 {
      %c0_10 = arith.constant 0 : index
      %c0_11 = arith.constant 0 : index
      %12 = vector.load %arg7[%c0_10, %c0_11] : memref<512x128xf32, #tpu.memory_space<vmem>>, vector<512x128xf32>
      %c0_12 = arith.constant 0 : index
      %c0_13 = arith.constant 0 : index
      %13 = vector.load %arg5[%c0_12, %c0_13] : memref<512x128xf32, #tpu.memory_space<vmem>>, vector<512x128xf32>
      tpu.vector_store %arg5[%c0_12, %c0_13], %12 {strides = array<i32>} : memref<512x128xf32, #tpu.memory_space<vmem>>, vector<512x128xf32>,
      %cst_14 = arith.constant dense<0.000000e+00> : vector<128xf32>
      %14 = vector.multi_reduction <add>, %12, %cst_14 [0] : vector<512x128xf32> to vector<128xf32>
      %15 = vector.shape_cast %14 : vector<128xf32> to vector<1x128xf32>
      %c0_15 = arith.constant 0 : index
      %c0_16 = arith.constant 0 : index
      %16 = vector.load %arg6[%c0_15, %c0_16] : memref<8x128xf32, #tpu.memory_space<vmem>>, vector<1x128xf32>
      tpu.vector_store %arg6[%c0_15, %c0_16], %15 {strides = array<i32>} : memref<8x128xf32, #tpu.memory_space<vmem>>, vector<1x128xf32>,
      %17 = arith.mulf %12, %12 : vector<512x128xf32>
      %cst_17 = arith.constant dense<0.000000e+00> : vector<128xf32>
      %18 = vector.multi_reduction <add>, %17, %cst_17 [0] : vector<512x128xf32> to vector<128xf32>
      %19 = vector.shape_cast %18 : vector<128xf32> to vector<1x128xf32>
      %c1 = arith.constant 1 : index
      %c0_18 = arith.constant 0 : index
      %20 = vector.load %arg6[%c1, %c0_18] : memref<8x128xf32, #tpu.memory_space<vmem>>, vector<1x128xf32>
      tpu.vector_store %arg6[%c1, %c0_18], %19 {strides = array<i32>} : memref<8x128xf32, #tpu.memory_space<vmem>>, vector<1x128xf32>,
      %cst_19 = arith.constant 0.000000e+00 : f32
      %21 = vector.broadcast %cst_19 : f32 to vector<6x128xf32>
      %c2 = arith.constant 2 : index
      %c0_20 = arith.constant 0 : index
      %22 = vector.load %arg6[%c2, %c0_20] : memref<8x128xf32, #tpu.memory_space<vmem>>, vector<6x128xf32>
      tpu.vector_store %arg6[%c2, %c0_20], %21 {strides = array<i32>} : memref<8x128xf32, #tpu.memory_space<vmem>>, vector<6x128xf32>,
    } else {
    }
    return
  }
  func.func @transform_0(%arg0: i32, %arg1: i32, %arg2: i32) -> (i32, i32) {
    %c0_i32 = arith.constant 0 : i32
    return %arg0, %arg2 : i32, i32
  }
  func.func @transform_1(%arg0: i32, %arg1: i32, %arg2: i32) -> (i32, i32) {
    %c0_i32 = arith.constant 0 : i32
    return %arg2, %arg1 : i32, i32
  }
  func.func @transform_2(%arg0: i32, %arg1: i32, %arg2: i32) -> (i32, i32) {
    %c0_i32 = arith.constant 0 : i32
    return %arg0, %arg1 : i32, i32
  }
  func.func @transform_3(%arg0: i32, %arg1: i32, %arg2: i32) -> (i32, i32) {
    %c0_i32 = arith.constant 0 : i32
    return %arg0, %arg1 : i32, i32
  }
}

</mosaic_0001>

<bundles_post_ra>
// kernel: residual_forward.6
= control target key start
LH: loop header
LB: loop body
LE: loop exit
PB: predicated region body
PF: predicated region fallthrough
CT: control target
= control target key end

     0   :  { %s1375_s0 = inlined_call_operand.vmem [shape: f32[512,128], index: 0, kind: input, shape index: {}]   ;;  %s1376_s1 = inlined_call_operand.vmem [shape: f32[1,128], index: 1, kind: input, shape index: {}]   ;;  %s1377_s2 = inlined_call_operand.vmem [shape: f32[1,128], index: 2, kind: input, shape index: {}]   ;;  %s1378_s3 = inlined_call_operand.vmem [shape: bf16[512,128], index: 3, kind: output, shape index: {}]  }
   0x1   :  { %v14_v0 = vld [vmem:[%s1375_s0] sm:$0xff]  ;;  %v15_v1 = vld [vmem:[%s1375_s0 + $0x8] sm:$0xff]  ;;  %v16_v6 = vld [vmem:[%s1375_s0 + $0x10] sm:$0xff] }
   0x2   :  { %v958_v2 = vld [vmem:[%s1376_s1] ss:$0 sm:$0xff]  ;;  %v17_v7 = vld [vmem:[%s1375_s0 + $0x18] sm:$0xff]  ;;  %v19_v11 = vld [vmem:[%s1375_s0 + $0x28] sm:$0xff] }
   0x3   :  { %v85_v3 = vmul.f32 %v958_v2, %v14_v0  ;;  %v86_v4 = vmul.f32 %v958_v2, %v15_v1  ;;  %v965_v5 = vld [vmem:[%s1377_s2] ss:$0 sm:$0xff]  ;;  %v87_v8 = vmul.f32 %v958_v2, %v16_v6  ;;  %v88_v9 = vmul.f32 %v958_v2, %v17_v7  ;;  %v20_v12 = vld [vmem:[%s1375_s0 + $0x30] sm:$0xff]  ;;  %v21_v17 = vld [vmem:[%s1375_s0 + $0x38] sm:$0xff] }
   0x4   :  { %v18_v10 = vld [vmem:[%s1375_s0 + $0x20] sm:$0xff]  ;;  %v90_v16 = vmul.f32 %v958_v2, %v19_v11  ;;  %v91_v20 = vmul.f32 %v958_v2, %v20_v12  ;;  %v92_v21 = vmul.f32 %v958_v2, %v21_v17  ;;  %v23_v27 = vld [vmem:[%s1375_s0 + $0x48] sm:$0xff]  ;;  %v24_v32 = vld [vmem:[%s1375_s0 + $0x50] sm:$0xff] }
   0x5   :  { %v156_v13 = vadd.f32 %v965_v5, %v85_v3  ;;  %v157_v14 = vadd.f32 %v965_v5, %v86_v4  ;;  %v89_v15 = vmul.f32 %v958_v2, %v18_v10  ;;  %v158_v18 = vadd.f32 %v965_v5, %v87_v8  ;;  %v22_v22 = vld [vmem:[%s1375_s0 + $0x40] sm:$0xff]  ;;  %v25_v33 = vld [vmem:[%s1375_s0 + $0x58] sm:$0xff]  ;;  %v27_v39 = vld [vmem:[%s1375_s0 + $0x68] sm:$0xff] }
   0x6   :  { %v159_v19 = vadd.f32 %v965_v5, %v88_v9  ;;  %v161_v26 = vadd.f32 %v965_v5, %v90_v16  ;;  %v162_v30 = vadd.f32 %v965_v5, %v91_v20  ;;  %v163_v31 = vadd.f32 %v965_v5, %v92_v21  ;;  %v26_v38 = vld [vmem:[%s1375_s0 + $0x60] sm:$0xff]  ;;  %v28_v44 = vld [vmem:[%s1375_s0 + $0x70] sm:$0xff]  ;;  %v29_v49 = vld [vmem:[%s1375_s0 + $0x78] sm:$0xff] }
   0x7   :  { %v220_v23 = vmax.f32 %v156_v13, 0.0  ;;  %v221_v24 = vmax.f32 %v157_v14, 0.0  ;;  %v160_v25 = vadd.f32 %v965_v5, %v89_v15  ;;  %v222_v28 = vmax.f32 %v158_v18, 0.0  ;;  %v30_v54 = vld [vmem:[%s1375_s0 + $0x80] sm:$0xff]  ;;  %v31_v63 = vld [vmem:[%s1375_s0 + $0x88] sm:$0xff]  ;;  %v32_v6 = vld [vmem:[%s1375_s0 + $0x90] sm:$0xff] }
   0x8   :  { %v223_v29 = vmax.f32 %v159_v19, 0.0  ;;  %v225_v36 = vmax.f32 %v161_v26, 0.0  ;;  %v93_v37 = vmul.f32 %v958_v2, %v22_v22  ;;  %v226_v41 = vmax.f32 %v162_v30, 0.0  ;;  %v33_v7 = vld [vmem:[%s1375_s0 + $0x98] sm:$0xff]  ;;  %v34_v12 = vld [vmem:[%s1375_s0 + $0xa0] sm:$0xff]  ;;  %v35_v13 = vld [vmem:[%s1375_s0 + $0xa8] sm:$0xff] }
   0x9   :  { %v741_v34 = vpack.c.bf16 %v221_v24, %v220_v23  ;;  %v224_v35 = vmax.f32 %v160_v25, 0.0  ;;  %v227_v42 = vmax.f32 %v163_v31, 0.0  ;;  %v94_v43 = vmul.f32 %v958_v2, %v23_v27  ;;  %v36_v18 = vld [vmem:[%s1375_s0 + $0xb0] sm:$0xff]  ;;  %v37_v23 = vld [vmem:[%s1375_s0 + $0xb8] sm:$0xff] }
   0xa   :  { %v746_v40 = vpack.c.bf16 %v223_v29, %v222_v28  ;;  %v164_v46 = vadd.f32 %v965_v5, %v93_v37  ;;  %v95_v47 = vmul.f32 %v958_v2, %v24_v32  ;;  %v96_v48 = vmul.f32 %v958_v2, %v25_v33  ;;  %v38_v28 = vld [vmem:[%s1375_s0 + $0xc0] sm:$0xff]  ;;  %v39_v37 = vld [vmem:[%s1375_s0 + $0xc8] sm:$0xff] }
   0xb   :  { %742 = vst [vmem:[%s1378_s3] sm:$0xff] %v741_v34   ;;  %v751_v45 = vpack.c.bf16 %v225_v36, %v224_v35  ;;  %v756_v50 = vpack.c.bf16 %v227_v42, %v226_v41  ;;  %v165_v51 = vadd.f32 %v965_v5, %v94_v43  ;;  %v97_v52 = vmul.f32 %v958_v2, %v26_v38  ;;  %v40_v42 = vld [vmem:[%s1375_s0 + $0xd0] sm:$0xff]  ;;  %v41_v43 = vld [vmem:[%s1375_s0 + $0xd8] sm:$0xff] }
   0xc   :  { %898 = vst [vmem:[%s1378_s3 + $0x8] sm:$0xff] %v746_v40   ;;  %v98_v53 = vmul.f32 %v958_v2, %v27_v39  ;;  %v228_v55 = vmax.f32 %v164_v46, 0.0  ;;  %v166_v56 = vadd.f32 %v965_v5, %v95_v47  ;;  %v167_v57 = vadd.f32 %v965_v5, %v96_v48  ;;  %v42_v48 = vld [vmem:[%s1375_s0 + $0xe0] sm:$0xff] }
   0xd   :  { %899 = vst [vmem:[%s1378_s3 + $0x10] sm:$0xff] %v751_v45   ;;  %v99_v58 = vmul.f32 %v958_v2, %v28_v44  ;;  %900 = vst [vmem:[%s1378_s3 + $0x18] sm:$0xff] %v756_v50   ;;  %v229_v59 = vmax.f32 %v165_v51, 0.0  ;;  %v168_v60 = vadd.f32 %v965_v5, %v97_v52  ;;  %v100_v62 = vmul.f32 %v958_v2, %v29_v49  ;;  %v43_v49 = vld [vmem:[%s1375_s0 + $0xe8] sm:$0xff] }
   0xe   :  { %v169_v61 = vadd.f32 %v965_v5, %v98_v53  ;;  %v230_v0 = vmax.f32 %v166_v56, 0.0  ;;  %v231_v1 = vmax.f32 %v167_v57, 0.0  ;;  %v101_v4 = vmul.f32 %v958_v2, %v30_v54  ;;  %v44_v54 = vld [vmem:[%s1375_s0 + $0xf0] sm:$0xff] }
   0xf   :  { %v170_v3 = vadd.f32 %v965_v5, %v99_v58  ;;  %v761_v8 = vpack.c.bf16 %v229_v59, %v228_v55  ;;  %v232_v9 = vmax.f32 %v168_v60, 0.0  ;;  %v171_v11 = vadd.f32 %v965_v5, %v100_v62  ;;  %v45_v59 = vld [vmem:[%s1375_s0 + $0xf8] sm:$0xff] }
  0x10   :  { %v233_v10 = vmax.f32 %v169_v61, 0.0  ;;  %v766_v14 = vpack.c.bf16 %v231_v1, %v230_v0  ;;  %v102_v16 = vmul.f32 %v958_v2, %v31_v63  ;;  %v172_v17 = vadd.f32 %v965_v5, %v101_v4  ;;  %v46_v0 = vld [vmem:[%s1375_s0 + $0x100] sm:$0xff] }
  0x11   :  { %v234_v15 = vmax.f32 %v170_v3, 0.0  ;;  %901 = vst [vmem:[%s1378_s3 + $0x20] sm:$0xff] %v761_v8   ;;  %v235_v20 = vmax.f32 %v171_v11, 0.0  ;;  %v103_v21 = vmul.f32 %v958_v2, %v32_v6  ;;  %v104_v22 = vmul.f32 %v958_v2, %v33_v7  ;;  %v47_v11 = vld [vmem:[%s1375_s0 + $0x108] sm:$0xff] }
  0x12   :  { %v771_v19 = vpack.c.bf16 %v233_v10, %v232_v9  ;;  %902 = vst [vmem:[%s1378_s3 + $0x28] sm:$0xff] %v766_v14   ;;  %v173_v24 = vadd.f32 %v965_v5, %v102_v16  ;;  %v236_v25 = vmax.f32 %v172_v17, 0.0  ;;  %v105_v26 = vmul.f32 %v958_v2, %v34_v12  ;;  %v48_v16 = vld [vmem:[%s1375_s0 + $0x110] sm:$0xff]  ;;  %v49_v17 = vld [vmem:[%s1375_s0 + $0x118] sm:$0xff] }
  0x13   :  { %v106_v27 = vmul.f32 %v958_v2, %v35_v13  ;;  %v776_v29 = vpack.c.bf16 %v235_v20, %v234_v15  ;;  %v174_v30 = vadd.f32 %v965_v5, %v103_v21  ;;  %v175_v31 = vadd.f32 %v965_v5, %v104_v22  ;;  %v50_v22 = vld [vmem:[%s1375_s0 + $0x120] sm:$0xff] }
  0x14   :  { %903 = vst [vmem:[%s1378_s3 + $0x30] sm:$0xff] %v771_v19   ;;  %v107_v32 = vmul.f32 %v958_v2, %v36_v18  ;;  %v237_v33 = vmax.f32 %v173_v24, 0.0  ;;  %v176_v34 = vadd.f32 %v965_v5, %v105_v26  ;;  %v108_v36 = vmul.f32 %v958_v2, %v37_v23  ;;  %v51_v23 = vld [vmem:[%s1375_s0 + $0x128] sm:$0xff] }
  0x15   :  { %v177_v35 = vadd.f32 %v965_v5, %v106_v27  ;;  %904 = vst [vmem:[%s1378_s3 + $0x38] sm:$0xff] %v776_v29   ;;  %v238_v38 = vmax.f32 %v174_v30, 0.0  ;;  %v239_v39 = vmax.f32 %v175_v31, 0.0  ;;  %v109_v41 = vmul.f32 %v958_v2, %v38_v28  ;;  %v52_v28 = vld [vmem:[%s1375_s0 + $0x130] sm:$0xff] }
  0x16   :  { %v178_v40 = vadd.f32 %v965_v5, %v107_v32  ;;  %v781_v44 = vpack.c.bf16 %v237_v33, %v236_v25  ;;  %v240_v45 = vmax.f32 %v176_v34, 0.0  ;;  %v179_v47 = vadd.f32 %v965_v5, %v108_v36  ;;  %v53_v33 = vld [vmem:[%s1375_s0 + $0x138] sm:$0xff] }
  0x17   :  { %v241_v46 = vmax.f32 %v177_v35, 0.0  ;;  %v786_v50 = vpack.c.bf16 %v239_v39, %v238_v38  ;;  %v110_v52 = vmul.f32 %v958_v2, %v39_v37  ;;  %v180_v53 = vadd.f32 %v965_v5, %v109_v41  ;;  %v54_v38 = vld [vmem:[%s1375_s0 + $0x140] sm:$0xff] }
  0x18   :  { %v242_v51 = vmax.f32 %v178_v40, 0.0  ;;  %905 = vst [vmem:[%s1378_s3 + $0x40] sm:$0xff] %v781_v44   ;;  %v243_v56 = vmax.f32 %v179_v47, 0.0  ;;  %v111_v57 = vmul.f32 %v958_v2, %v40_v42  ;;  %v112_v58 = vmul.f32 %v958_v2, %v41_v43  ;;  %v55_v47 = vld [vmem:[%s1375_s0 + $0x148] sm:$0xff] }
  0x19   :  { %v791_v55 = vpack.c.bf16 %v241_v46, %v240_v45  ;;  %906 = vst [vmem:[%s1378_s3 + $0x48] sm:$0xff] %v786_v50   ;;  %v181_v60 = vadd.f32 %v965_v5, %v110_v52  ;;  %v244_v61 = vmax.f32 %v180_v53, 0.0  ;;  %v113_v62 = vmul.f32 %v958_v2, %v42_v48  ;;  %v56_v52 = vld [vmem:[%s1375_s0 + $0x150] sm:$0xff]  ;;  %v57_v53 = vld [vmem:[%s1375_s0 + $0x158] sm:$0xff] }
  0x1a   :  { %v114_v63 = vmul.f32 %v958_v2, %v43_v49  ;;  %v796_v1 = vpack.c.bf16 %v243_v56, %v242_v51  ;;  %v182_v3 = vadd.f32 %v965_v5, %v111_v57  ;;  %v183_v4 = vadd.f32 %v965_v5, %v112_v58  ;;  %v58_v58 = vld [vmem:[%s1375_s0 + $0x160] sm:$0xff] }
  0x1b   :  { %907 = vst [vmem:[%s1378_s3 + $0x50] sm:$0xff] %v791_v55   ;;  %v115_v6 = vmul.f32 %v958_v2, %v44_v54  ;;  %v245_v7 = vmax.f32 %v181_v60, 0.0  ;;  %v184_v8 = vadd.f32 %v965_v5, %v113_v62  ;;  %v116_v10 = vmul.f32 %v958_v2, %v45_v59  ;;  %v59_v59 = vld [vmem:[%s1375_s0 + $0x168] sm:$0xff] }
  0x1c   :  { %v185_v9 = vadd.f32 %v965_v5, %v114_v63  ;;  %908 = vst [vmem:[%s1378_s3 + $0x58] sm:$0xff] %v796_v1   ;;  %v246_v12 = vmax.f32 %v182_v3, 0.0  ;;  %v247_v13 = vmax.f32 %v183_v4, 0.0  ;;  %v117_v15 = vmul.f32 %v958_v2, %v46_v0  ;;  %v60_v0 = vld [vmem:[%s1375_s0 + $0x170] sm:$0xff] }
  0x1d   :  { %v186_v14 = vadd.f32 %v965_v5, %v115_v6  ;;  %v801_v18 = vpack.c.bf16 %v245_v7, %v244_v61  ;;  %v248_v19 = vmax.f32 %v184_v8, 0.0  ;;  %v187_v21 = vadd.f32 %v965_v5, %v116_v10  ;;  %v61_v7 = vld [vmem:[%s1375_s0 + $0x178] sm:$0xff] }
  0x1e   :  { %v249_v20 = vmax.f32 %v185_v9, 0.0  ;;  %v806_v24 = vpack.c.bf16 %v247_v13, %v246_v12  ;;  %v118_v26 = vmul.f32 %v958_v2, %v47_v11  ;;  %v188_v27 = vadd.f32 %v965_v5, %v117_v15  ;;  %v62_v12 = vld [vmem:[%s1375_s0 + $0x180] sm:$0xff] }
  0x1f   :  { %v250_v25 = vmax.f32 %v186_v14, 0.0  ;;  %909 = vst [vmem:[%s1378_s3 + $0x60] sm:$0xff] %v801_v18   ;;  %v251_v30 = vmax.f32 %v187_v21, 0.0  ;;  %v119_v31 = vmul.f32 %v958_v2, %v48_v16  ;;  %v120_v32 = vmul.f32 %v958_v2, %v49_v17  ;;  %v63_v21 = vld [vmem:[%s1375_s0 + $0x188] sm:$0xff] }
  0x20   :  { %v811_v29 = vpack.c.bf16 %v249_v20, %v248_v19  ;;  %910 = vst [vmem:[%s1378_s3 + $0x68] sm:$0xff] %v806_v24   ;;  %v189_v34 = vadd.f32 %v965_v5, %v118_v26  ;;  %v252_v35 = vmax.f32 %v188_v27, 0.0  ;;  %v121_v36 = vmul.f32 %v958_v2, %v50_v22  ;;  %v64_v26 = vld [vmem:[%s1375_s0 + $0x190] sm:$0xff]  ;;  %v65_v27 = vld [vmem:[%s1375_s0 + $0x198] sm:$0xff] }
  0x21   :  { %v122_v37 = vmul.f32 %v958_v2, %v51_v23  ;;  %v816_v39 = vpack.c.bf16 %v251_v30, %v250_v25  ;;  %v190_v40 = vadd.f32 %v965_v5, %v119_v31  ;;  %v191_v41 = vadd.f32 %v965_v5, %v120_v32  ;;  %v66_v32 = vld [vmem:[%s1375_s0 + $0x1a0] sm:$0xff] }
  0x22   :  { %911 = vst [vmem:[%s1378_s3 + $0x70] sm:$0xff] %v811_v29   ;;  %v123_v42 = vmul.f32 %v958_v2, %v52_v28  ;;  %v253_v43 = vmax.f32 %v189_v34, 0.0  ;;  %v192_v44 = vadd.f32 %v965_v5, %v121_v36  ;;  %v124_v46 = vmul.f32 %v958_v2, %v53_v33  ;;  %v67_v33 = vld [vmem:[%s1375_s0 + $0x1a8] sm:$0xff] }
  0x23   :  { %v193_v45 = vadd.f32 %v965_v5, %v122_v37  ;;  %912 = vst [vmem:[%s1378_s3 + $0x78] sm:$0xff] %v816_v39   ;;  %v254_v48 = vmax.f32 %v190_v40, 0.0  ;;  %v255_v49 = vmax.f32 %v191_v41, 0.0  ;;  %v125_v51 = vmul.f32 %v958_v2, %v54_v38  ;;  %v68_v38 = vld [vmem:[%s1375_s0 + $0x1b0] sm:$0xff] }
  0x24   :  { %v194_v50 = vadd.f32 %v965_v5, %v123_v42  ;;  %v821_v54 = vpack.c.bf16 %v253_v43, %v252_v35  ;;  %v256_v55 = vmax.f32 %v192_v44, 0.0  ;;  %v195_v57 = vadd.f32 %v965_v5, %v124_v46  ;;  %v69_v43 = vld [vmem:[%s1375_s0 + $0x1b8] sm:$0xff] }
  0x25   :  { %v257_v56 = vmax.f32 %v193_v45, 0.0  ;;  %v826_v60 = vpack.c.bf16 %v255_v49, %v254_v48  ;;  %v126_v62 = vmul.f32 %v958_v2, %v55_v47  ;;  %v196_v63 = vadd.f32 %v965_v5, %v125_v51  ;;  %v70_v48 = vld [vmem:[%s1375_s0 + $0x1c0] sm:$0xff] }
  0x26   :  { %v258_v61 = vmax.f32 %v194_v50, 0.0  ;;  %913 = vst [vmem:[%s1378_s3 + $0x80] sm:$0xff] %v821_v54   ;;  %v259_v3 = vmax.f32 %v195_v57, 0.0  ;;  %v127_v4 = vmul.f32 %v958_v2, %v56_v52  ;;  %v128_v6 = vmul.f32 %v958_v2, %v57_v53  ;;  %v71_v57 = vld [vmem:[%s1375_s0 + $0x1c8] sm:$0xff] }
  0x27   :  { %v831_v1 = vpack.c.bf16 %v257_v56, %v256_v55  ;;  %914 = vst [vmem:[%s1378_s3 + $0x88] sm:$0xff] %v826_v60   ;;  %v197_v8 = vadd.f32 %v965_v5, %v126_v62  ;;  %v260_v9 = vmax.f32 %v196_v63, 0.0  ;;  %v129_v10 = vmul.f32 %v958_v2, %v58_v58  ;;  %v72_v62 = vld [vmem:[%s1375_s0 + $0x1d0] sm:$0xff]  ;;  %v73_v63 = vld [vmem:[%s1375_s0 + $0x1d8] sm:$0xff] }
  0x28   :  { %v130_v11 = vmul.f32 %v958_v2, %v59_v59  ;;  %v836_v13 = vpack.c.bf16 %v259_v3, %v258_v61  ;;  %v198_v14 = vadd.f32 %v965_v5, %v127_v4  ;;  %v199_v15 = vadd.f32 %v965_v5, %v128_v6  ;;  %v74_v6 = vld [vmem:[%s1375_s0 + $0x1e0] sm:$0xff] }
  0x29   :  { %915 = vst [vmem:[%s1378_s3 + $0x90] sm:$0xff] %v831_v1   ;;  %v131_v16 = vmul.f32 %v958_v2, %v60_v0  ;;  %v261_v17 = vmax.f32 %v197_v8, 0.0  ;;  %v200_v18 = vadd.f32 %v965_v5, %v129_v10  ;;  %v132_v20 = vmul.f32 %v958_v2, %v61_v7  ;;  %v75_v7 = vld [vmem:[%s1375_s0 + $0x1e8] sm:$0xff] }
  0x2a   :  { %v201_v19 = vadd.f32 %v965_v5, %v130_v11  ;;  %916 = vst [vmem:[%s1378_s3 + $0x98] sm:$0xff] %v836_v13   ;;  %v262_v22 = vmax.f32 %v198_v14, 0.0  ;;  %v263_v23 = vmax.f32 %v199_v15, 0.0  ;;  %v133_v25 = vmul.f32 %v958_v2, %v62_v12  ;;  %v76_v12 = vld [vmem:[%s1375_s0 + $0x1f0] sm:$0xff] }
  0x2b   :  { %v202_v24 = vadd.f32 %v965_v5, %v131_v16  ;;  %v841_v28 = vpack.c.bf16 %v261_v17, %v260_v9  ;;  %v264_v29 = vmax.f32 %v200_v18, 0.0  ;;  %v203_v31 = vadd.f32 %v965_v5, %v132_v20  ;;  %v77_v17 = vld [vmem:[%s1375_s0 + $0x1f8] sm:$0xff] }
  0x2c   :  { %v265_v30 = vmax.f32 %v201_v19, 0.0  ;;  %v846_v34 = vpack.c.bf16 %v263_v23, %v262_v22  ;;  %v134_v36 = vmul.f32 %v958_v2, %v63_v21  ;;  %v204_v37 = vadd.f32 %v965_v5, %v133_v25 }
  0x2d   :  { %v266_v35 = vmax.f32 %v202_v24, 0.0  ;;  %917 = vst [vmem:[%s1378_s3 + $0xa0] sm:$0xff] %v841_v28   ;;  %v267_v40 = vmax.f32 %v203_v31, 0.0  ;;  %v135_v41 = vmul.f32 %v958_v2, %v64_v26  ;;  %v136_v42 = vmul.f32 %v958_v2, %v65_v27 }
  0x2e   :  { %v851_v39 = vpack.c.bf16 %v265_v30, %v264_v29  ;;  %918 = vst [vmem:[%s1378_s3 + $0xa8] sm:$0xff] %v846_v34   ;;  %v205_v44 = vadd.f32 %v965_v5, %v134_v36  ;;  %v268_v45 = vmax.f32 %v204_v37, 0.0  ;;  %v137_v46 = vmul.f32 %v958_v2, %v66_v32 }
  0x2f   :  { %v138_v47 = vmul.f32 %v958_v2, %v67_v33  ;;  %v856_v49 = vpack.c.bf16 %v267_v40, %v266_v35  ;;  %v206_v50 = vadd.f32 %v965_v5, %v135_v41  ;;  %v207_v51 = vadd.f32 %v965_v5, %v136_v42 }
  0x30   :  { %919 = vst [vmem:[%s1378_s3 + $0xb0] sm:$0xff] %v851_v39   ;;  %v139_v52 = vmul.f32 %v958_v2, %v68_v38  ;;  %v269_v53 = vmax.f32 %v205_v44, 0.0  ;;  %v208_v54 = vadd.f32 %v965_v5, %v137_v46  ;;  %v140_v56 = vmul.f32 %v958_v2, %v69_v43 }
  0x31   :  { %v209_v55 = vadd.f32 %v965_v5, %v138_v47  ;;  %920 = vst [vmem:[%s1378_s3 + $0xb8] sm:$0xff] %v856_v49   ;;  %v270_v58 = vmax.f32 %v206_v50, 0.0  ;;  %v271_v59 = vmax.f32 %v207_v51, 0.0  ;;  %v141_v61 = vmul.f32 %v958_v2, %v70_v48 }
  0x32   :  { %v210_v60 = vadd.f32 %v965_v5, %v139_v52  ;;  %v861_v0 = vpack.c.bf16 %v269_v53, %v268_v45  ;;  %v272_v1 = vmax.f32 %v208_v54, 0.0  ;;  %v211_v4 = vadd.f32 %v965_v5, %v140_v56 }
  0x33   :  { %v273_v3 = vmax.f32 %v209_v55, 0.0  ;;  %v866_v8 = vpack.c.bf16 %v271_v59, %v270_v58  ;;  %v142_v10 = vmul.f32 %v958_v2, %v71_v57  ;;  %v212_v11 = vadd.f32 %v965_v5, %v141_v61 }
  0x34   :  { %v274_v9 = vmax.f32 %v210_v60, 0.0  ;;  %921 = vst [vmem:[%s1378_s3 + $0xc0] sm:$0xff] %v861_v0   ;;  %v275_v14 = vmax.f32 %v211_v4, 0.0  ;;  %v143_v15 = vmul.f32 %v958_v2, %v72_v62  ;;  %v144_v16 = vmul.f32 %v958_v2, %v73_v63 }
  0x35   :  { %v871_v13 = vpack.c.bf16 %v273_v3, %v272_v1  ;;  %922 = vst [vmem:[%s1378_s3 + $0xc8] sm:$0xff] %v866_v8   ;;  %v213_v18 = vadd.f32 %v965_v5, %v142_v10  ;;  %v276_v19 = vmax.f32 %v212_v11, 0.0  ;;  %v145_v20 = vmul.f32 %v958_v2, %v74_v6 }
  0x36   :  { %v146_v21 = vmul.f32 %v958_v2, %v75_v7  ;;  %v876_v22 = vpack.c.bf16 %v275_v14, %v274_v9  ;;  %v214_v23 = vadd.f32 %v965_v5, %v143_v15  ;;  %v215_v24 = vadd.f32 %v965_v5, %v144_v16 }
  0x37   :  { %923 = vst [vmem:[%s1378_s3 + $0xd0] sm:$0xff] %v871_v13   ;;  %v147_v25 = vmul.f32 %v958_v2, %v76_v12  ;;  %v277_v26 = vmax.f32 %v213_v18, 0.0  ;;  %v216_v27 = vadd.f32 %v965_v5, %v145_v20  ;;  %v148_v29 = vmul.f32 %v958_v2, %v77_v17 }
  0x38   :  { %v217_v28 = vadd.f32 %v965_v5, %v146_v21  ;;  %924 = vst [vmem:[%s1378_s3 + $0xd8] sm:$0xff] %v876_v22   ;;  %v278_v30 = vmax.f32 %v214_v23, 0.0  ;;  %v279_v31 = vmax.f32 %v215_v24, 0.0 }
  0x39   :  { %v218_v32 = vadd.f32 %v965_v5, %v147_v25  ;;  %v881_v33 = vpack.c.bf16 %v277_v26, %v276_v19  ;;  %v280_v34 = vmax.f32 %v216_v27, 0.0  ;;  %v219_v36 = vadd.f32 %v965_v5, %v148_v29 }
  0x3a   :  { %v281_v35 = vmax.f32 %v217_v28, 0.0  ;;  %v886_v37 = vpack.c.bf16 %v279_v31, %v278_v30 }
  0x3b   :  { %v282_v38 = vmax.f32 %v218_v32, 0.0  ;;  %925 = vst [vmem:[%s1378_s3 + $0xe0] sm:$0xff] %v881_v33   ;;  %v283_v39 = vmax.f32 %v219_v36, 0.0 }
  0x3c   :  { %v891_v2 = vpack.c.bf16 %v281_v35, %v280_v34  ;;  %926 = vst [vmem:[%s1378_s3 + $0xe8] sm:$0xff] %v886_v37  }
  0x3d   :  { %v896_v40 = vpack.c.bf16 %v283_v39, %v282_v38 }
  0x3e   :  { %927 = vst [vmem:[%s1378_s3 + $0xf0] sm:$0xff] %v891_v2  }
  0x3f   :  { %928 = vst [vmem:[%s1378_s3 + $0xf8] sm:$0xff] %v896_v40  }

// kernel: residual_forward.5
= control target key start
LH: loop header
LB: loop body
LE: loop exit
PB: predicated region body
PF: predicated region fallthrough
CT: control target
= control target key end

     0   :  { %s3365_s12 = smov 0   ;;  %s3367_s13 = smov 0   ;;  %s4590_s0 = inlined_call_operand.vmem [shape: bf16[512,1152], index: 0, kind: input, shape index: {}]   ;;  %s4591_s1 = inlined_call_operand.vmem [shape: bf16[1152,128], index: 1, kind: input, shape index: {}]   ;;  %s4592_s2 = inlined_call_operand.vmem [shape: f32[512,128], index: 2, kind: output, shape index: {0}]   ;;  %s4593_s3 = inlined_call_operand.vmem [shape: f32[8,128], index: 3, kind: output, shape index: {1}]  }
   0x1   :  { %s3369_s14 = smov 0   ;;  %s3371_s15 = smov 0  }
   0x2   :  { %s3373_s16 = smov 0  }
   0x3 LB: > { %s26_s17 = sadd.s32 1, %s3336_s15  ;;  %p49_p1 = scmp.ne.s32.totalorder %s3328_s13, %s3324_s12  ;;  %s3340_s16 = sphi %s3373_s16, %s14_s16   ;;  %s3336_s15 = sphi %s3371_s15, %s4605_s15   ;;  %s3332_s14 = sphi %s3369_s14, %s4604_s14   ;;  %s3328_s13 = sphi %s3367_s13, %s4603_s13   ;;  %s3324_s12 = sphi %s3365_s12, %s4602_s12  }
   0x4   : > { %p27_p0 = scmp.ge.s32.totalorder %s26_s17, 3  ;;  %p50_p2 = scmp.eq.s32.totalorder %s3340_s16, 0 }
   0x5   : > { %s42_s19 = sadd.s32 1, %s3328_s13  ;;  %p2693_p5 = scmp.ge.s32.totalorder %s3340_s16, 3 }
   0x6   : > { %s4607_s17 = smov (%p27_p0, %s26_s17), 0  ;;  %p51_p3 = por %p50_p2, %p49_p1 }
   0x7   : > { %s38_s18 = ssub.s32 %s3336_s15, %s4607_s17  ;;  %159 = sbr.rel (%p2693_p5) target bundleno = 91 (0x5b), region = 16 }
   0x8   : > { %p40_p4 = scmp.eq.s32.totalorder %s38_s18, 0 }
   0xa   : > { %s3400_s20 = scalar_select %p40_p4, %s3328_s13, %s42_s19  }
   0xc   : > { %162 = sbr.rel (!%p51_p3) target bundleno = 91 (0x5b), region = 20  ;;  %s164_s21 = sand.u32 (%p51_p3), 1, %s3328_s13  }
   0xd   : > { %s2952_s22 = smul.u32 (%p51_p3), 12, %s3336_s15 }
   0xe   : > { %s3105_s23 = smul.u32 (%p51_p3), 768, %s164_s21 }
   0xf   : > { %s3408_s26 = scalar_lea.vmem (%p51_p3), %s4590_s0, %s2952_s22 }
  0x10   : > { %v187_v0 = vld [vmem:[%s3408_s26] sm:$0xff] (%p51_p3)  ;;  %v191_v2 = vld [vmem:[%s3408_s26 + $0x48] sm:$0xff] (%p51_p3)  ;;  %s3413_s27 = scalar_lea.vmem (%p51_p3), [#allocation3], %s3105_s23  ;;  %v195_v4 = vld [vmem:[%s3408_s26 + $0x90] sm:$0xff] (%p51_p3) }
  0x11   : > { %v189_v1 = vld [vmem:[%s3408_s26 + $0x24] sm:$0xff]  ;;  %188 = vst [vmem:[%s3413_s27] sm:$0xff] %v187_v0  ;;  %192 = vst [vmem:[%s3413_s27 + $0x18] sm:$0xff] %v191_v2  ;;  %v193_v3 = vld [vmem:[%s3408_s26 + $0x6c] sm:$0xff] }
  0x12   : > { %190 = vst [vmem:[%s3413_s27 + $0xc] sm:$0xff] %v189_v1  ;;  %v197_v5 = vld [vmem:[%s3408_s26 + $0xb4] sm:$0xff]  ;;  %194 = vst [vmem:[%s3413_s27 + $0x24] sm:$0xff] %v193_v3  ;;  %v201_v7 = vld [vmem:[%s3408_s26 + $0xfc] sm:$0xff] }
  0x13   : > { %196 = vst [vmem:[%s3413_s27 + $0x30] sm:$0xff] %v195_v4  ;;  %198 = vst [vmem:[%s3413_s27 + $0x3c] sm:$0xff] %v197_v5  ;;  %v199_v6 = vld [vmem:[%s3408_s26 + $0xd8] sm:$0xff]  ;;  %v203_v8 = vld [vmem:[%s3408_s26 + $0x120] sm:$0xff] }
  0x14   : > { %200 = vst [vmem:[%s3413_s27 + $0x48] sm:$0xff] %v199_v6  ;;  %202 = vst [vmem:[%s3413_s27 + $0x54] sm:$0xff] %v201_v7  ;;  %v205_v9 = vld [vmem:[%s3408_s26 + $0x144] sm:$0xff]  ;;  %v209_v11 = vld [vmem:[%s3408_s26 + $0x18c] sm:$0xff] }
  0x15   : > { %204 = vst [vmem:[%s3413_s27 + $0x60] sm:$0xff] %v203_v8  ;;  %v207_v10 = vld [vmem:[%s3408_s26 + $0x168] sm:$0xff]  ;;  %206 = vst [vmem:[%s3413_s27 + $0x6c] sm:$0xff] %v205_v9  ;;  %v211_v12 = vld [vmem:[%s3408_s26 + $0x1b0] sm:$0xff] }
  0x16   : > { %208 = vst [vmem:[%s3413_s27 + $0x78] sm:$0xff] %v207_v10  ;;  %210 = vst [vmem:[%s3413_s27 + $0x84] sm:$0xff] %v209_v11  ;;  %v213_v13 = vld [vmem:[%s3408_s26 + $0x1d4] sm:$0xff]  ;;  %v217_v15 = vld [vmem:[%s3408_s26 + $0x21c] sm:$0xff] }
  0x17   : > { %v215_v14 = vld [vmem:[%s3408_s26 + $0x1f8] sm:$0xff]  ;;  %212 = vst [vmem:[%s3413_s27 + $0x90] sm:$0xff] %v211_v12  ;;  %214 = vst [vmem:[%s3413_s27 + $0x9c] sm:$0xff] %v213_v13  ;;  %v219_v16 = vld [vmem:[%s3408_s26 + $0x240] sm:$0xff] }
  0x18   : > { %216 = vst [vmem:[%s3413_s27 + $0xa8] sm:$0xff] %v215_v14  ;;  %v221_v17 = vld [vmem:[%s3408_s26 + $0x264] sm:$0xff]  ;;  %218 = vst [vmem:[%s3413_s27 + $0xb4] sm:$0xff] %v217_v15  ;;  %v225_v19 = vld [vmem:[%s3408_s26 + $0x2ac] sm:$0xff] }
  0x19   : > { %220 = vst [vmem:[%s3413_s27 + $0xc0] sm:$0xff] %v219_v16  ;;  %222 = vst [vmem:[%s3413_s27 + $0xcc] sm:$0xff] %v221_v17  ;;  %v223_v18 = vld [vmem:[%s3408_s26 + $0x288] sm:$0xff]  ;;  %v227_v20 = vld [vmem:[%s3408_s26 + $0x2d0] sm:$0xff] }
  0x1a   : > { %224 = vst [vmem:[%s3413_s27 + $0xd8] sm:$0xff] %v223_v18  ;;  %226 = vst [vmem:[%s3413_s27 + $0xe4] sm:$0xff] %v225_v19  ;;  %v229_v21 = vld [vmem:[%s3408_s26 + $0x2f4] sm:$0xff]  ;;  %v233_v23 = vld [vmem:[%s3408_s26 + $0x33c] sm:$0xff] }
  0x1b   : > { %228 = vst [vmem:[%s3413_s27 + $0xf0] sm:$0xff] %v227_v20  ;;  %v231_v22 = vld [vmem:[%s3408_s26 + $0x318] sm:$0xff]  ;;  %230 = vst [vmem:[%s3413_s27 + $0xfc] sm:$0xff] %v229_v21  ;;  %v235_v24 = vld [vmem:[%s3408_s26 + $0x360] sm:$0xff] }
  0x1c   : > { %232 = vst [vmem:[%s3413_s27 + $0x108] sm:$0xff] %v231_v22  ;;  %234 = vst [vmem:[%s3413_s27 + $0x114] sm:$0xff] %v233_v23  ;;  %v237_v25 = vld [vmem:[%s3408_s26 + $0x384] sm:$0xff]  ;;  %v241_v27 = vld [vmem:[%s3408_s26 + $0x3cc] sm:$0xff] }
  0x1d   : > { %v239_v26 = vld [vmem:[%s3408_s26 + $0x3a8] sm:$0xff]  ;;  %236 = vst [vmem:[%s3413_s27 + $0x120] sm:$0xff] %v235_v24  ;;  %238 = vst [vmem:[%s3413_s27 + $0x12c] sm:$0xff] %v237_v25  ;;  %v243_v28 = vld [vmem:[%s3408_s26 + $0x3f0] sm:$0xff] }
  0x1e   : > { %240 = vst [vmem:[%s3413_s27 + $0x138] sm:$0xff] %v239_v26  ;;  %v245_v29 = vld [vmem:[%s3408_s26 + $0x414] sm:$0xff]  ;;  %242 = vst [vmem:[%s3413_s27 + $0x144] sm:$0xff] %v241_v27  ;;  %v249_v31 = vld [vmem:[%s3408_s26 + $0x45c] sm:$0xff] }
  0x1f   : > { %244 = vst [vmem:[%s3413_s27 + $0x150] sm:$0xff] %v243_v28  ;;  %246 = vst [vmem:[%s3413_s27 + $0x15c] sm:$0xff] %v245_v29  ;;  %v247_v30 = vld [vmem:[%s3408_s26 + $0x438] sm:$0xff]  ;;  %v251_v32 = vld [vmem:[%s3408_s26 + $0x480] sm:$0xff] }
  0x20   : > { %248 = vst [vmem:[%s3413_s27 + $0x168] sm:$0xff] %v247_v30  ;;  %250 = vst [vmem:[%s3413_s27 + $0x174] sm:$0xff] %v249_v31  ;;  %v253_v33 = vld [vmem:[%s3408_s26 + $0x4a4] sm:$0xff]  ;;  %v257_v35 = vld [vmem:[%s3408_s26 + $0x4ec] sm:$0xff] }
  0x21   : > { %252 = vst [vmem:[%s3413_s27 + $0x180] sm:$0xff] %v251_v32  ;;  %v255_v34 = vld [vmem:[%s3408_s26 + $0x4c8] sm:$0xff]  ;;  %254 = vst [vmem:[%s3413_s27 + $0x18c] sm:$0xff] %v253_v33  ;;  %v259_v36 = vld [vmem:[%s3408_s26 + $0x510] sm:$0xff] }
  0x22   : > { %256 = vst [vmem:[%s3413_s27 + $0x198] sm:$0xff] %v255_v34  ;;  %258 = vst [vmem:[%s3413_s27 + $0x1a4] sm:$0xff] %v257_v35  ;;  %v261_v37 = vld [vmem:[%s3408_s26 + $0x534] sm:$0xff]  ;;  %v265_v39 = vld [vmem:[%s3408_s26 + $0x57c] sm:$0xff] }
  0x23   : > { %v263_v38 = vld [vmem:[%s3408_s26 + $0x558] sm:$0xff]  ;;  %260 = vst [vmem:[%s3413_s27 + $0x1b0] sm:$0xff] %v259_v36  ;;  %262 = vst [vmem:[%s3413_s27 + $0x1bc] sm:$0xff] %v261_v37  ;;  %v267_v40 = vld [vmem:[%s3408_s26 + $0x5a0] sm:$0xff] }
  0x24   : > { %264 = vst [vmem:[%s3413_s27 + $0x1c8] sm:$0xff] %v263_v38  ;;  %v269_v41 = vld [vmem:[%s3408_s26 + $0x5c4] sm:$0xff]  ;;  %266 = vst [vmem:[%s3413_s27 + $0x1d4] sm:$0xff] %v265_v39  ;;  %v273_v43 = vld [vmem:[%s3408_s26 + $0x60c] sm:$0xff] }
  0x25   : > { %268 = vst [vmem:[%s3413_s27 + $0x1e0] sm:$0xff] %v267_v40  ;;  %270 = vst [vmem:[%s3413_s27 + $0x1ec] sm:$0xff] %v269_v41  ;;  %v271_v42 = vld [vmem:[%s3408_s26 + $0x5e8] sm:$0xff]  ;;  %v275_v44 = vld [vmem:[%s3408_s26 + $0x630] sm:$0xff] }
  0x26   : > { %272 = vst [vmem:[%s3413_s27 + $0x1f8] sm:$0xff] %v271_v42  ;;  %274 = vst [vmem:[%s3413_s27 + $0x204] sm:$0xff] %v273_v43  ;;  %v277_v45 = vld [vmem:[%s3408_s26 + $0x654] sm:$0xff]  ;;  %v281_v47 = vld [vmem:[%s3408_s26 + $0x69c] sm:$0xff] }
  0x27   : > { %276 = vst [vmem:[%s3413_s27 + $0x210] sm:$0xff] %v275_v44  ;;  %v279_v46 = vld [vmem:[%s3408_s26 + $0x678] sm:$0xff]  ;;  %278 = vst [vmem:[%s3413_s27 + $0x21c] sm:$0xff] %v277_v45  ;;  %v283_v48 = vld [vmem:[%s3408_s26 + $0x6c0] sm:$0xff] }
  0x28   : > { %280 = vst [vmem:[%s3413_s27 + $0x228] sm:$0xff] %v279_v46  ;;  %282 = vst [vmem:[%s3413_s27 + $0x234] sm:$0xff] %v281_v47  ;;  %v285_v49 = vld [vmem:[%s3408_s26 + $0x6e4] sm:$0xff]  ;;  %v289_v51 = vld [vmem:[%s3408_s26 + $0x72c] sm:$0xff] }
  0x29   : > { %v287_v50 = vld [vmem:[%s3408_s26 + $0x708] sm:$0xff]  ;;  %284 = vst [vmem:[%s3413_s27 + $0x240] sm:$0xff] %v283_v48  ;;  %286 = vst [vmem:[%s3413_s27 + $0x24c] sm:$0xff] %v285_v49  ;;  %v291_v52 = vld [vmem:[%s3408_s26 + $0x750] sm:$0xff] }
  0x2a   : > { %288 = vst [vmem:[%s3413_s27 + $0x258] sm:$0xff] %v287_v50  ;;  %v293_v53 = vld [vmem:[%s3408_s26 + $0x774] sm:$0xff]  ;;  %290 = vst [vmem:[%s3413_s27 + $0x264] sm:$0xff] %v289_v51  ;;  %v297_v55 = vld [vmem:[%s3408_s26 + $0x7bc] sm:$0xff] }
  0x2b   : > { %292 = vst [vmem:[%s3413_s27 + $0x270] sm:$0xff] %v291_v52  ;;  %294 = vst [vmem:[%s3413_s27 + $0x27c] sm:$0xff] %v293_v53  ;;  %v295_v54 = vld [vmem:[%s3408_s26 + $0x798] sm:$0xff]  ;;  %v299_v56 = vld [vmem:[%s3408_s26 + $0x7e0] sm:$0xff] }
  0x2c   : > { %296 = vst [vmem:[%s3413_s27 + $0x288] sm:$0xff] %v295_v54  ;;  %298 = vst [vmem:[%s3413_s27 + $0x294] sm:$0xff] %v297_v55  ;;  %v301_v57 = vld [vmem:[%s3408_s26 + $0x804] sm:$0xff]  ;;  %v305_v59 = vld [vmem:[%s3408_s26 + $0x84c] sm:$0xff] }
  0x2d   : > { %300 = vst [vmem:[%s3413_s27 + $0x2a0] sm:$0xff] %v299_v56  ;;  %v303_v58 = vld [vmem:[%s3408_s26 + $0x828] sm:$0xff]  ;;  %302 = vst [vmem:[%s3413_s27 + $0x2ac] sm:$0xff] %v301_v57  ;;  %v307_v60 = vld [vmem:[%s3408_s26 + $0x870] sm:$0xff] }
  0x2e   : > { %304 = vst [vmem:[%s3413_s27 + $0x2b8] sm:$0xff] %v303_v58  ;;  %306 = vst [vmem:[%s3413_s27 + $0x2c4] sm:$0xff] %v305_v59  ;;  %v309_v61 = vld [vmem:[%s3408_s26 + $0x894] sm:$0xff]  ;;  %v313_v63 = vld [vmem:[%s3408_s26 + $0x8dc] sm:$0xff] }
  0x2f   : > { %v311_v62 = vld [vmem:[%s3408_s26 + $0x8b8] sm:$0xff]  ;;  %308 = vst [vmem:[%s3413_s27 + $0x2d0] sm:$0xff] %v307_v60  ;;  %310 = vst [vmem:[%s3413_s27 + $0x2dc] sm:$0xff] %v309_v61  ;;  %v2695_v0 = vld [vmem:[%s3408_s26 + $0x8] sm:$0xf] }
  0x30   : > { %312 = vst [vmem:[%s3413_s27 + $0x2e8] sm:$0xff] %v311_v62  ;;  %v2697_v1 = vld [vmem:[%s3408_s26 + $0x2c] sm:$0xf]  ;;  %314 = vst [vmem:[%s3413_s27 + $0x2f4] sm:$0xff] %v313_v63  ;;  %v2699_v2 = vld [vmem:[%s3408_s26 + $0x50] sm:$0xf] }
  0x31   : > { %2696 = vst [vmem:[%s3413_s27 + $0x8] sm:$0xf] %v2695_v0  ;;  %2698 = vst [vmem:[%s3413_s27 + $0x14] sm:$0xf] %v2697_v1  ;;  %v2701_v3 = vld [vmem:[%s3408_s26 + $0x74] sm:$0xf] }
  0x32   : > { %v2703_v4 = vld [vmem:[%s3408_s26 + $0x98] sm:$0xf]  ;;  %2700 = vst [vmem:[%s3413_s27 + $0x20] sm:$0xf] %v2699_v2  ;;  %2702 = vst [vmem:[%s3413_s27 + $0x2c] sm:$0xf] %v2701_v3 }
  0x33   : > { %2704 = vst [vmem:[%s3413_s27 + $0x38] sm:$0xf] %v2703_v4  ;;  %v2705_v5 = vld [vmem:[%s3408_s26 + $0xbc] sm:$0xf]  ;;  %v2707_v6 = vld [vmem:[%s3408_s26 + $0xe0] sm:$0xf] }
  0x34   : > { %v2709_v7 = vld [vmem:[%s3408_s26 + $0x104] sm:$0xf]  ;;  %2706 = vst [vmem:[%s3413_s27 + $0x44] sm:$0xf] %v2705_v5  ;;  %2708 = vst [vmem:[%s3413_s27 + $0x50] sm:$0xf] %v2707_v6 }
  0x35   : > { %2710 = vst [vmem:[%s3413_s27 + $0x5c] sm:$0xf] %v2709_v7  ;;  %v2711_v8 = vld [vmem:[%s3408_s26 + $0x128] sm:$0xf]  ;;  %v2713_v9 = vld [vmem:[%s3408_s26 + $0x14c] sm:$0xf] }
  0x36   : > { %v2715_v10 = vld [vmem:[%s3408_s26 + $0x170] sm:$0xf]  ;;  %2712 = vst [vmem:[%s3413_s27 + $0x68] sm:$0xf] %v2711_v8  ;;  %2714 = vst [vmem:[%s3413_s27 + $0x74] sm:$0xf] %v2713_v9 }
  0x37   : > { %2716 = vst [vmem:[%s3413_s27 + $0x80] sm:$0xf] %v2715_v10  ;;  %v2717_v11 = vld [vmem:[%s3408_s26 + $0x194] sm:$0xf]  ;;  %v2719_v12 = vld [vmem:[%s3408_s26 + $0x1b8] sm:$0xf] }
  0x38   : > { %v2721_v13 = vld [vmem:[%s3408_s26 + $0x1dc] sm:$0xf]  ;;  %2718 = vst [vmem:[%s3413_s27 + $0x8c] sm:$0xf] %v2717_v11  ;;  %2720 = vst [vmem:[%s3413_s27 + $0x98] sm:$0xf] %v2719_v12 }
  0x39   : > { %2722 = vst [vmem:[%s3413_s27 + $0xa4] sm:$0xf] %v2721_v13  ;;  %v2723_v14 = vld [vmem:[%s3408_s26 + $0x200] sm:$0xf]  ;;  %v2725_v15 = vld [vmem:[%s3408_s26 + $0x224] sm:$0xf] }
  0x3a   : > { %v2727_v16 = vld [vmem:[%s3408_s26 + $0x248] sm:$0xf]  ;;  %2724 = vst [vmem:[%s3413_s27 + $0xb0] sm:$0xf] %v2723_v14  ;;  %2726 = vst [vmem:[%s3413_s27 + $0xbc] sm:$0xf] %v2725_v15 }
  0x3b   : > { %2728 = vst [vmem:[%s3413_s27 + $0xc8] sm:$0xf] %v2727_v16  ;;  %v2729_v17 = vld [vmem:[%s3408_s26 + $0x26c] sm:$0xf]  ;;  %v2731_v18 = vld [vmem:[%s3408_s26 + $0x290] sm:$0xf] }
  0x3c   : > { %v2733_v19 = vld [vmem:[%s3408_s26 + $0x2b4] sm:$0xf]  ;;  %2730 = vst [vmem:[%s3413_s27 + $0xd4] sm:$0xf] %v2729_v17  ;;  %2732 = vst [vmem:[%s3413_s27 + $0xe0] sm:$0xf] %v2731_v18 }
  0x3d   : > { %2734 = vst [vmem:[%s3413_s27 + $0xec] sm:$0xf] %v2733_v19  ;;  %v2735_v20 = vld [vmem:[%s3408_s26 + $0x2d8] sm:$0xf]  ;;  %v2737_v21 = vld [vmem:[%s3408_s26 + $0x2fc] sm:$0xf] }
  0x3e   : > { %v2739_v22 = vld [vmem:[%s3408_s26 + $0x320] sm:$0xf]  ;;  %2736 = vst [vmem:[%s3413_s27 + $0xf8] sm:$0xf] %v2735_v20  ;;  %2738 = vst [vmem:[%s3413_s27 + $0x104] sm:$0xf] %v2737_v21 }
  0x3f   : > { %2740 = vst [vmem:[%s3413_s27 + $0x110] sm:$0xf] %v2739_v22  ;;  %v2741_v23 = vld [vmem:[%s3408_s26 + $0x344] sm:$0xf]  ;;  %v2743_v24 = vld [vmem:[%s3408_s26 + $0x368] sm:$0xf] }
  0x40   : > { %v2745_v25 = vld [vmem:[%s3408_s26 + $0x38c] sm:$0xf]  ;;  %2742 = vst [vmem:[%s3413_s27 + $0x11c] sm:$0xf] %v2741_v23  ;;  %2744 = vst [vmem:[%s3413_s27 + $0x128] sm:$0xf] %v2743_v24 }
  0x41   : > { %2746 = vst [vmem:[%s3413_s27 + $0x134] sm:$0xf] %v2745_v25  ;;  %v2747_v26 = vld [vmem:[%s3408_s26 + $0x3b0] sm:$0xf]  ;;  %v2749_v27 = vld [vmem:[%s3408_s26 + $0x3d4] sm:$0xf] }
  0x42   : > { %v2751_v28 = vld [vmem:[%s3408_s26 + $0x3f8] sm:$0xf]  ;;  %2748 = vst [vmem:[%s3413_s27 + $0x140] sm:$0xf] %v2747_v26  ;;  %2750 = vst [vmem:[%s3413_s27 + $0x14c] sm:$0xf] %v2749_v27 }
  0x43   : > { %2752 = vst [vmem:[%s3413_s27 + $0x158] sm:$0xf] %v2751_v28  ;;  %v2753_v29 = vld [vmem:[%s3408_s26 + $0x41c] sm:$0xf]  ;;  %v2755_v30 = vld [vmem:[%s3408_s26 + $0x440] sm:$0xf] }
  0x44   : > { %v2757_v31 = vld [vmem:[%s3408_s26 + $0x464] sm:$0xf]  ;;  %2754 = vst [vmem:[%s3413_s27 + $0x164] sm:$0xf] %v2753_v29  ;;  %2756 = vst [vmem:[%s3413_s27 + $0x170] sm:$0xf] %v2755_v30 }
  0x45   : > { %2758 = vst [vmem:[%s3413_s27 + $0x17c] sm:$0xf] %v2757_v31  ;;  %v2759_v32 = vld [vmem:[%s3408_s26 + $0x488] sm:$0xf]  ;;  %v2761_v33 = vld [vmem:[%s3408_s26 + $0x4ac] sm:$0xf] }
  0x46   : > { %v2763_v34 = vld [vmem:[%s3408_s26 + $0x4d0] sm:$0xf]  ;;  %2760 = vst [vmem:[%s3413_s27 + $0x188] sm:$0xf] %v2759_v32  ;;  %2762 = vst [vmem:[%s3413_s27 + $0x194] sm:$0xf] %v2761_v33 }
  0x47   : > { %2764 = vst [vmem:[%s3413_s27 + $0x1a0] sm:$0xf] %v2763_v34  ;;  %v2765_v35 = vld [vmem:[%s3408_s26 + $0x4f4] sm:$0xf]  ;;  %v2767_v36 = vld [vmem:[%s3408_s26 + $0x518] sm:$0xf] }
  0x48   : > { %v2769_v37 = vld [vmem:[%s3408_s26 + $0x53c] sm:$0xf]  ;;  %2766 = vst [vmem:[%s3413_s27 + $0x1ac] sm:$0xf] %v2765_v35  ;;  %2768 = vst [vmem:[%s3413_s27 + $0x1b8] sm:$0xf] %v2767_v36 }
  0x49   : > { %2770 = vst [vmem:[%s3413_s27 + $0x1c4] sm:$0xf] %v2769_v37  ;;  %v2771_v38 = vld [vmem:[%s3408_s26 + $0x560] sm:$0xf]  ;;  %v2773_v39 = vld [vmem:[%s3408_s26 + $0x584] sm:$0xf] }
  0x4a   : > { %v2775_v40 = vld [vmem:[%s3408_s26 + $0x5a8] sm:$0xf]  ;;  %2772 = vst [vmem:[%s3413_s27 + $0x1d0] sm:$0xf] %v2771_v38  ;;  %2774 = vst [vmem:[%s3413_s27 + $0x1dc] sm:$0xf] %v2773_v39 }
  0x4b   : > { %2776 = vst [vmem:[%s3413_s27 + $0x1e8] sm:$0xf] %v2775_v40  ;;  %v2777_v41 = vld [vmem:[%s3408_s26 + $0x5cc] sm:$0xf]  ;;  %v2779_v42 = vld [vmem:[%s3408_s26 + $0x5f0] sm:$0xf] }
  0x4c   : > { %v2781_v43 = vld [vmem:[%s3408_s26 + $0x614] sm:$0xf]  ;;  %2778 = vst [vmem:[%s3413_s27 + $0x1f4] sm:$0xf] %v2777_v41  ;;  %2780 = vst [vmem:[%s3413_s27 + $0x200] sm:$0xf] %v2779_v42 }
  0x4d   : > { %2782 = vst [vmem:[%s3413_s27 + $0x20c] sm:$0xf] %v2781_v43  ;;  %v2783_v44 = vld [vmem:[%s3408_s26 + $0x638] sm:$0xf]  ;;  %v2785_v45 = vld [vmem:[%s3408_s26 + $0x65c] sm:$0xf] }
  0x4e   : > { %v2787_v46 = vld [vmem:[%s3408_s26 + $0x680] sm:$0xf]  ;;  %2784 = vst [vmem:[%s3413_s27 + $0x218] sm:$0xf] %v2783_v44  ;;  %2786 = vst [vmem:[%s3413_s27 + $0x224] sm:$0xf] %v2785_v45 }
  0x4f   : > { %2788 = vst [vmem:[%s3413_s27 + $0x230] sm:$0xf] %v2787_v46  ;;  %v2789_v47 = vld [vmem:[%s3408_s26 + $0x6a4] sm:$0xf]  ;;  %v2791_v48 = vld [vmem:[%s3408_s26 + $0x6c8] sm:$0xf] }
  0x50   : > { %v2793_v49 = vld [vmem:[%s3408_s26 + $0x6ec] sm:$0xf]  ;;  %2790 = vst [vmem:[%s3413_s27 + $0x23c] sm:$0xf] %v2789_v47  ;;  %2792 = vst [vmem:[%s3413_s27 + $0x248] sm:$0xf] %v2791_v48 }
  0x51   : > { %2794 = vst [vmem:[%s3413_s27 + $0x254] sm:$0xf] %v2793_v49  ;;  %v2795_v50 = vld [vmem:[%s3408_s26 + $0x710] sm:$0xf]  ;;  %v2797_v51 = vld [vmem:[%s3408_s26 + $0x734] sm:$0xf] }
  0x52   : > { %v2799_v52 = vld [vmem:[%s3408_s26 + $0x758] sm:$0xf]  ;;  %2796 = vst [vmem:[%s3413_s27 + $0x260] sm:$0xf] %v2795_v50  ;;  %2798 = vst [vmem:[%s3413_s27 + $0x26c] sm:$0xf] %v2797_v51 }
  0x53   : > { %2800 = vst [vmem:[%s3413_s27 + $0x278] sm:$0xf] %v2799_v52  ;;  %v2801_v53 = vld [vmem:[%s3408_s26 + $0x77c] sm:$0xf]  ;;  %v2803_v54 = vld [vmem:[%s3408_s26 + $0x7a0] sm:$0xf] }
  0x54   : > { %v2805_v55 = vld [vmem:[%s3408_s26 + $0x7c4] sm:$0xf]  ;;  %2802 = vst [vmem:[%s3413_s27 + $0x284] sm:$0xf] %v2801_v53  ;;  %2804 = vst [vmem:[%s3413_s27 + $0x290] sm:$0xf] %v2803_v54 }
  0x55   : > { %2806 = vst [vmem:[%s3413_s27 + $0x29c] sm:$0xf] %v2805_v55  ;;  %v2807_v56 = vld [vmem:[%s3408_s26 + $0x7e8] sm:$0xf]  ;;  %v2809_v57 = vld [vmem:[%s3408_s26 + $0x80c] sm:$0xf] }
  0x56   : > { %v2811_v58 = vld [vmem:[%s3408_s26 + $0x830] sm:$0xf]  ;;  %2808 = vst [vmem:[%s3413_s27 + $0x2a8] sm:$0xf] %v2807_v56  ;;  %2810 = vst [vmem:[%s3413_s27 + $0x2b4] sm:$0xf] %v2809_v57 }
  0x57   : > { %2812 = vst [vmem:[%s3413_s27 + $0x2c0] sm:$0xf] %v2811_v58  ;;  %v2813_v59 = vld [vmem:[%s3408_s26 + $0x854] sm:$0xf]  ;;  %v2815_v60 = vld [vmem:[%s3408_s26 + $0x878] sm:$0xf] }
  0x58   : > { %v2817_v61 = vld [vmem:[%s3408_s26 + $0x89c] sm:$0xf]  ;;  %2814 = vst [vmem:[%s3413_s27 + $0x2cc] sm:$0xf] %v2813_v59  ;;  %2816 = vst [vmem:[%s3413_s27 + $0x2d8] sm:$0xf] %v2815_v60 }
  0x59   : > { %2818 = vst [vmem:[%s3413_s27 + $0x2e4] sm:$0xf] %v2817_v61  ;;  %v2819_v62 = vld [vmem:[%s3408_s26 + $0x8c0] sm:$0xf]  ;;  %v2821_v63 = vld [vmem:[%s3408_s26 + $0x8e4] sm:$0xf] }
  0x5a   : > { %2820 = vst [vmem:[%s3413_s27 + $0x2f0] sm:$0xf] %v2819_v62  ;;  %2822 = vst [vmem:[%s3413_s27 + $0x2fc] sm:$0xf] %v2821_v63 }
  0x5b PF: > { %p2823_p6 = scmp.ge.s32.totalorder %s3340_s16, 1  ;;  %p467_p7 = scmp.lt.s32.totalorder %s3340_s16, 4 }
  0x5d   : > { %p468_p8 = pnand %p2823_p6, %p467_p7 }
  0x5e   : > { %s474_s28 = sand.u32 (!%p468_p8), 1, %s3324_s12   ;;  %s517_s29 = smul.u32 (!%p468_p8), 48, %s3332_s14 }
  0x5f   : > { %471 = sbr.rel (%p468_p8) target bundleno = 737 (0x2e1), region = 50  ;;  %p2825_p10 = scmp.ne.s32.totalorder (!%p468_p8), %s3332_s14, 0 }
  0x60   : > { %s3106_s30 = smul.u32 (!%p468_p8), 768, %s474_s28  ;;  %p518_p9 = scmp.lt.s32.totalorder (!%p468_p8), %s517_s29, 143 }
  0x62   : > { %s3677_s8 = scalar_lea.vmem (!%p468_p8), [#allocation3], %s3106_s30 }
  0x64   : > { %s4609_s29 = smov (!%p518_p9, %s517_s29), 143  ;;  %546 = sbr.rel (%p2825_p10) target bundleno = 138 (0x8a), region = 58 }
  0x65   : > { %s2824_s4 = sshll.u32 %s4609_s29, 2 }
  0x66   : > { %s3675_s7 = scalar_lea.vmem %s4591_s1, %s2824_s4 }
  0x69   : > { %v3342_v0 = vmov 0.0  }
  0x6a   : > { %547 = vst [vmem:[#allocation2 + $0xb0] sm:$0xff] %v3342_v0  ;;  %548 = vst [vmem:[#allocation2 + $0x1b0] sm:$0xff] %v3342_v0 }
  0x6b   : > { %549 = vst [vmem:[#allocation2 + $0xd8] sm:$0xff] %v3342_v0  ;;  %550 = vst [vmem:[#allocation2 + $0x18] sm:$0xff] %v3342_v0 }
  0x6c   : > { %551 = vst [vmem:[#allocation2 + $0x50] sm:$0xff] %v3342_v0  ;;  %552 = vst [vmem:[#allocation2 + $0x168] sm:$0xff] %v3342_v0 }
  0x6d   : > { %553 = vst [vmem:[#allocation2 + $0x130] sm:$0xff] %v3342_v0  ;;  %554 = vst [vmem:[#allocation2 + $0x48] sm:$0xff] %v3342_v0 }
  0x6e   : > { %555 = vst [vmem:[#allocation2 + $0x180] sm:$0xff] %v3342_v0  ;;  %556 = vst [vmem:[#allocation2 + $0x110] sm:$0xff] %v3342_v0 }
  0x6f   : > { %557 = vst [vmem:[#allocation2 + $0x118] sm:$0xff] %v3342_v0  ;;  %558 = vst [vmem:[#allocation2 + $0x98] sm:$0xff] %v3342_v0 }
  0x70   : > { %559 = vst [vmem:[#allocation2 + $0x120] sm:$0xff] %v3342_v0  ;;  %560 = vst [vmem:[#allocation2 + $0x150] sm:$0xff] %v3342_v0 }
  0x71   : > { %561 = vst [vmem:[#allocation2 + $0x108] sm:$0xff] %v3342_v0  ;;  %562 = vst [vmem:[#allocation2 + $0x60] sm:$0xff] %v3342_v0 }
  0x72   : > { %563 = vst [vmem:[#allocation2 + $0xe0] sm:$0xff] %v3342_v0  ;;  %564 = vst [vmem:[#allocation2 + $0x188] sm:$0xff] %v3342_v0 }
  0x73   : > { %565 = vst [vmem:[#allocation2 + $0x138] sm:$0xff] %v3342_v0  ;;  %566 = vst [vmem:[#allocation2 + $0x140] sm:$0xff] %v3342_v0 }
  0x74   : > { %567 = vst [vmem:[#allocation2 + $0x80] sm:$0xff] %v3342_v0  ;;  %568 = vst [vmem:[#allocation2 + $0x1a8] sm:$0xff] %v3342_v0 }
  0x75   : > { %569 = vst [vmem:[#allocation2 + $0x1b8] sm:$0xff] %v3342_v0  ;;  %570 = vst [vmem:[#allocation2 + $0x28] sm:$0xff] %v3342_v0 }
  0x76   : > { %571 = vst [vmem:[#allocation2 + $0x1e8] sm:$0xff] %v3342_v0  ;;  %572 = vst [vmem:[#allocation2 + $0xf8] sm:$0xff] %v3342_v0 }
  0x77   : > { %573 = vst [vmem:[#allocation2 + $0x160] sm:$0xff] %v3342_v0  ;;  %574 = vst [vmem:[#allocation2 + $0x30] sm:$0xff] %v3342_v0 }
  0x78   : > { %575 = vst [vmem:[#allocation2 + $0x1e0] sm:$0xff] %v3342_v0  ;;  %576 = vst [vmem:[#allocation2] sm:$0xff] %v3342_v0 }
  0x79   : > { %577 = vst [vmem:[#allocation2 + $0xf0] sm:$0xff] %v3342_v0  ;;  %578 = vst [vmem:[#allocation2 + $0x8] sm:$0xff] %v3342_v0 }
  0x7a   : > { %579 = vst [vmem:[#allocation2 + $0x148] sm:$0xff] %v3342_v0  ;;  %580 = vst [vmem:[#allocation2 + $0x1d0] sm:$0xff] %v3342_v0 }
  0x7b   : > { %581 = vst [vmem:[#allocation2 + $0x100] sm:$0xff] %v3342_v0  ;;  %582 = vst [vmem:[#allocation2 + $0xc8] sm:$0xff] %v3342_v0 }
  0x7c   : > { %583 = vst [vmem:[#allocation2 + $0x40] sm:$0xff] %v3342_v0  ;;  %584 = vst [vmem:[#allocation2 + $0x1f8] sm:$0xff] %v3342_v0 }
  0x7d   : > { %585 = vst [vmem:[#allocation2 + $0x20] sm:$0xff] %v3342_v0  ;;  %586 = vst [vmem:[#allocation2 + $0x128] sm:$0xff] %v3342_v0 }
  0x7e   : > { %587 = vst [vmem:[#allocation2 + $0x1a0] sm:$0xff] %v3342_v0  ;;  %588 = vst [vmem:[#allocation2 + $0x1f0] sm:$0xff] %v3342_v0 }
  0x7f   : > { %589 = vst [vmem:[#allocation2 + $0xe8] sm:$0xff] %v3342_v0  ;;  %590 = vst [vmem:[#allocation2 + $0x78] sm:$0xff] %v3342_v0 }
  0x80   : > { %591 = vst [vmem:[#allocation2 + $0x70] sm:$0xff] %v3342_v0  ;;  %592 = vst [vmem:[#allocation2 + $0x90] sm:$0xff] %v3342_v0 }
  0x81   : > { %593 = vst [vmem:[#allocation2 + $0x1d8] sm:$0xff] %v3342_v0  ;;  %594 = vst [vmem:[#allocation2 + $0xd0] sm:$0xff] %v3342_v0 }
  0x82   : > { %595 = vst [vmem:[#allocation2 + $0xb8] sm:$0xff] %v3342_v0  ;;  %596 = vst [vmem:[#allocation2 + $0x88] sm:$0xff] %v3342_v0 }
  0x83   : > { %597 = vst [vmem:[#allocation2 + $0xa8] sm:$0xff] %v3342_v0  ;;  %598 = vst [vmem:[#allocation2 + $0x1c8] sm:$0xff] %v3342_v0 }
  0x84   : > { %599 = vst [vmem:[#allocation2 + $0x170] sm:$0xff] %v3342_v0  ;;  %600 = vst [vmem:[#allocation2 + $0x178] sm:$0xff] %v3342_v0 }
  0x85   : > { %601 = vst [vmem:[#allocation2 + $0x68] sm:$0xff] %v3342_v0  ;;  %602 = vst [vmem:[#allocation2 + $0x190] sm:$0xff] %v3342_v0 }
  0x86   : > { %603 = vst [vmem:[#allocation2 + $0x198] sm:$0xff] %v3342_v0  ;;  %604 = vst [vmem:[#allocation2 + $0x38] sm:$0xff] %v3342_v0 }
  0x87   : > { %605 = vst [vmem:[#allocation2 + $0xc0] sm:$0xff] %v3342_v0  ;;  %606 = vst [vmem:[#allocation2 + $0x1c0] sm:$0xff] %v3342_v0 }
  0x88   : > { %607 = vst [vmem:[#allocation2 + $0x158] sm:$0xff] %v3342_v0  ;;  %608 = vst [vmem:[#allocation2 + $0x10] sm:$0xff] %v3342_v0 }
  0x89   : > { %609 = vst [vmem:[#allocation2 + $0x58] sm:$0xff] %v3342_v0  ;;  %610 = vst [vmem:[#allocation2 + $0xa0] sm:$0xff] %v3342_v0 }
  0x8a PF: > { %v3150_v1 = vld [vmem:[%s3675_s7 + $0x38] sm:$0xff]   ;;  %v3343_v2 = vmov 0   ;;  %v3151_v3 = vld [vmem:[%s3675_s7 + $0x30] sm:$0xff]   ;;  %v3152_v4 = vld [vmem:[%s3675_s7 + $0x28] sm:$0xff]   ;;  %p2946_p11 = scmp.ne.s32.totalorder %s3332_s14, 2 }
  0x8b   : > { %1507 = vmatprep.subr.bf16.mxu0 %v3343_v2  ;;  %3073 = vmatprep.subr.bf16.mxu1 %v3343_v2  ;;  %v3153_v5 = vld [vmem:[%s3675_s7 + $0x20] sm:$0xff]   ;;  %v3154_v6 = vld [vmem:[%s3675_s7 + $0x18] sm:$0xff]   ;;  %v3155_v8 = vld [vmem:[%s3675_s7 + $0x10] sm:$0xff]  }
  0x8c   : > { %1508 = vmatpush1.bf16.msra.mxu0 %v3150_v1  ;;  %3089 = vmatpush1.bf16.msra.mxu1 %v3150_v1  ;;  %v3168_v7 = vld [vmem:[%s3677_s8 + $0x4] ss:$12 sps:$4 sm:$0xff]   ;;  %v3156_v10 = vld [vmem:[%s3675_s7 + $0x8] sm:$0xff]   ;;  %v3158_v12 = vld [vmem:[%s3675_s7 + $0x78] sm:$0xff]  }
  0x8d   : > { %1509 = vmatprep.subr.bf16.mxu0 %v3343_v2  ;;  %3074 = vmatprep.subr.bf16.mxu1 %v3343_v2  ;;  %v3171_v9 = vld [vmem:[%s3677_s8 + $0x244] ss:$12 sps:$4 sm:$0xff]   ;;  %v3160_v14 = vld [vmem:[%s3675_s7 + $0x68] sm:$0xff]   ;;  %v3162_v16 = vld [vmem:[%s3675_s7 + $0x58] sm:$0xff]  }
  0x8e   : > { %1539 = vmatprep.mubr.bf16.mxu0 %v3168_v7  ;;  %1731 = vmatprep.mubr.bf16.mxu1 %v3171_v9  ;;  %v3157_v11 = vld [vmem:[%s3675_s7] sm:$0xff]   ;;  %v3159_v13 = vld [vmem:[%s3675_s7 + $0x70] sm:$0xff]   ;;  %v3164_v18 = vld [vmem:[%s3675_s7 + $0x48] sm:$0xff]  }
  0x8f   : > { %v3161_v15 = vld [vmem:[%s3675_s7 + $0x60] sm:$0xff]   ;;  %v3163_v17 = vld [vmem:[%s3675_s7 + $0x50] sm:$0xff]   ;;  %v3172_v20 = vld [vmem:[%s3675_s7 + $0xb8] sm:$0xff]  }
  0x90   : > { %1510 = vmatpush1.bf16.msra.mxu0 %v3151_v3  ;;  %3090 = vmatpush1.bf16.msra.mxu1 %v3151_v3  ;;  %v3165_v19 = vld [vmem:[%s3675_s7 + $0x40] sm:$0xff]   ;;  %v3173_v23 = vld [vmem:[%s3677_s8 + $0x1c] ss:$12 sps:$4 sm:$0xff]   ;;  %v3179_v25 = vld [vmem:[%s3675_s7 + $0xb0] sm:$0xff]  }
  0x91   : > { %1511 = vmatprep.subr.bf16.mxu0 %v3343_v2  ;;  %3075 = vmatprep.subr.bf16.mxu1 %v3343_v2  ;;  %v3166_v21 = vld [vmem:[%s3677_s8] ss:$12 sps:$4 sm:$0xff]   ;;  %v3175_v24 = vld [vmem:[%s3677_s8 + $0x25c] ss:$12 sps:$4 sm:$0xff]   ;;  %v3177_v27 = vld [vmem:[%s3677_s8 + $0x18] ss:$12 sps:$4 sm:$0xff]  }
  0x92   : > { %v3169_v22 = vld [vmem:[%s3677_s8 + $0x240] ss:$12 sps:$4 sm:$0xff]   ;;  %v3178_v28 = vld [vmem:[%s3677_s8 + $0x258] ss:$12 sps:$4 sm:$0xff]   ;;  %v3184_v32 = vld [vmem:[%s3677_s8 + $0x30] ss:$12 sps:$4 sm:$0xff]  }
  0x93   : > { %v3186_v26 = vld [vmem:[%s3675_s7 + $0xa8] sm:$0xff]   ;;  %v3180_v29 = vld [vmem:[%s3677_s8 + $0x34] ss:$12 sps:$4 sm:$0xff]   ;;  %v3200_v33 = vld [vmem:[%s3675_s7 + $0x98] sm:$0xff]  }
  0x94   : > { %1512 = vmatpush1.bf16.msra.mxu0 %v3152_v4  ;;  %3091 = vmatpush1.bf16.msra.mxu1 %v3152_v4  ;;  %v3182_v30 = vld [vmem:[%s3677_s8 + $0x274] ss:$12 sps:$4 sm:$0xff]   ;;  %v3185_v34 = vld [vmem:[%s3677_s8 + $0x270] ss:$12 sps:$4 sm:$0xff]   ;;  %v3187_v35 = vld [vmem:[%s3677_s8 + $0x4c] ss:$12 sps:$4 sm:$0xff]  }
  0x95   : > { %1513 = vmatprep.subr.bf16.mxu0 %v3343_v2  ;;  %3076 = vmatprep.subr.bf16.mxu1 %v3343_v2  ;;  %v3193_v31 = vld [vmem:[%s3675_s7 + $0xa0] sm:$0xff]   ;;  %v3189_v36 = vld [vmem:[%s3677_s8 + $0x28c] ss:$12 sps:$4 sm:$0xff]   ;;  %v3207_v37 = vld [vmem:[%s3675_s7 + $0x90] sm:$0xff]  }
  0x96   : > { %v3191_v38 = vld [vmem:[%s3677_s8 + $0x48] ss:$12 sps:$4 sm:$0xff]   ;;  %v3194_v40 = vld [vmem:[%s3677_s8 + $0x64] ss:$12 sps:$4 sm:$0xff]   ;;  %v3198_v44 = vld [vmem:[%s3677_s8 + $0x60] ss:$12 sps:$4 sm:$0xff]  }
  0x97   : > { %v3192_v39 = vld [vmem:[%s3677_s8 + $0x288] ss:$12 sps:$4 sm:$0xff]   ;;  %v3196_v41 = vld [vmem:[%s3677_s8 + $0x2a4] ss:$12 sps:$4 sm:$0xff]   ;;  %v3199_v45 = vld [vmem:[%s3677_s8 + $0x2a0] ss:$12 sps:$4 sm:$0xff]  }
  0x98   : > { %1514 = vmatpush1.bf16.msra.mxu0 %v3153_v5  ;;  %3092 = vmatpush1.bf16.msra.mxu1 %v3153_v5  ;;  %v3214_v42 = vld [vmem:[%s3675_s7 + $0x88] sm:$0xff]   ;;  %v3221_v43 = vld [vmem:[%s3675_s7 + $0x80] sm:$0xff]   ;;  %v3212_v52 = vld [vmem:[%s3677_s8 + $0x90] ss:$12 sps:$4 sm:$0xff]  }
  0x99   : > { %1515 = vmatprep.subr.bf16.mxu0 %v3343_v2  ;;  %3077 = vmatprep.subr.bf16.mxu1 %v3343_v2  ;;  %v3201_v46 = vld [vmem:[%s3677_s8 + $0x7c] ss:$12 sps:$4 sm:$0xff]   ;;  %v3205_v48 = vld [vmem:[%s3677_s8 + $0x78] ss:$12 sps:$4 sm:$0xff]   ;;  %v3208_v50 = vld [vmem:[%s3677_s8 + $0x94] ss:$12 sps:$4 sm:$0xff]  }
  0x9a   : > { %v3203_v47 = vld [vmem:[%s3677_s8 + $0x2bc] ss:$12 sps:$4 sm:$0xff]   ;;  %v3206_v49 = vld [vmem:[%s3677_s8 + $0x2b8] ss:$12 sps:$4 sm:$0xff]   ;;  %v3210_v51 = vld [vmem:[%s3677_s8 + $0x2d4] ss:$12 sps:$4 sm:$0xff]  }
  0x9b   : > { %v3213_v53 = vld [vmem:[%s3677_s8 + $0x2d0] ss:$12 sps:$4 sm:$0xff]   ;;  %v3215_v54 = vld [vmem:[%s3677_s8 + $0xac] ss:$12 sps:$4 sm:$0xff]   ;;  %v3219_v56 = vld [vmem:[%s3677_s8 + $0xa8] ss:$12 sps:$4 sm:$0xff]  }
  0x9c   : > { %1516 = vmatpush1.bf16.msra.mxu0 %v3154_v6  ;;  %3093 = vmatpush1.bf16.msra.mxu1 %v3154_v6  ;;  %v3217_v55 = vld [vmem:[%s3677_s8 + $0x2ec] ss:$12 sps:$4 sm:$0xff]   ;;  %v3220_v57 = vld [vmem:[%s3677_s8 + $0x2e8] ss:$12 sps:$4 sm:$0xff]   ;;  %v3222_v58 = vld [vmem:[%s3677_s8 + $0xc4] ss:$12 sps:$4 sm:$0xff]  }
  0x9d   : > { %1517 = vmatprep.subr.bf16.mxu0 %v3343_v2  ;;  %3078 = vmatprep.subr.bf16.mxu1 %v3343_v2  ;;  %v3224_v59 = vld [vmem:[%s3677_s8 + $0x8] ss:$12 sps:$4 sm:$0xff]   ;;  %v3225_v60 = vld [vmem:[%s3677_s8 + $0xc0] ss:$12 sps:$4 sm:$0xff]   ;;  %v3229_v63 = vld [vmem:[%s3677_s8 + $0x38] ss:$12 sps:$4 sm:$0xff]  }
  0x9e   : > { %v3226_v61 = vld [vmem:[%s3677_s8 + $0x20] ss:$12 sps:$4 sm:$0xff]   ;;  %v3227_v62 = vld [vmem:[%s3677_s8 + $0xdc] ss:$12 sps:$4 sm:$0xff]   ;;  %v3230_v0 = vld [vmem:[%s3677_s8 + $0xd8] ss:$12 sps:$4 sm:$0xff]  }
  0x9f   : > { %v3231_v1 = vld [vmem:[%s3677_s8 + $0x50] ss:$12 sps:$4 sm:$0xff]   ;;  %v3234_v3 = vld [vmem:[%s3677_s8 + $0x68] ss:$12 sps:$4 sm:$0xff]   ;;  %v3236_v5 = vld [vmem:[%s3677_s8 + $0x80] ss:$12 sps:$4 sm:$0xff]  }
  0xa0   : > { %1518 = vmatpush1.bf16.msra.mxu0 %v3155_v8  ;;  %3094 = vmatpush1.bf16.msra.mxu1 %v3155_v8  ;;  %v3235_v4 = vld [vmem:[%s3677_s8 + $0xf0] ss:$12 sps:$4 sm:$0xff]   ;;  %v3237_v6 = vld [vmem:[%s3677_s8 + $0x10c] ss:$12 sps:$4 sm:$0xff]   ;;  %v3240_v8 = vld [vmem:[%s3677_s8 + $0x108] ss:$12 sps:$4 sm:$0xff]  }
  0xa1   : > { %1519 = vmatprep.subr.bf16.mxu0 %v3343_v2  ;;  %3079 = vmatprep.subr.bf16.mxu1 %v3343_v2  ;;  %v3239_v7 = vld [vmem:[%s3677_s8 + $0x98] ss:$12 sps:$4 sm:$0xff]   ;;  %v3241_v9 = vld [vmem:[%s3677_s8 + $0xb0] ss:$12 sps:$4 sm:$0xff]  }
  0xa4   : > { %1520 = vmatpush1.bf16.msra.mxu0 %v3156_v10  ;;  %3095 = vmatpush1.bf16.msra.mxu1 %v3156_v10  ;;  %v3242_v10 = vld [vmem:[%s3677_s8 + $0x124] ss:$12 sps:$4 sm:$0xff]  }
  0xa5   : > { %1521 = vmatprep.subr.bf16.mxu0 %v3343_v2  ;;  %3080 = vmatprep.subr.bf16.mxu1 %v3343_v2 }
  0xa8   : > { %1522 = vmatpush1.bf16.msra.mxu0 %v3157_v11  ;;  %3096 = vmatpush1.bf16.msra.mxu1 %v3157_v11  ;;  %v3244_v11 = vld [vmem:[%s3677_s8 + $0xc8] ss:$12 sps:$4 sm:$0xff]  }
  0xa9   : > { %1523 = vmatprep.subr.bf16.mxu0 %v3343_v2  ;;  %3081 = vmatprep.subr.bf16.mxu1 %v3343_v2 }
  0xac   : > { %1524 = vmatpush2.bf16.msra.mxu0 %v3158_v12  ;;  %3097 = vmatpush2.bf16.msra.mxu1 %v3158_v12  ;;  %v3245_v12 = vld [vmem:[%s3677_s8 + $0x120] ss:$12 sps:$4 sm:$0xff]  }
  0xad   : > { %1525 = vmatprep.subr.bf16.mxu0 %v3343_v2  ;;  %3082 = vmatprep.subr.bf16.mxu1 %v3343_v2 }
  0xb0   : > { %1526 = vmatpush2.bf16.msra.mxu0 %v3159_v13  ;;  %3098 = vmatpush2.bf16.msra.mxu1 %v3159_v13  ;;  %v3246_v13 = vld [vmem:[%s3677_s8 + $0xe0] ss:$12 sps:$4 sm:$0xff]  }
  0xb1   : > { %1527 = vmatprep.subr.bf16.mxu0 %v3343_v2  ;;  %3083 = vmatprep.subr.bf16.mxu1 %v3343_v2 }
  0xb4   : > { %1528 = vmatpush2.bf16.msra.mxu0 %v3160_v14  ;;  %3099 = vmatpush2.bf16.msra.mxu1 %v3160_v14  ;;  %v3247_v14 = vld [vmem:[%s3677_s8 + $0x13c] ss:$12 sps:$4 sm:$0xff]  }
  0xb5   : > { %1529 = vmatprep.subr.bf16.mxu0 %v3343_v2  ;;  %3084 = vmatprep.subr.bf16.mxu1 %v3343_v2 }
  0xb8   : > { %1530 = vmatpush2.bf16.msra.mxu0 %v3161_v15  ;;  %3100 = vmatpush2.bf16.msra.mxu1 %v3161_v15  ;;  %v3249_v15 = vld [vmem:[%s3677_s8 + $0xf8] ss:$12 sps:$4 sm:$0xff]  }
  0xb9   : > { %1531 = vmatprep.subr.bf16.mxu0 %v3343_v2  ;;  %3085 = vmatprep.subr.bf16.mxu1 %v3343_v2 }
  0xbc   : > { %1532 = vmatpush2.bf16.msra.mxu0 %v3162_v16  ;;  %3101 = vmatpush2.bf16.msra.mxu1 %v3162_v16  ;;  %v3250_v16 = vld [vmem:[%s3677_s8 + $0x138] ss:$12 sps:$4 sm:$0xff]  }
  0xbd   : > { %1533 = vmatprep.subr.bf16.mxu0 %v3343_v2  ;;  %3086 = vmatprep.subr.bf16.mxu1 %v3343_v2 }
  0xc0   : > { %1534 = vmatpush2.bf16.msra.mxu0 %v3163_v17  ;;  %3102 = vmatpush2.bf16.msra.mxu1 %v3163_v17  ;;  %v3251_v17 = vld [vmem:[%s3677_s8 + $0x110] ss:$12 sps:$4 sm:$0xff]  }
  0xc1   : > { %1535 = vmatprep.subr.bf16.mxu0 %v3343_v2  ;;  %3087 = vmatprep.subr.bf16.mxu1 %v3343_v2 }
  0xc4   : > { %1536 = vmatpush2.bf16.msra.mxu0 %v3164_v18  ;;  %3103 = vmatpush2.bf16.msra.mxu1 %v3164_v18  ;;  %v3252_v18 = vld [vmem:[%s3677_s8 + $0x154] ss:$12 sps:$4 sm:$0xff]  }
  0xc5   : > { %1537 = vmatprep.subr.bf16.mxu0 %v3343_v2  ;;  %3088 = vmatprep.subr.bf16.mxu1 %v3343_v2  ;;  %v3232_v2 = vld [vmem:[%s3677_s8 + $0xf4] ss:$12 sps:$4 sm:$0xff]  }
  0xc8   : > { %1538 = vmatpush2.bf16.msra.mxu0 %v3165_v19  ;;  %3104 = vmatpush2.bf16.msra.mxu1 %v3165_v19  ;;  %v3254_v19 = vld [vmem:[%s3677_s8 + $0x128] ss:$12 sps:$4 sm:$0xff]  }
  0xc9   : > { %2993 = vmatprep.subr.bf16.mxu1 %v3172_v20 }
  0xcb   : > { %1540 = vmatmul.mubr.bf16.vlgmr.msra.gmra.mxu0 %v3166_v21  ;;  %1732 = vmatmul.mubr.bf16.vlgmr.msra.gmra.mxu1 %v3169_v22  ;;  %v3256_v21 = vld [vmem:[%s3677_s8 + $0x140] ss:$12 sps:$4 sm:$0xff]  }
  0xcc   : > { %2994 = vmatpush3.bf16.msra.mxu1 %v3172_v20  ;;  %1547 = vmatprep.mubr.bf16.mxu0 %v3173_v23  ;;  %v3255_v20 = vld [vmem:[%s3677_s8 + $0x150] ss:$12 sps:$4 sm:$0xff]   ;;  %v3257_v22 = vld [vmem:[%s3677_s8 + $0x16c] ss:$12 sps:$4 sm:$0xff]  }
  0xcd   : > { %1739 = vmatprep.mubr.bf16.mxu1 %v3175_v24  ;;  %2995 = vmatprep.subr.bf16.mxu1 %v3179_v25  ;;  %v3259_v23 = vld [vmem:[%s3677_s8 + $0x158] ss:$12 sps:$4 sm:$0xff]   ;;  %v3260_v24 = vld [vmem:[%s3677_s8 + $0x168] ss:$12 sps:$4 sm:$0xff]  }
  0xd0   : > { %2996 = vmatpush3.bf16.msra.mxu1 %v3179_v25  ;;  %v3261_v25 = vld [vmem:[%s3677_s8 + $0x170] ss:$12 sps:$4 sm:$0xff]  }
  0xd1   : > { %2997 = vmatprep.subr.bf16.mxu1 %v3186_v26 }
  0xd3   : > { %1548 = vmatmul.mubr.bf16.gmra.mxu0 %v3177_v27  ;;  %1740 = vmatmul.mubr.bf16.gmra.mxu1 %v3178_v28  ;;  %v3264_v27 = vld [vmem:[%s3677_s8 + $0x188] ss:$12 sps:$4 sm:$0xff]   ;;  %v3265_v28 = vld [vmem:[%s3677_s8 + $0x180] ss:$12 sps:$4 sm:$0xff]  }
  0xd4   : > { %1555 = vmatprep.mubr.bf16.mxu0 %v3180_v29  ;;  %1747 = vmatprep.mubr.bf16.mxu1 %v3182_v30  ;;  %v3266_v29 = vld [vmem:[%s3677_s8 + $0x1a0] ss:$12 sps:$4 sm:$0xff]   ;;  %v3267_v30 = vld [vmem:[%s3677_s8 + $0x19c] ss:$12 sps:$4 sm:$0xff]  }
  0xd5   : > { %2998 = vmatpush3.bf16.msra.mxu1 %v3186_v26  ;;  %v3262_v26 = vld [vmem:[%s3677_s8 + $0x184] ss:$12 sps:$4 sm:$0xff]  }
  0xd6   : > { %2999 = vmatprep.subr.bf16.mxu1 %v3193_v31 }
  0xd9   : > { %3000 = vmatpush3.bf16.msra.mxu1 %v3193_v31  ;;  %v3269_v31 = vld [vmem:[%s3677_s8 + $0x1b8] ss:$12 sps:$4 sm:$0xff]  }
  0xda   : > { %3001 = vmatprep.subr.bf16.mxu1 %v3200_v33 }
  0xdb   : > { %1556 = vmatmul.mubr.bf16.gmra.mxu0 %v3184_v32  ;;  %1748 = vmatmul.mubr.bf16.gmra.mxu1 %v3185_v34  ;;  %v3270_v32 = vld [vmem:[%s3677_s8 + $0x198] ss:$12 sps:$4 sm:$0xff]   ;;  %v3272_v34 = vld [vmem:[%s3677_s8 + $0x1b4] ss:$12 sps:$4 sm:$0xff]  }
  0xdc   : > { %1563 = vmatprep.mubr.bf16.mxu0 %v3187_v35  ;;  %1755 = vmatprep.mubr.bf16.mxu1 %v3189_v36  ;;  %v3274_v35 = vld [vmem:[%s3677_s8 + $0x1e8] ss:$12 sps:$4 sm:$0xff]   ;;  %v3275_v36 = vld [vmem:[%s3677_s8 + $0x1b0] ss:$12 sps:$4 sm:$0xff]  }
  0xdd   : > { %3002 = vmatpush3.bf16.msra.mxu1 %v3200_v33  ;;  %v3271_v33 = vld [vmem:[%s3677_s8 + $0x1d0] ss:$12 sps:$4 sm:$0xff]  }
  0xde   : > { %3003 = vmatprep.subr.bf16.mxu1 %v3207_v37 }
  0xe1   : > { %3004 = vmatpush3.bf16.msra.mxu1 %v3207_v37  ;;  %v3276_v37 = vld [vmem:[%s3677_s8 + $0x200] ss:$12 sps:$4 sm:$0xff]  }
  0xe2   : > { %3005 = vmatprep.subr.bf16.mxu1 %v3214_v42 }
  0xe3   : > { %1564 = vmatmul.mubr.bf16.gmra.mxu0 %v3191_v38  ;;  %1756 = vmatmul.mubr.bf16.gmra.mxu1 %v3192_v39  ;;  %v3277_v38 = vld [vmem:[%s3677_s8 + $0x1cc] ss:$12 sps:$4 sm:$0xff]  }
  0xe4   : > { %1571 = vmatprep.mubr.bf16.mxu0 %v3194_v40  ;;  %1763 = vmatprep.mubr.bf16.mxu1 %v3196_v41  ;;  %v3279_v39 = vld [vmem:[%s3677_s8 + $0x218] ss:$12 sps:$4 sm:$0xff]   ;;  %v3280_v40 = vld [vmem:[%s3677_s8 + $0x1c8] ss:$12 sps:$4 sm:$0xff]   ;;  %v3281_v41 = vld [vmem:[%s3677_s8 + $0x230] ss:$12 sps:$4 sm:$0xff]  }
  0xe5   : > { %3006 = vmatpush3.bf16.msra.mxu1 %v3214_v42  ;;  %v3282_v42 = vld [vmem:[%s3677_s8 + $0x1e4] ss:$12 sps:$4 sm:$0xff]  }
  0xe6   : > { %3007 = vmatprep.subr.bf16.mxu1 %v3221_v43 }
  0xe9   : > { %3008 = vmatpush3.bf16.msra.mxu1 %v3221_v43  ;;  %v3284_v43 = vld [vmem:[%s3677_s8 + $0x248] ss:$12 sps:$4 sm:$0xff]  }
  0xeb   : > { %1572 = vmatmul.mubr.bf16.gmra.mxu0 %v3198_v44  ;;  %1764 = vmatmul.mubr.bf16.gmra.mxu1 %v3199_v45  ;;  %v3285_v44 = vld [vmem:[%s3677_s8 + $0x1e0] ss:$12 sps:$4 sm:$0xff]  }
  0xec   : > { %1579 = vmatprep.mubr.bf16.mxu0 %v3201_v46  ;;  %1771 = vmatprep.mubr.bf16.mxu1 %v3203_v47  ;;  %v3286_v45 = vld [vmem:[%s3677_s8 + $0x260] ss:$12 sps:$4 sm:$0xff]   ;;  %v3287_v46 = vld [vmem:[%s3677_s8 + $0x1fc] ss:$12 sps:$4 sm:$0xff]   ;;  %v3289_v47 = vld [vmem:[%s3677_s8 + $0x278] ss:$12 sps:$4 sm:$0xff]  }
  0xf3   : > { %1580 = vmatmul.mubr.bf16.gmra.mxu0 %v3205_v48  ;;  %1772 = vmatmul.mubr.bf16.gmra.mxu1 %v3206_v49  ;;  %v3290_v48 = vld [vmem:[%s3677_s8 + $0x1f8] ss:$12 sps:$4 sm:$0xff]   ;;  %v3291_v49 = vld [vmem:[%s3677_s8 + $0x290] ss:$12 sps:$4 sm:$0xff]  }
  0xf4   : > { %1587 = vmatprep.mubr.bf16.mxu0 %v3208_v50  ;;  %1779 = vmatprep.mubr.bf16.mxu1 %v3210_v51  ;;  %v3292_v50 = vld [vmem:[%s3677_s8 + $0x214] ss:$12 sps:$4 sm:$0xff]  }
  0xf5   : > { %v3294_v51 = vld [vmem:[%s3677_s8 + $0x2a8] ss:$12 sps:$4 sm:$0xff]  }
  0xfb   : > { %1588 = vmatmul.mubr.bf16.gmra.mxu0 %v3212_v52  ;;  %1780 = vmatmul.mubr.bf16.gmra.mxu1 %v3213_v53  ;;  %v3295_v52 = vld [vmem:[%s3677_s8 + $0x210] ss:$12 sps:$4 sm:$0xff]   ;;  %v3296_v53 = vld [vmem:[%s3677_s8 + $0x2c0] ss:$12 sps:$4 sm:$0xff]  }
  0xfc   : > { %1595 = vmatprep.mubr.bf16.mxu0 %v3215_v54  ;;  %1787 = vmatprep.mubr.bf16.mxu1 %v3217_v55  ;;  %v3297_v54 = vld [vmem:[%s3677_s8 + $0x22c] ss:$12 sps:$4 sm:$0xff]  }
  0xfd   : > { %v3299_v55 = vld [vmem:[%s3677_s8 + $0x2d8] ss:$12 sps:$4 sm:$0xff]  }
 0x103   : > { %1596 = vmatmul.mubr.bf16.gmra.mxu0 %v3219_v56  ;;  %1788 = vmatmul.mubr.bf16.gmra.mxu1 %v3220_v57  ;;  %v3300_v56 = vld [vmem:[%s3677_s8 + $0x228] ss:$12 sps:$4 sm:$0xff]   ;;  %v3301_v57 = vld [vmem:[%s3677_s8 + $0x2f0] ss:$12 sps:$4 sm:$0xff]  }
 0x104   : > { %1603 = vmatprep.mubr.bf16.mxu0 %v3222_v58  ;;  %3009 = vmatprep.mubr.bf16.mxu1 %v3224_v59 }
 0x10b   : > { %1604 = vmatmul.mubr.bf16.gmra.mxu0 %v3225_v60  ;;  %3010 = vmatmul.mubr.bf16.vlgmr.msra.gmra.mxu1 %v3226_v61 }
 0x10c   : > { %1611 = vmatprep.mubr.bf16.mxu0 %v3227_v62  ;;  %3013 = vmatprep.mubr.bf16.mxu1 %v3229_v63 }
 0x113   : > { %1612 = vmatmul.mubr.bf16.gmra.mxu0 %v3230_v0  ;;  %3014 = vmatmul.mubr.bf16.gmra.mxu1 %v3231_v1 }
 0x114   : > { %1619 = vmatprep.mubr.bf16.mxu0 %v3232_v2  ;;  %3017 = vmatprep.mubr.bf16.mxu1 %v3234_v3 }
 0x11b   : > { %1620 = vmatmul.mubr.bf16.gmra.mxu0 %v3235_v4  ;;  %3018 = vmatmul.mubr.bf16.gmra.mxu1 %v3236_v5 }
 0x11c   : > { %1627 = vmatprep.mubr.bf16.mxu0 %v3237_v6  ;;  %3021 = vmatprep.mubr.bf16.mxu1 %v3239_v7 }
 0x123   : > { %1628 = vmatmul.mubr.bf16.gmra.mxu0 %v3240_v8  ;;  %3022 = vmatmul.mubr.bf16.gmra.mxu1 %v3241_v9 }
 0x124   : > { %1635 = vmatprep.mubr.bf16.mxu0 %v3242_v10  ;;  %3025 = vmatprep.mubr.bf16.mxu1 %v3244_v11 }
 0x12b   : > { %1636 = vmatmul.mubr.bf16.gmra.mxu0 %v3245_v12  ;;  %3026 = vmatmul.mubr.bf16.gmra.mxu1 %v3246_v13 }
 0x12c   : > { %1643 = vmatprep.mubr.bf16.mxu0 %v3247_v14  ;;  %3029 = vmatprep.mubr.bf16.mxu1 %v3249_v15 }
 0x133   : > { %1644 = vmatmul.mubr.bf16.gmra.mxu0 %v3250_v16  ;;  %3030 = vmatmul.mubr.bf16.gmra.mxu1 %v3251_v17 }
 0x134   : > { %1651 = vmatprep.mubr.bf16.mxu0 %v3252_v18  ;;  %3033 = vmatprep.mubr.bf16.mxu1 %v3254_v19 }
 0x13b   : > { %1652 = vmatmul.mubr.bf16.gmra.mxu0 %v3255_v20  ;;  %3034 = vmatmul.mubr.bf16.gmra.mxu1 %v3256_v21 }
 0x13c   : > { %1659 = vmatprep.mubr.bf16.mxu0 %v3257_v22  ;;  %3037 = vmatprep.mubr.bf16.mxu1 %v3259_v23 }
 0x143   : > { %1660 = vmatmul.mubr.bf16.gmra.mxu0 %v3260_v24  ;;  %3038 = vmatmul.mubr.bf16.gmra.mxu1 %v3261_v25 }
 0x144   : > { %1667 = vmatprep.mubr.bf16.mxu0 %v3262_v26  ;;  %3041 = vmatprep.mubr.bf16.mxu1 %v3264_v27 }
 0x14b   : > { %1668 = vmatmul.mubr.bf16.gmra.mxu0 %v3265_v28  ;;  %3042 = vmatmul.mubr.bf16.gmra.mxu1 %v3266_v29 }
 0x14c   : > { %1675 = vmatprep.mubr.bf16.mxu0 %v3267_v30  ;;  %3045 = vmatprep.mubr.bf16.mxu1 %v3269_v31 }
 0x153   : > { %1676 = vmatmul.mubr.bf16.gmra.mxu0 %v3270_v32  ;;  %3046 = vmatmul.mubr.bf16.gmra.mxu1 %v3271_v33 }
 0x154   : > { %1683 = vmatprep.mubr.bf16.mxu0 %v3272_v34  ;;  %3049 = vmatprep.mubr.bf16.mxu1 %v3274_v35 }
 0x15b   : > { %1684 = vmatmul.mubr.bf16.gmra.mxu0 %v3275_v36  ;;  %3050 = vmatmul.mubr.bf16.gmra.mxu1 %v3276_v37 }
 0x15c   : > { %1691 = vmatprep.mubr.bf16.mxu0 %v3277_v38  ;;  %3053 = vmatprep.mubr.bf16.mxu1 %v3279_v39 }
 0x163   : > { %1692 = vmatmul.mubr.bf16.gmra.mxu0 %v3280_v40  ;;  %3054 = vmatmul.mubr.bf16.gmra.mxu1 %v3281_v41 }
 0x164   : > { %1699 = vmatprep.mubr.bf16.mxu0 %v3282_v42  ;;  %3057 = vmatprep.mubr.bf16.mxu1 %v3284_v43 }
 0x16b   : > { %1700 = vmatmul.mubr.bf16.gmra.mxu0 %v3285_v44  ;;  %3058 = vmatmul.mubr.bf16.gmra.mxu1 %v3286_v45 }
 0x16c   : > { %1707 = vmatprep.mubr.bf16.mxu0 %v3287_v46  ;;  %3061 = vmatprep.mubr.bf16.mxu1 %v3289_v47 }
 0x173   : > { %1708 = vmatmul.mubr.bf16.gmra.mxu0 %v3290_v48  ;;  %3062 = vmatmul.mubr.bf16.gmra.mxu1 %v3291_v49 }
 0x174   : > { %1715 = vmatprep.mubr.bf16.mxu0 %v3292_v50  ;;  %3065 = vmatprep.mubr.bf16.mxu1 %v3294_v51 }
 0x17b   : > { %1716 = vmatmul.mubr.bf16.gmra.mxu0 %v3295_v52  ;;  %3066 = vmatmul.mubr.bf16.gmra.mxu1 %v3296_v53 }
 0x17c   : > { %1723 = vmatprep.mubr.bf16.mxu0 %v3297_v54  ;;  %3069 = vmatprep.mubr.bf16.mxu1 %v3299_v55 }
 0x183   : > { %1724 = vmatmul.mubr.bf16.gmra.mxu0 %v3300_v56  ;;  %3070 = vmatmul.mubr.bf16.gmra.mxu1 %v3301_v57 }
 0x18b   : > { %v3896_v58 = vpop.f32.mrf.mxu0  ;;  %v3898_v59 = vpop.f32.mrf.mxu1 }
 0x18d   : > { %v1543_v60 = vpop.f32.mrf.mxu0  ;;  %v1735_v61 = vpop.f32.mrf.mxu1 }
 0x18e   : > { %v613_v61 = vld [vmem:[#allocation2 + $0xd8] sm:$0xff] }
 0x18f   : > { %v3900_v62 = vpop.f32.mrf.mxu0  ;;  %v3902_v63 = vpop.f32.mrf.mxu1 }
 0x191   : > { %v1546_v0 = vpop.f32.mrf.mxu0  ;;  %v1738_v1 = vpop.f32.mrf.mxu1 }
 0x193   : > { %v1549_v2 = vpop.f32.mrf.mxu0  ;;  %v3904_v3 = vpop.f32.mrf.mxu1 }
 0x195   : > { %v1551_v4 = vpop.f32.mrf.mxu0  ;;  %v1743_v5 = vpop.f32.mrf.mxu1 }
 0x196   : > { %v611_v5 = vld [vmem:[#allocation2 + $0xb0] sm:$0xff] }
 0x197   : > { %v3906_v6 = vpop.f32.mrf.mxu0  ;;  %v3908_v7 = vpop.f32.mrf.mxu1 }
 0x199   : > { %v1554_v8 = vpop.f32.mrf.mxu0  ;;  %v1746_v9 = vpop.f32.mrf.mxu1 }
 0x19b   : > { %v3910_v10 = vpop.f32.mrf.mxu0  ;;  %v3912_v11 = vpop.f32.mrf.mxu1 }
 0x19d   : > { %v1559_v12 = vpop.f32.mrf.mxu0  ;;  %v1751_v13 = vpop.f32.mrf.mxu1 }
 0x19f   : > { %v3914_v14 = vpop.f32.mrf.mxu0  ;;  %v3916_v15 = vpop.f32.mrf.mxu1 }
 0x1a1   : > { %v1562_v16 = vpop.f32.mrf.mxu0  ;;  %v1754_v17 = vpop.f32.mrf.mxu1 }
 0x1a2   : > { %v614_v16 = vld [vmem:[#allocation2 + $0x18] sm:$0xff] }
 0x1a3   : > { %v3918_v18 = vpop.f32.mrf.mxu0  ;;  %v3920_v19 = vpop.f32.mrf.mxu1 }
 0x1a5   : > { %v1567_v20 = vpop.f32.mrf.mxu0  ;;  %v1759_v21 = vpop.f32.mrf.mxu1 }
 0x1a7   : > { %v3922_v22 = vpop.f32.mrf.mxu0  ;;  %v3924_v23 = vpop.f32.mrf.mxu1 }
 0x1a9   : > { %v1570_v24 = vpop.f32.mrf.mxu0  ;;  %v1762_v25 = vpop.f32.mrf.mxu1 }
 0x1aa   : > { %v612_v25 = vld [vmem:[#allocation2 + $0x1b0] sm:$0xff] }
 0x1ab   : > { %v3926_v26 = vpop.f32.mrf.mxu0  ;;  %v3928_v27 = vpop.f32.mrf.mxu1 }
 0x1ad   : > { %v1575_v28 = vpop.f32.mrf.mxu0  ;;  %v1767_v29 = vpop.f32.mrf.mxu1 }
 0x1af   : > { %v3930_v30 = vpop.f32.mrf.mxu0  ;;  %v3932_v31 = vpop.f32.mrf.mxu1 }
 0x1b1   : > { %v1578_v32 = vpop.f32.mrf.mxu0  ;;  %v1770_v33 = vpop.f32.mrf.mxu1 }
 0x1b2   : > { %v617_v33 = vld [vmem:[#allocation2 + $0x130] sm:$0xff] }
 0x1b3   : > { %v3934_v34 = vpop.f32.mrf.mxu0  ;;  %v3936_v35 = vpop.f32.mrf.mxu1 }
 0x1b5   : > { %v1583_v36 = vpop.f32.mrf.mxu0  ;;  %v1775_v37 = vpop.f32.mrf.mxu1 }
 0x1b7   : > { %v3938_v38 = vpop.f32.mrf.mxu0  ;;  %v3940_v39 = vpop.f32.mrf.mxu1 }
 0x1b9   : > { %v1586_v40 = vpop.f32.mrf.mxu0  ;;  %v1778_v41 = vpop.f32.mrf.mxu1 }
 0x1ba   : > { %v615_v41 = vld [vmem:[#allocation2 + $0x50] sm:$0xff] }
 0x1bb   : > { %v3942_v42 = vpop.f32.mrf.mxu0  ;;  %v3944_v43 = vpop.f32.mrf.mxu1 }
 0x1bd   : > { %v1591_v44 = vpop.f32.mrf.mxu0  ;;  %v1783_v45 = vpop.f32.mrf.mxu1 }
 0x1bf   : > { %v3946_v46 = vpop.f32.mrf.mxu0  ;;  %v3948_v47 = vpop.f32.mrf.mxu1 }
 0x1c1   : > { %v1594_v48 = vpop.f32.mrf.mxu0  ;;  %v1786_v49 = vpop.f32.mrf.mxu1 }
 0x1c2   : > { %v618_v49 = vld [vmem:[#allocation2 + $0x48] sm:$0xff] }
 0x1c3   : > { %v3950_v50 = vpop.f32.mrf.mxu0  ;;  %v3952_v51 = vpop.f32.mrf.mxu1 }
 0x1c5   : > { %v1599_v52 = vpop.f32.mrf.mxu0  ;;  %v1791_v53 = vpop.f32.mrf.mxu1 }
 0x1c7   : > { %v3954_v54 = vpop.f32.mrf.mxu0  ;;  %v3956_v55 = vpop.f32.mrf.mxu1 }
 0x1c9   : > { %v1602_v56 = vpop.f32.mrf.mxu0  ;;  %v1794_v57 = vpop.f32.mrf.mxu1 }
 0x1ca   : > { %v616_v57 = vld [vmem:[#allocation2 + $0x168] sm:$0xff] }
 0x1cb   : > { %v3958_v60 = vpop.f32.mrf.mxu0  ;;  %v3011_v0 = vpop.f32.mrf.mxu1 }
 0x1cc   : > { %v1839_v1 = vadd.f32 %v3011_v0, %v1549_v2 }
 0x1cd   : > { %v1607_v4 = vpop.f32.mrf.mxu0  ;;  %v1830_v8 = vpop.f32.mrf.mxu1 }
 0x1ce   : > { %v2087_v9 = vadd.f32 %v1839_v1, %v613_v61  ;;  %v1831_v12 = vadd.f32 %v1830_v8, %v3896_v58  ;;  %v621_v4 = vld [vmem:[#allocation2 + $0x118] sm:$0xff] }
 0x1cf   : > { %v3961_v13 = vpop.f32.mrf.mxu0  ;;  %v3012_v17 = vpop.f32.mrf.mxu1 }
 0x1d0   : > { %2151 = vst [vmem:[#allocation2 + $0xd8] sm:$0xff] %v2087_v9  ;;  %v2085_v20 = vadd.f32 %v1831_v12, %v611_v5  ;;  %v1842_v21 = vadd.f32 %v3012_v17, %v3906_v6  ;;  %v619_v12 = vld [vmem:[#allocation2 + $0x180] sm:$0xff] }
 0x1d1   : > { %v1610_v24 = vpop.f32.mrf.mxu0  ;;  %v1833_v28 = vpop.f32.mrf.mxu1 }
 0x1d2   : > { %2149 = vst [vmem:[#allocation2 + $0xb0] sm:$0xff] %v2085_v20  ;;  %v2088_v29 = vadd.f32 %v1842_v21, %v614_v16  ;;  %v1834_v2 = vadd.f32 %v1833_v28, %v3900_v62  ;;  %v622_v21 = vld [vmem:[#allocation2 + $0x98] sm:$0xff] }
 0x1d3   : > { %v3965_v32 = vpop.f32.mrf.mxu0  ;;  %v3015_v36 = vpop.f32.mrf.mxu1 }
 0x1d4   : > { %2152 = vst [vmem:[#allocation2 + $0x18] sm:$0xff] %v2088_v29  ;;  %v2086_v58 = vadd.f32 %v1834_v2, %v612_v25  ;;  %v1855_v37 = vadd.f32 %v3015_v36, %v3918_v18  ;;  %v620_v29 = vld [vmem:[#allocation2 + $0x110] sm:$0xff] }
 0x1d5   : > { %v1615_v40 = vpop.f32.mrf.mxu0  ;;  %v1846_v44 = vpop.f32.mrf.mxu1 }
 0x1d6   : > { %2150 = vst [vmem:[#allocation2 + $0x1b0] sm:$0xff] %v2086_v58  ;;  %v2091_v6 = vadd.f32 %v1855_v37, %v617_v33  ;;  %v1847_v45 = vadd.f32 %v1846_v44, %v3910_v10  ;;  %v625_v58 = vld [vmem:[#allocation2 + $0x108] sm:$0xff]  ;;  %v623_v44 = vld [vmem:[#allocation2 + $0x120] sm:$0xff] }
 0x1d7   : > { %v3969_v48 = vpop.f32.mrf.mxu0  ;;  %v3016_v52 = vpop.f32.mrf.mxu1 }
 0x1d8   : > { %2155 = vst [vmem:[#allocation2 + $0x130] sm:$0xff] %v2091_v6  ;;  %v2089_v62 = vadd.f32 %v1847_v45, %v615_v41  ;;  %v1858_v53 = vadd.f32 %v3016_v52, %v3922_v22  ;;  %v626_v52 = vld [vmem:[#allocation2 + $0x60] sm:$0xff] }
 0x1d9   : > { %v1618_v56 = vpop.f32.mrf.mxu0  ;;  %v1849_v61 = vpop.f32.mrf.mxu1 }
 0x1da   : > { %2153 = vst [vmem:[#allocation2 + $0x50] sm:$0xff] %v2089_v62  ;;  %v2092_v18 = vadd.f32 %v1858_v53, %v618_v49  ;;  %v1850_v0 = vadd.f32 %v1849_v61, %v3914_v14 }
 0x1db   : > { %v3973_v1 = vpop.f32.mrf.mxu0  ;;  %v3019_v5 = vpop.f32.mrf.mxu1 }
 0x1dc   : > { %2156 = vst [vmem:[#allocation2 + $0x48] sm:$0xff] %v2092_v18  ;;  %v2090_v10 = vadd.f32 %v1850_v0, %v616_v57  ;;  %v1871_v8 = vadd.f32 %v3019_v5, %v3934_v34  ;;  %v624_v57 = vld [vmem:[#allocation2 + $0x150] sm:$0xff] }
 0x1dd   : > { %v1623_v9 = vpop.f32.mrf.mxu0  ;;  %v1862_v16 = vpop.f32.mrf.mxu1 }
 0x1de   : > { %2154 = vst [vmem:[#allocation2 + $0x168] sm:$0xff] %v2090_v10  ;;  %v2095_v22 = vadd.f32 %v1871_v8, %v621_v4  ;;  %v1863_v17 = vadd.f32 %v1862_v16, %v3926_v26  ;;  %v629_v4 = vld [vmem:[#allocation2 + $0x138] sm:$0xff]  ;;  %v627_v9 = vld [vmem:[#allocation2 + $0xe0] sm:$0xff] }
 0x1df   : > { %v3977_v20 = vpop.f32.mrf.mxu0  ;;  %v3020_v24 = vpop.f32.mrf.mxu1 }
 0x1e0   : > { %2159 = vst [vmem:[#allocation2 + $0x118] sm:$0xff] %v2095_v22  ;;  %v2093_v14 = vadd.f32 %v1863_v17, %v619_v12  ;;  %v1874_v25 = vadd.f32 %v3020_v24, %v3938_v38  ;;  %v630_v17 = vld [vmem:[#allocation2 + $0x140] sm:$0xff] }
 0x1e1   : > { %v1626_v28 = vpop.f32.mrf.mxu0  ;;  %v1865_v2 = vpop.f32.mrf.mxu1 }
 0x1e2   : > { %2157 = vst [vmem:[#allocation2 + $0x180] sm:$0xff] %v2093_v14  ;;  %v2096_v34 = vadd.f32 %v1874_v25, %v622_v21  ;;  %v1866_v33 = vadd.f32 %v1865_v2, %v3930_v30  ;;  %v628_v25 = vld [vmem:[#allocation2 + $0x188] sm:$0xff] }
 0x1e3   : > { %v1629_v36 = vpop.f32.mrf.mxu0  ;;  %v3023_v37 = vpop.f32.mrf.mxu1 }
 0x1e4   : > { %2160 = vst [vmem:[#allocation2 + $0x98] sm:$0xff] %v2096_v34  ;;  %v2094_v26 = vadd.f32 %v1866_v33, %v620_v29  ;;  %v1887_v40 = vadd.f32 %v3023_v37, %v3950_v50  ;;  %v633_v34 = vld [vmem:[#allocation2 + $0x1b8] sm:$0xff] }
 0x1e5   : > { %v1631_v41 = vpop.f32.mrf.mxu0  ;;  %v1878_v6 = vpop.f32.mrf.mxu1 }
 0x1e6   : > { %2158 = vst [vmem:[#allocation2 + $0x110] sm:$0xff] %v2094_v26  ;;  %v2099_v45 = vadd.f32 %v1887_v40, %v625_v58  ;;  %v1879_v38 = vadd.f32 %v1878_v6, %v3942_v42  ;;  %v631_v26 = vld [vmem:[#allocation2 + $0x80] sm:$0xff]  ;;  %v634_v6 = vld [vmem:[#allocation2 + $0x28] sm:$0xff] }
 0x1e7   : > { %v1632_v49 = vpop.f32.mrf.mxu0  ;;  %v3024_v62 = vpop.f32.mrf.mxu1 }
 0x1e8   : > { %2163 = vst [vmem:[#allocation2 + $0x108] sm:$0xff] %v2099_v45  ;;  %v2097_v53 = vadd.f32 %v1879_v38, %v623_v44  ;;  %v1890_v30 = vadd.f32 %v3024_v62, %v3954_v54  ;;  %v632_v62 = vld [vmem:[#allocation2 + $0x1a8] sm:$0xff] }
 0x1e9   : > { %v1634_v56 = vpop.f32.mrf.mxu0  ;;  %v1881_v61 = vpop.f32.mrf.mxu1 }
 0x1ea   : > { %2161 = vst [vmem:[#allocation2 + $0x120] sm:$0xff] %v2097_v53  ;;  %v2100_v18 = vadd.f32 %v1890_v30, %v626_v52  ;;  %v1882_v50 = vadd.f32 %v1881_v61, %v3946_v46 }
 0x1eb   : > { %v1637_v0 = vpop.f32.mrf.mxu0  ;;  %v3027_v5 = vpop.f32.mrf.mxu1 }
 0x1ec   : > { %2164 = vst [vmem:[#allocation2 + $0x60] sm:$0xff] %v2100_v18  ;;  %v2098_v10 = vadd.f32 %v1882_v50, %v624_v57  ;;  %v1903_v42 = vadd.f32 %v3027_v5, %v3965_v32  ;;  %v637_v57 = vld [vmem:[#allocation2 + $0x160] sm:$0xff] }
 0x1ed   : > { %v1639_v8 = vpop.f32.mrf.mxu0  ;;  %v1894_v12 = vpop.f32.mrf.mxu1 }
 0x1ee   : > { %2162 = vst [vmem:[#allocation2 + $0x150] sm:$0xff] %v2098_v10  ;;  %v2103_v16 = vadd.f32 %v1903_v42, %v629_v4  ;;  %v1895_v54 = vadd.f32 %v1894_v12, %v3958_v60  ;;  %v635_v4 = vld [vmem:[#allocation2 + $0x1e8] sm:$0xff]  ;;  %v638_v8 = vld [vmem:[#allocation2 + $0x30] sm:$0xff] }
 0x1ef   : > { %v1640_v22 = vpop.f32.mrf.mxu0  ;;  %v3028_v21 = vpop.f32.mrf.mxu1 }
 0x1f0   : > { %2167 = vst [vmem:[#allocation2 + $0x138] sm:$0xff] %v2103_v16  ;;  %v2101_v24 = vadd.f32 %v1895_v54, %v627_v9  ;;  %v1906_v46 = vadd.f32 %v3028_v21, %v3969_v48 }
 0x1f1   : > { %v1642_v14 = vpop.f32.mrf.mxu0  ;;  %v1897_v28 = vpop.f32.mrf.mxu1 }
 0x1f2   : > { %2165 = vst [vmem:[#allocation2 + $0xe0] sm:$0xff] %v2101_v24  ;;  %v2104_v29 = vadd.f32 %v1906_v46, %v630_v17  ;;  %v1898_v32 = vadd.f32 %v1897_v28, %v3961_v13  ;;  %v641_v14 = vld [vmem:[#allocation2 + $0xf0] sm:$0xff] }
 0x1f3   : > { %v1645_v2 = vpop.f32.mrf.mxu0  ;;  %v3031_v33 = vpop.f32.mrf.mxu1 }
 0x1f4   : > { %2168 = vst [vmem:[#allocation2 + $0x140] sm:$0xff] %v2104_v29  ;;  %v2102_v58 = vadd.f32 %v1898_v32, %v628_v25  ;;  %v1919_v60 = vadd.f32 %v3031_v33, %v1629_v36 }
 0x1f5   : > { %v1647_v37 = vpop.f32.mrf.mxu0  ;;  %v1910_v40 = vpop.f32.mrf.mxu1 }
 0x1f6   : > { %2166 = vst [vmem:[#allocation2 + $0x188] sm:$0xff] %v2102_v58  ;;  %v2107_v41 = vadd.f32 %v1919_v60, %v633_v34  ;;  %v1911_v48 = vadd.f32 %v1910_v40, %v3973_v1  ;;  %v642_v60 = vld [vmem:[#allocation2 + $0x8] sm:$0xff] }
 0x1f7   : > { %v1648_v44 = vpop.f32.mrf.mxu0  ;;  %v3032_v45 = vpop.f32.mrf.mxu1 }
 0x1f8   : > { %2171 = vst [vmem:[#allocation2 + $0x1b8] sm:$0xff] %v2107_v41  ;;  %v2105_v38 = vadd.f32 %v1911_v48, %v631_v26  ;;  %v1922_v52 = vadd.f32 %v3032_v45, %v1632_v49 }
 0x1f9   : > { %v1650_v13 = vpop.f32.mrf.mxu0  ;;  %v1913_v53 = vpop.f32.mrf.mxu1 }
 0x1fa   : > { %2169 = vst [vmem:[#allocation2 + $0x80] sm:$0xff] %v2105_v38  ;;  %v2108_v30 = vadd.f32 %v1922_v52, %v634_v6  ;;  %v1914_v36 = vadd.f32 %v1913_v53, %v3977_v20  ;;  %v636_v20 = vld [vmem:[#allocation2 + $0xf8] sm:$0xff] }
 0x1fb   : > { %v1653_v56 = vpop.f32.mrf.mxu0  ;;  %v3035_v61 = vpop.f32.mrf.mxu1 }
 0x1fc   : > { %2172 = vst [vmem:[#allocation2 + $0x28] sm:$0xff] %v2108_v30  ;;  %v2106_v18 = vadd.f32 %v1914_v36, %v632_v62  ;;  %v1935_v50 = vadd.f32 %v3035_v61, %v1645_v2  ;;  %v643_v62 = vld [vmem:[#allocation2 + $0x148] sm:$0xff] }
 0x1fd   : > { %v1655_v1 = vpop.f32.mrf.mxu0  ;;  %v1926_v5 = vpop.f32.mrf.mxu1 }
 0x1fe   : > { %2170 = vst [vmem:[#allocation2 + $0x1a8] sm:$0xff] %v2106_v18  ;;  %v2111_v10 = vadd.f32 %v1935_v50, %v637_v57  ;;  %v1927_v42 = vadd.f32 %v1926_v5, %v1637_v0  ;;  %v639_v0 = vld [vmem:[#allocation2 + $0x1e0] sm:$0xff]  ;;  %v644_v18 = vld [vmem:[#allocation2 + $0x1d0] sm:$0xff] }
 0x1ff   : > { %v1656_v49 = vpop.f32.mrf.mxu0  ;;  %v3036_v9 = vpop.f32.mrf.mxu1 }
 0x200   : > { %2175 = vst [vmem:[#allocation2 + $0x160] sm:$0xff] %v2111_v10  ;;  %v2109_v12 = vadd.f32 %v1927_v42, %v635_v4  ;;  %v1938_v16 = vadd.f32 %v3036_v9, %v1648_v44  ;;  %v645_v4 = vld [vmem:[#allocation2 + $0x100] sm:$0xff] }
 0x201   : > { %v1658_v54 = vpop.f32.mrf.mxu0  ;;  %v1929_v17 = vpop.f32.mrf.mxu1 }
 0x202   : > { %2173 = vst [vmem:[#allocation2 + $0x1e8] sm:$0xff] %v2109_v12  ;;  %v2112_v21 = vadd.f32 %v1938_v16, %v638_v8  ;;  %v1930_v24 = vadd.f32 %v1929_v17, %v1640_v22  ;;  %v640_v22 = vld [vmem:[#allocation2] sm:$0xff]  ;;  %v646_v16 = vld [vmem:[#allocation2 + $0xc8] sm:$0xff] }
 0x203   : > { %v1661_v46 = vpop.f32.mrf.mxu0  ;;  %v3039_v25 = vpop.f32.mrf.mxu1 }
 0x204   : > { %2176 = vst [vmem:[#allocation2 + $0x30] sm:$0xff] %v2112_v21  ;;  %v2110_v28 = vadd.f32 %v1930_v24, %v636_v20  ;;  %v1951_v29 = vadd.f32 %v3039_v25, %v1661_v46 }
 0x205   : > { %v1663_v32 = vpop.f32.mrf.mxu0  ;;  %v1942_v2 = vpop.f32.mrf.mxu1 }
 0x206   : > { %2174 = vst [vmem:[#allocation2 + $0xf8] sm:$0xff] %v2110_v28  ;;  %v2115_v34 = vadd.f32 %v1951_v29, %v641_v14  ;;  %v1943_v33 = vadd.f32 %v1942_v2, %v1653_v56  ;;  %v647_v14 = vld [vmem:[#allocation2 + $0x40] sm:$0xff] }
 0x207   : > { %v1664_v58 = vpop.f32.mrf.mxu0  ;;  %v3040_v37 = vpop.f32.mrf.mxu1 }
 0x208   : > { %2179 = vst [vmem:[#allocation2 + $0xf0] sm:$0xff] %v2115_v34  ;;  %v2113_v26 = vadd.f32 %v1943_v33, %v639_v0  ;;  %v1954_v40 = vadd.f32 %v3040_v37, %v1664_v58  ;;  %v648_v34 = vld [vmem:[#allocation2 + $0x1f8] sm:$0xff] }
 0x209   : > { %v1666_v41 = vpop.f32.mrf.mxu0  ;;  %v1945_v48 = vpop.f32.mrf.mxu1 }
 0x20a   : > { %2177 = vst [vmem:[#allocation2 + $0x1e0] sm:$0xff] %v2113_v26  ;;  %v2116_v44 = vadd.f32 %v1954_v40, %v642_v60  ;;  %v1946_v6 = vadd.f32 %v1945_v48, %v1656_v49  ;;  %v649_v41 = vld [vmem:[#allocation2 + $0x20] sm:$0xff] }
 0x20b   : > { %v1669_v45 = vpop.f32.mrf.mxu0  ;;  %v3043_v38 = vpop.f32.mrf.mxu1 }
 0x20c   : > { %2180 = vst [vmem:[#allocation2 + $0x8] sm:$0xff] %v2116_v44  ;;  %v2114_v52 = vadd.f32 %v1946_v6, %v640_v22 }
 0x20d   : > { %v1671_v13 = vpop.f32.mrf.mxu0  ;;  %v1958_v53 = vpop.f32.mrf.mxu1 }
 0x20e   : > { %2178 = vst [vmem:[#allocation2] sm:$0xff] %v2114_v52  ;;  %v1959_v30 = vadd.f32 %v1958_v53, %v1669_v45  ;;  %v650_v52 = vld [vmem:[#allocation2 + $0x128] sm:$0xff] }
 0x20f   : > { %v1672_v36 = vpop.f32.mrf.mxu0  ;;  %v3044_v56 = vpop.f32.mrf.mxu1 }
 0x210   : > { %v2117_v57 = vadd.f32 %v1959_v30, %v643_v62 }
 0x211   : > { %v1674_v61 = vpop.f32.mrf.mxu0  ;;  %v1961_v50 = vpop.f32.mrf.mxu1 }
 0x212   : > { %2181 = vst [vmem:[#allocation2 + $0x148] sm:$0xff] %v2117_v57  ;;  %v1962_v1 = vadd.f32 %v1961_v50, %v1672_v36  ;;  %v651_v57 = vld [vmem:[#allocation2 + $0x1a0] sm:$0xff] }
 0x213   : > { %v1677_v5 = vpop.f32.mrf.mxu0  ;;  %v3047_v10 = vpop.f32.mrf.mxu1 }
 0x214   : > { %v2118_v42 = vadd.f32 %v1962_v1, %v644_v18  ;;  %v1967_v49 = vadd.f32 %v3043_v38, %v1677_v5  ;;  %v661_v18 = vld [vmem:[#allocation2 + $0xa8] sm:$0xff] }
 0x215   : > { %v1679_v8 = vpop.f32.mrf.mxu0  ;;  %v1974_v9 = vpop.f32.mrf.mxu1 }
 0x216   : > { %2182 = vst [vmem:[#allocation2 + $0x1d0] sm:$0xff] %v2118_v42  ;;  %v2119_v12 = vadd.f32 %v1967_v49, %v645_v4 }
 0x217   : > { %v1680_v54 = vpop.f32.mrf.mxu0  ;;  %v3048_v20 = vpop.f32.mrf.mxu1 }
 0x218   : > { %2183 = vst [vmem:[#allocation2 + $0x100] sm:$0xff] %v2119_v12  ;;  %v1970_v17 = vadd.f32 %v3044_v56, %v1680_v54  ;;  %v652_v12 = vld [vmem:[#allocation2 + $0x1f0] sm:$0xff]  ;;  %v662_v54 = vld [vmem:[#allocation2 + $0x1c8] sm:$0xff] }
 0x219   : > { %v1682_v21 = vpop.f32.mrf.mxu0  ;;  %v1977_v24 = vpop.f32.mrf.mxu1 }
 0x21a   : > { %v2120_v46 = vadd.f32 %v1970_v17, %v646_v16 }
 0x21b   : > { %v1685_v25 = vpop.f32.mrf.mxu0  ;;  %v3991_v28 = vpop.f32.mrf.mxu1 }
 0x21c   : > { %2184 = vst [vmem:[#allocation2 + $0xc8] sm:$0xff] %v2120_v46  ;;  %v1975_v29 = vadd.f32 %v1974_v9, %v1685_v25 }
 0x21d   : > { %v1687_v32 = vpop.f32.mrf.mxu0  ;;  %v1990_v0 = vpop.f32.mrf.mxu1 }
 0x21e   : > { %v2121_v2 = vadd.f32 %v1975_v29, %v647_v14  ;;  %v660_v14 = vld [vmem:[#allocation2 + $0x88] sm:$0xff] }
 0x21f   : > { %v1688_v33 = vpop.f32.mrf.mxu0  ;;  %v3993_v58 = vpop.f32.mrf.mxu1 }
 0x220   : > { %2185 = vst [vmem:[#allocation2 + $0x40] sm:$0xff] %v2121_v2  ;;  %v1978_v60 = vadd.f32 %v1977_v24, %v1688_v33  ;;  %v665_v2 = vld [vmem:[#allocation2 + $0x68] sm:$0xff] }
 0x221   : > { %v1690_v37 = vpop.f32.mrf.mxu0  ;;  %v1993_v26 = vpop.f32.mrf.mxu1 }
 0x222   : > { %v2122_v40 = vadd.f32 %v1978_v60, %v648_v34 }
 0x223   : > { %v1693_v22 = vpop.f32.mrf.mxu0  ;;  %v3995_v48 = vpop.f32.mrf.mxu1 }
 0x224   : > { %2186 = vst [vmem:[#allocation2 + $0x1f8] sm:$0xff] %v2122_v40  ;;  %v1983_v44 = vadd.f32 %v3047_v10, %v1693_v22  ;;  %v659_v10 = vld [vmem:[#allocation2 + $0xb8] sm:$0xff] }
 0x225   : > { %v1695_v6 = vpop.f32.mrf.mxu0  ;;  %v3997_v45 = vpop.f32.mrf.mxu1 }
 0x226   : > { %v2123_v38 = vadd.f32 %v1983_v44, %v649_v41 }
 0x227   : > { %v1696_v13 = vpop.f32.mrf.mxu0  ;;  %v3999_v62 = vpop.f32.mrf.mxu1 }
 0x228   : > { %2187 = vst [vmem:[#allocation2 + $0x20] sm:$0xff] %v2123_v38  ;;  %v1986_v53 = vadd.f32 %v3048_v20, %v1696_v13  ;;  %v666_v38 = vld [vmem:[#allocation2 + $0x190] sm:$0xff] }
 0x229   : > { %v1698_v30 = vpop.f32.mrf.mxu0  ;;  %v4001_v36 = vpop.f32.mrf.mxu1 }
 0x22a   : > { %v2124_v56 = vadd.f32 %v1986_v53, %v650_v52  ;;  %v664_v30 = vld [vmem:[#allocation2 + $0x178] sm:$0xff] }
 0x22b   : > { %v1701_v61 = vpop.f32.mrf.mxu0  ;;  %v3059_v50 = vpop.f32.mrf.mxu1 }
 0x22c   : > { %2188 = vst [vmem:[#allocation2 + $0x128] sm:$0xff] %v2124_v56  ;;  %v1991_v1 = vadd.f32 %v1990_v0, %v1701_v61  ;;  %v2031_v4 = vadd.f32 %v3059_v50, %v3904_v3  ;;  %v653_v0 = vld [vmem:[#allocation2 + $0xe8] sm:$0xff] }
 0x22d   : > { %v1703_v5 = vpop.f32.mrf.mxu0  ;;  %v2022_v42 = vpop.f32.mrf.mxu1 }
 0x22e   : > { %v2125_v49 = vadd.f32 %v1991_v1, %v651_v57  ;;  %v2135_v8 = vadd.f32 %v2031_v4, %v661_v18  ;;  %v2023_v9 = vadd.f32 %v2022_v42, %v3898_v59  ;;  %v669_v1 = vld [vmem:[#allocation2 + $0xc0] sm:$0xff]  ;;  %v667_v42 = vld [vmem:[#allocation2 + $0x198] sm:$0xff] }
 0x22f   : > { %v1704_v16 = vpop.f32.mrf.mxu0  ;;  %v3060_v20 = vpop.f32.mrf.mxu1 }
 0x230   : > { %2189 = vst [vmem:[#allocation2 + $0x1a0] sm:$0xff] %v2125_v49  ;;  %2199 = vst [vmem:[#allocation2 + $0xa8] sm:$0xff] %v2135_v8  ;;  %v2133_v17 = vadd.f32 %v2023_v9, %v659_v10  ;;  %v1994_v21 = vadd.f32 %v1993_v26, %v1704_v16  ;;  %v2034_v24 = vadd.f32 %v3060_v20, %v3908_v7  ;;  %v663_v26 = vld [vmem:[#allocation2 + $0x170] sm:$0xff] }
 0x231   : > { %v1706_v46 = vpop.f32.mrf.mxu0  ;;  %v2025_v3 = vpop.f32.mrf.mxu1 }
 0x232   : > { %2197 = vst [vmem:[#allocation2 + $0xb8] sm:$0xff] %v2133_v17  ;;  %v2126_v25 = vadd.f32 %v1994_v21, %v652_v12  ;;  %v2136_v29 = vadd.f32 %v2034_v24, %v662_v54  ;;  %v2026_v32 = vadd.f32 %v2025_v3, %v3902_v63  ;;  %v654_v63 = vld [vmem:[#allocation2 + $0x78] sm:$0xff]  ;;  %v670_v54 = vld [vmem:[#allocation2 + $0x1c0] sm:$0xff] }
 0x233   : > { %v1709_v59 = vpop.f32.mrf.mxu0  ;;  %v3063_v34 = vpop.f32.mrf.mxu1  ;;  %v668_v24 = vld [vmem:[#allocation2 + $0x38] sm:$0xff] }
 0x234   : > { %2190 = vst [vmem:[#allocation2 + $0x1f0] sm:$0xff] %v2126_v25  ;;  %2200 = vst [vmem:[#allocation2 + $0x1c8] sm:$0xff] %v2136_v29  ;;  %v2134_v33 = vadd.f32 %v2026_v32, %v660_v14  ;;  %v1999_v60 = vadd.f32 %v3991_v28, %v1709_v59  ;;  %v2047_v37 = vadd.f32 %v3063_v34, %v3920_v19  ;;  %v673_v32 = vld [vmem:[#allocation2 + $0x58] sm:$0xff] }
 0x235   : > { %v1711_v7 = vpop.f32.mrf.mxu0  ;;  %v2038_v40 = vpop.f32.mrf.mxu1  ;;  %v671_v34 = vld [vmem:[#allocation2 + $0x158] sm:$0xff] }
 0x236   : > { %2198 = vst [vmem:[#allocation2 + $0x88] sm:$0xff] %v2134_v33  ;;  %v2127_v41 = vadd.f32 %v1999_v60, %v653_v0  ;;  %v2139_v22 = vadd.f32 %v2047_v37, %v665_v2  ;;  %v2039_v44 = vadd.f32 %v2038_v40, %v3912_v11  ;;  %v655_v11 = vld [vmem:[#allocation2 + $0x70] sm:$0xff]  ;;  %v674_v40 = vld [vmem:[#allocation2 + $0xa0] sm:$0xff] }
 0x237   : > { %v1712_v6 = vpop.f32.mrf.mxu0  ;;  %v3064_v52 = vpop.f32.mrf.mxu1 }
 0x238   : > { %2191 = vst [vmem:[#allocation2 + $0xe8] sm:$0xff] %v2127_v41  ;;  %2203 = vst [vmem:[#allocation2 + $0x68] sm:$0xff] %v2139_v22  ;;  %v2137_v13 = vadd.f32 %v2039_v44, %v663_v26  ;;  %v2002_v53 = vadd.f32 %v3993_v58, %v1712_v6  ;;  %v2050_v28 = vadd.f32 %v3064_v52, %v3924_v23 }
 0x239   : > { %v1714_v19 = vpop.f32.mrf.mxu0  ;;  %v2041_v56 = vpop.f32.mrf.mxu1 }
 0x23a   : > { %2201 = vst [vmem:[#allocation2 + $0x170] sm:$0xff] %v2137_v13  ;;  %v2128_v57 = vadd.f32 %v2002_v53, %v654_v63  ;;  %v2140_v61 = vadd.f32 %v2050_v28, %v666_v38  ;;  %v2042_v18 = vadd.f32 %v2041_v56, %v3916_v15  ;;  %v656_v15 = vld [vmem:[#allocation2 + $0x90] sm:$0xff] }
 0x23b   : > { %v1717_v50 = vpop.f32.mrf.mxu0  ;;  %v3067_v4 = vpop.f32.mrf.mxu1  ;;  %v672_v63 = vld [vmem:[#allocation2 + $0x10] sm:$0xff] }
 0x23c   : > { %2192 = vst [vmem:[#allocation2 + $0x78] sm:$0xff] %v2128_v57  ;;  %2204 = vst [vmem:[#allocation2 + $0x190] sm:$0xff] %v2140_v61  ;;  %v2138_v5 = vadd.f32 %v2042_v18, %v664_v30  ;;  %v2007_v10 = vadd.f32 %v3997_v45, %v1717_v50  ;;  %v2063_v58 = vadd.f32 %v3067_v4, %v3936_v35 }
 0x23d   : > { %v1719_v23 = vpop.f32.mrf.mxu0  ;;  %v2054_v49 = vpop.f32.mrf.mxu1 }
 0x23e   : > { %2202 = vst [vmem:[#allocation2 + $0x178] sm:$0xff] %v2138_v5  ;;  %v2129_v8 = vadd.f32 %v2007_v10, %v655_v11  ;;  %v2143_v9 = vadd.f32 %v2063_v58, %v669_v1  ;;  %v2055_v12 = vadd.f32 %v2054_v49, %v3928_v27  ;;  %v657_v27 = vld [vmem:[#allocation2 + $0x1d8] sm:$0xff] }
 0x23f   : > { %v1720_v16 = vpop.f32.mrf.mxu0  ;;  %v3068_v20 = vpop.f32.mrf.mxu1 }
 0x240   : > { %2193 = vst [vmem:[#allocation2 + $0x70] sm:$0xff] %v2129_v8  ;;  %2207 = vst [vmem:[#allocation2 + $0xc0] sm:$0xff] %v2143_v9  ;;  %v2141_v17 = vadd.f32 %v2055_v12, %v667_v42  ;;  %v2010_v21 = vadd.f32 %v4001_v36, %v1720_v16  ;;  %v2066_v45 = vadd.f32 %v3068_v20, %v3940_v39 }
 0x241   : > { %v1722_v35 = vpop.f32.mrf.mxu0  ;;  %v2057_v46 = vpop.f32.mrf.mxu1 }
 0x242   : > { %2205 = vst [vmem:[#allocation2 + $0x198] sm:$0xff] %v2141_v17  ;;  %v2130_v14 = vadd.f32 %v2010_v21, %v656_v15  ;;  %v2144_v3 = vadd.f32 %v2066_v45, %v670_v54  ;;  %v2058_v25 = vadd.f32 %v2057_v46, %v3932_v31  ;;  %v658_v31 = vld [vmem:[#allocation2 + $0xd0] sm:$0xff] }
 0x243   : > { %v1725_v29 = vpop.f32.mrf.mxu0  ;;  %v3071_v0 = vpop.f32.mrf.mxu1 }
 0x244   : > { %2194 = vst [vmem:[#allocation2 + $0x90] sm:$0xff] %v2130_v14  ;;  %2208 = vst [vmem:[#allocation2 + $0x1c0] sm:$0xff] %v2144_v3  ;;  %v2142_v59 = vadd.f32 %v2058_v25, %v668_v24  ;;  %v2015_v2 = vadd.f32 %v3995_v48, %v1725_v29  ;;  %v2079_v36 = vadd.f32 %v3071_v0, %v3952_v51 }
 0x245   : > { %v1727_v39 = vpop.f32.mrf.mxu0  ;;  %v2070_v33 = vpop.f32.mrf.mxu1 }
 0x246   : > { %2206 = vst [vmem:[#allocation2 + $0x38] sm:$0xff] %v2142_v59  ;;  %v2131_v60 = vadd.f32 %v2015_v2, %v657_v27  ;;  %v2147_v37 = vadd.f32 %v2079_v36, %v673_v32  ;;  %v2071_v7 = vadd.f32 %v2070_v33, %v3944_v43 }
 0x247   : > { %v1728_v26 = vpop.f32.mrf.mxu0  ;;  %v3072_v41 = vpop.f32.mrf.mxu1 }
 0x248   : > { %2195 = vst [vmem:[#allocation2 + $0x1d8] sm:$0xff] %v2131_v60  ;;  %2211 = vst [vmem:[#allocation2 + $0x58] sm:$0xff] %v2147_v37  ;;  %v2145_v22 = vadd.f32 %v2071_v7, %v671_v34  ;;  %v2018_v44 = vadd.f32 %v3999_v62, %v1728_v26  ;;  %v2082_v48 = vadd.f32 %v3072_v41, %v3956_v55 }
 0x249   : > { %v1730_v51 = vpop.f32.mrf.mxu0  ;;  %v2073_v6 = vpop.f32.mrf.mxu1 }
 0x24a   : > { %2209 = vst [vmem:[#allocation2 + $0x158] sm:$0xff] %v2145_v22  ;;  %v2132_v38 = vadd.f32 %v2018_v44, %v658_v31  ;;  %v2148_v52 = vadd.f32 %v2082_v48, %v674_v40  ;;  %v2074_v13 = vadd.f32 %v2073_v6, %v3948_v47  ;;  %2216 = sbr.rel (%p2946_p11) target bundleno = 737 (0x2e1), region = 62 }
 0x24c   : > { %2196 = vst [vmem:[#allocation2 + $0xd0] sm:$0xff] %v2132_v38  ;;  %2212 = vst [vmem:[#allocation2 + $0xa0] sm:$0xff] %v2148_v52  ;;  %v2146_v43 = vadd.f32 %v2074_v13, %v672_v63 }
 0x24e   : > { %2210 = vst [vmem:[#allocation2 + $0x10] sm:$0xff] %v2146_v43 }
 0x24f   : > { %v2217_v53 = vld [vmem:[#allocation2 + $0xb0] sm:$0xff]  ;;  %v2219_v62 = vld [vmem:[#allocation2 + $0xd8] sm:$0xff]  ;;  %v2222_v61 = vld [vmem:[#allocation2 + $0x168] sm:$0xff] }
 0x250   : > { %v2218_v28 = vld [vmem:[#allocation2 + $0x1b0] sm:$0xff]  ;;  %2281 = vst [vmem:[%s4592_s2] sm:$0xff] %v2217_v53  ;;  %v2415_v55 = vmul.f32 %v2217_v53, %v2217_v53  ;;  %2283 = vst [vmem:[%s4592_s2 + $0x10] sm:$0xff] %v2219_v62  ;;  %v2417_v30 = vmul.f32 %v2219_v62, %v2219_v62  ;;  %v2220_v56 = vld [vmem:[#allocation2 + $0x18] sm:$0xff]  ;;  %v2420_v46 = vmul.f32 %v2222_v61, %v2222_v61 }
 0x251   : > { %2282 = vst [vmem:[%s4592_s2 + $0x8] sm:$0xff] %v2218_v28  ;;  %v2345_v47 = vadd.f32 %v2218_v28, %v2217_v53  ;;  %v2416_v19 = vmul.f32 %v2218_v28, %v2218_v28  ;;  %v2221_v57 = vld [vmem:[#allocation2 + $0x50] sm:$0xff]  ;;  %2284 = vst [vmem:[%s4592_s2 + $0x18] sm:$0xff] %v2220_v56  ;;  %v4046_v11 = vld [vmem:[#allocation2 + $0x48] sm:$0xff]  ;;  %v2418_v5 = vmul.f32 %v2220_v56, %v2220_v56 }
 0x252   : > { %2285 = vst [vmem:[%s4592_s2 + $0x20] sm:$0xff] %v2221_v57  ;;  %2286 = vst [vmem:[%s4592_s2 + $0x28] sm:$0xff] %v2222_v61  ;;  %v4044_v18 = vld [vmem:[#allocation2 + $0x130] sm:$0xff]  ;;  %v4048_v50 = vld [vmem:[#allocation2 + $0x180] sm:$0xff]  ;;  %v2419_v15 = vmul.f32 %v2221_v57, %v2221_v57  ;;  %v2422_v26 = vmul.f32 %v4046_v11, %v4046_v11 }
 0x253   : > { %v2479_v1 = vadd.f32 %v2416_v19, %v2415_v55  ;;  %v2346_v4 = vadd.f32 %v2345_v47, %v2219_v62  ;;  %2287 = vst [vmem:[%s4592_s2 + $0x30] sm:$0xff] %v4044_v18  ;;  %2288 = vst [vmem:[%s4592_s2 + $0x38] sm:$0xff] %v4046_v11  ;;  %v4062_v10 = vld [vmem:[#allocation2 + $0x110] sm:$0xff]  ;;  %v4064_v58 = vld [vmem:[#allocation2 + $0x118] sm:$0xff]  ;;  %v2421_v2 = vmul.f32 %v4044_v18, %v4044_v18 }
 0x254   : > { %2289 = vst [vmem:[%s4592_s2 + $0x40] sm:$0xff] %v4048_v50  ;;  %v4066_v23 = vld [vmem:[#allocation2 + $0x98] sm:$0xff]  ;;  %2290 = vst [vmem:[%s4592_s2 + $0x48] sm:$0xff] %v4062_v10  ;;  %v4080_v42 = vld [vmem:[#allocation2 + $0x120] sm:$0xff]  ;;  %v2423_v38 = vmul.f32 %v4048_v50, %v4048_v50  ;;  %v2424_v19 = vmul.f32 %v4062_v10, %v4062_v10 }
 0x255   : > { %2291 = vst [vmem:[%s4592_s2 + $0x50] sm:$0xff] %v4064_v58  ;;  %2292 = vst [vmem:[%s4592_s2 + $0x58] sm:$0xff] %v4066_v23  ;;  %v4082_v49 = vld [vmem:[#allocation2 + $0x150] sm:$0xff]  ;;  %v4084_v8 = vld [vmem:[#allocation2 + $0x108] sm:$0xff]  ;;  %v2480_v9 = vadd.f32 %v2479_v1, %v2417_v30  ;;  %v2347_v12 = vadd.f32 %v2346_v4, %v2220_v56  ;;  %v2425_v4 = vmul.f32 %v4064_v58, %v4064_v58 }
 0x256   : > { %2293 = vst [vmem:[%s4592_s2 + $0x60] sm:$0xff] %v4080_v42  ;;  %2294 = vst [vmem:[%s4592_s2 + $0x68] sm:$0xff] %v4082_v49  ;;  %v4098_v16 = vld [vmem:[#allocation2 + $0x60] sm:$0xff]  ;;  %v4102_v20 = vld [vmem:[#allocation2 + $0x188] sm:$0xff] }
 0x257   : > { %2295 = vst [vmem:[%s4592_s2 + $0x70] sm:$0xff] %v4084_v8  ;;  %v4100_v54 = vld [vmem:[#allocation2 + $0xe0] sm:$0xff]  ;;  %2296 = vst [vmem:[%s4592_s2 + $0x78] sm:$0xff] %v4098_v16  ;;  %v4116_v17 = vld [vmem:[#allocation2 + $0x138] sm:$0xff]  ;;  %v2481_v35 = vadd.f32 %v2480_v9, %v2418_v5  ;;  %v2348_v24 = vadd.f32 %v2347_v12, %v2221_v57 }
 0x258   : > { %2297 = vst [vmem:[%s4592_s2 + $0x80] sm:$0xff] %v4100_v54  ;;  %2298 = vst [vmem:[%s4592_s2 + $0x88] sm:$0xff] %v4102_v20  ;;  %v4118_v21 = vld [vmem:[#allocation2 + $0x140] sm:$0xff]  ;;  %v4134_v14 = vld [vmem:[#allocation2 + $0x1a8] sm:$0xff] }
 0x259   : > { %v4120_v45 = vld [vmem:[#allocation2 + $0x80] sm:$0xff]  ;;  %2299 = vst [vmem:[%s4592_s2 + $0x90] sm:$0xff] %v4116_v17  ;;  %2300 = vst [vmem:[%s4592_s2 + $0x98] sm:$0xff] %v4118_v21  ;;  %v4136_v3 = vld [vmem:[#allocation2 + $0x1b8] sm:$0xff]  ;;  %v2482_v0 = vadd.f32 %v2481_v35, %v2419_v15  ;;  %v2349_v59 = vadd.f32 %v2348_v24, %v2222_v61 }
 0x25a   : > { %2301 = vst [vmem:[%s4592_s2 + $0xa0] sm:$0xff] %v4120_v45  ;;  %v4138_v25 = vld [vmem:[#allocation2 + $0x28] sm:$0xff]  ;;  %2302 = vst [vmem:[%s4592_s2 + $0xa8] sm:$0xff] %v4134_v14  ;;  %v4154_v29 = vld [vmem:[#allocation2 + $0xf8] sm:$0xff] }
 0x25b   : > { %2303 = vst [vmem:[%s4592_s2 + $0xb0] sm:$0xff] %v4136_v3  ;;  %2304 = vst [vmem:[%s4592_s2 + $0xb8] sm:$0xff] %v4138_v25  ;;  %v4152_v27 = vld [vmem:[#allocation2 + $0x1e8] sm:$0xff]  ;;  %v4156_v32 = vld [vmem:[#allocation2 + $0x160] sm:$0xff]  ;;  %v2483_v7 = vadd.f32 %v2482_v0, %v2420_v46  ;;  %v2350_v31 = vadd.f32 %v2349_v59, %v4044_v18  ;;  %v2426_v0 = vmul.f32 %v4066_v23, %v4066_v23 }
 0x25c   : > { %2305 = vst [vmem:[%s4592_s2 + $0xc0] sm:$0xff] %v4152_v27  ;;  %2306 = vst [vmem:[%s4592_s2 + $0xc8] sm:$0xff] %v4154_v29  ;;  %v4172_v36 = vld [vmem:[#allocation2 + $0x30] sm:$0xff]  ;;  %v4174_v39 = vld [vmem:[#allocation2 + $0x1e0] sm:$0xff] }
 0x25d   : > { %2307 = vst [vmem:[%s4592_s2 + $0xd0] sm:$0xff] %v4156_v32  ;;  %v4176_v34 = vld [vmem:[#allocation2] sm:$0xff]  ;;  %2308 = vst [vmem:[%s4592_s2 + $0xd8] sm:$0xff] %v4172_v36  ;;  %v4190_v33 = vld [vmem:[#allocation2 + $0xf0] sm:$0xff]  ;;  %v2484_v63 = vadd.f32 %v2483_v7, %v2421_v2  ;;  %v2351_v6 = vadd.f32 %v2350_v31, %v4046_v11 }
 0x25e   : > { %2309 = vst [vmem:[%s4592_s2 + $0xe0] sm:$0xff] %v4174_v39  ;;  %2310 = vst [vmem:[%s4592_s2 + $0xe8] sm:$0xff] %v4176_v34  ;;  %v4192_v60 = vld [vmem:[#allocation2 + $0x8] sm:$0xff]  ;;  %v4211_v40 = vld [vmem:[#allocation2 + $0x1d0] sm:$0xff] }
 0x25f   : > { %v4194_v37 = vld [vmem:[#allocation2 + $0x148] sm:$0xff]  ;;  %2311 = vst [vmem:[%s4592_s2 + $0xf0] sm:$0xff] %v4190_v33  ;;  %2312 = vst [vmem:[%s4592_s2 + $0xf8] sm:$0xff] %v4192_v60  ;;  %v4213_v41 = vld [vmem:[#allocation2 + $0x100] sm:$0xff]  ;;  %v2485_v55 = vadd.f32 %v2484_v63, %v2422_v26  ;;  %v2352_v47 = vadd.f32 %v2351_v6, %v4048_v50 }
 0x260   : > { %2313 = vst [vmem:[%s4592_s2 + $0x100] sm:$0xff] %v4194_v37  ;;  %v4215_v22 = vld [vmem:[#allocation2 + $0xc8] sm:$0xff]  ;;  %2314 = vst [vmem:[%s4592_s2 + $0x108] sm:$0xff] %v4211_v40  ;;  %v4229_v44 = vld [vmem:[#allocation2 + $0x40] sm:$0xff] }
 0x261   : > { %2315 = vst [vmem:[%s4592_s2 + $0x110] sm:$0xff] %v4213_v41  ;;  %2316 = vst [vmem:[%s4592_s2 + $0x118] sm:$0xff] %v4215_v22  ;;  %v4231_v48 = vld [vmem:[#allocation2 + $0x1f8] sm:$0xff]  ;;  %v4233_v51 = vld [vmem:[#allocation2 + $0x20] sm:$0xff]  ;;  %v2486_v50 = vadd.f32 %v2485_v55, %v2423_v38  ;;  %v2353_v1 = vadd.f32 %v2352_v47, %v4062_v10  ;;  %v2427_v38 = vmul.f32 %v4080_v42, %v4080_v42 }
 0x262   : > { %2317 = vst [vmem:[%s4592_s2 + $0x120] sm:$0xff] %v4229_v44  ;;  %2318 = vst [vmem:[%s4592_s2 + $0x128] sm:$0xff] %v4231_v48  ;;  %v4250_v52 = vld [vmem:[#allocation2 + $0x128] sm:$0xff]  ;;  %v4252_v13 = vld [vmem:[#allocation2 + $0x1a0] sm:$0xff] }
 0x263   : > { %2319 = vst [vmem:[%s4592_s2 + $0x130] sm:$0xff] %v4233_v51  ;;  %v4254_v43 = vld [vmem:[#allocation2 + $0x1f0] sm:$0xff]  ;;  %2320 = vst [vmem:[%s4592_s2 + $0x138] sm:$0xff] %v4250_v52  ;;  %v4268_v53 = vld [vmem:[#allocation2 + $0xe8] sm:$0xff]  ;;  %v2487_v24 = vadd.f32 %v2486_v50, %v2424_v19  ;;  %v2354_v46 = vadd.f32 %v2353_v1, %v4064_v58  ;;  %v2428_v19 = vmul.f32 %v4082_v49, %v4082_v49  ;;  %v3344_v50 = vmov 0.0  }
 0x264   : > { %2321 = vst [vmem:[%s4592_s2 + $0x140] sm:$0xff] %v4252_v13  ;;  %2322 = vst [vmem:[%s4592_s2 + $0x148] sm:$0xff] %v4254_v43  ;;  %v4270_v28 = vld [vmem:[#allocation2 + $0x78] sm:$0xff]  ;;  %v4272_v62 = vld [vmem:[#allocation2 + $0x70] sm:$0xff] }
 0x265   : > { %2323 = vst [vmem:[%s4592_s2 + $0x150] sm:$0xff] %v4268_v53  ;;  %2324 = vst [vmem:[%s4592_s2 + $0x158] sm:$0xff] %v4270_v28  ;;  %v4289_v30 = vld [vmem:[#allocation2 + $0x90] sm:$0xff]  ;;  %v4291_v56 = vld [vmem:[#allocation2 + $0x1d8] sm:$0xff]  ;;  %v2488_v63 = vadd.f32 %v2487_v24, %v2425_v4  ;;  %v2355_v6 = vadd.f32 %v2354_v46, %v4066_v23  ;;  %v2429_v24 = vmul.f32 %v4084_v8, %v4084_v8 }
 0x266   : > { %2325 = vst [vmem:[%s4592_s2 + $0x160] sm:$0xff] %v4272_v62  ;;  %v4293_v57 = vld [vmem:[#allocation2 + $0xd0] sm:$0xff]  ;;  %2326 = vst [vmem:[%s4592_s2 + $0x168] sm:$0xff] %v4289_v30  ;;  %v4307_v61 = vld [vmem:[#allocation2 + $0xb8] sm:$0xff] }
 0x267   : > { %2327 = vst [vmem:[%s4592_s2 + $0x170] sm:$0xff] %v4291_v56  ;;  %2328 = vst [vmem:[%s4592_s2 + $0x178] sm:$0xff] %v4293_v57  ;;  %v4309_v18 = vld [vmem:[#allocation2 + $0x88] sm:$0xff]  ;;  %v4330_v10 = vld [vmem:[#allocation2 + $0x170] sm:$0xff]  ;;  %v2489_v23 = vadd.f32 %v2488_v63, %v2426_v0  ;;  %v2356_v47 = vadd.f32 %v2355_v6, %v4080_v42  ;;  %v2430_v42 = vmul.f32 %v4098_v16, %v4098_v16 }
 0x268   : > { %v4311_v11 = vld [vmem:[#allocation2 + $0xa8] sm:$0xff]  ;;  %2329 = vst [vmem:[%s4592_s2 + $0x180] sm:$0xff] %v4307_v61  ;;  %2330 = vst [vmem:[%s4592_s2 + $0x188] sm:$0xff] %v4309_v18  ;;  %v4332_v9 = vld [vmem:[#allocation2 + $0x178] sm:$0xff]  ;;  %v2431_v6 = vmul.f32 %v4100_v54, %v4100_v54 }
 0x269   : > { %2331 = vst [vmem:[%s4592_s2 + $0x190] sm:$0xff] %v4311_v11  ;;  %v4328_v5 = vld [vmem:[#allocation2 + $0x1c8] sm:$0xff]  ;;  %2333 = vst [vmem:[%s4592_s2 + $0x1a0] sm:$0xff] %v4330_v10  ;;  %v4348_v15 = vld [vmem:[#allocation2 + $0x190] sm:$0xff]  ;;  %v2490_v1 = vadd.f32 %v2489_v23, %v2427_v38  ;;  %v2357_v4 = vadd.f32 %v2356_v47, %v4082_v49  ;;  %v2432_v49 = vmul.f32 %v4102_v20, %v4102_v20 }
 0x26a   : > { %2332 = vst [vmem:[%s4592_s2 + $0x198] sm:$0xff] %v4328_v5  ;;  %2334 = vst [vmem:[%s4592_s2 + $0x1a8] sm:$0xff] %v4332_v9  ;;  %v4346_v12 = vld [vmem:[#allocation2 + $0x68] sm:$0xff]  ;;  %v4350_v35 = vld [vmem:[#allocation2 + $0x198] sm:$0xff] }
 0x26b   : > { %2335 = vst [vmem:[%s4592_s2 + $0x1b0] sm:$0xff] %v4346_v12  ;;  %2336 = vst [vmem:[%s4592_s2 + $0x1b8] sm:$0xff] %v4348_v15  ;;  %v4367_v59 = vld [vmem:[#allocation2 + $0x38] sm:$0xff]  ;;  %v4369_v58 = vld [vmem:[#allocation2 + $0xc0] sm:$0xff]  ;;  %v2491_v46 = vadd.f32 %v2490_v1, %v2428_v19 }
 0x26c   : > { %2337 = vst [vmem:[%s4592_s2 + $0x1c0] sm:$0xff] %v4350_v35  ;;  %v4371_v2 = vld [vmem:[#allocation2 + $0x1c0] sm:$0xff]  ;;  %2338 = vst [vmem:[%s4592_s2 + $0x1c8] sm:$0xff] %v4367_v59  ;;  %v4385_v7 = vld [vmem:[#allocation2 + $0x158] sm:$0xff] }
 0x26d   : > { %2339 = vst [vmem:[%s4592_s2 + $0x1d0] sm:$0xff] %v4369_v58  ;;  %2340 = vst [vmem:[%s4592_s2 + $0x1d8] sm:$0xff] %v4371_v2  ;;  %v4387_v31 = vld [vmem:[#allocation2 + $0x10] sm:$0xff]  ;;  %v4389_v26 = vld [vmem:[#allocation2 + $0x58] sm:$0xff]  ;;  %v2492_v0 = vadd.f32 %v2491_v46, %v2429_v24 }
 0x26e   : > { %4598 = vst [vmem:[#allocation4_spill] sm:$0xff] %v4389_v26  ;;  %2341 = vst [vmem:[%s4592_s2 + $0x1e0] sm:$0xff] %v4385_v7  ;;  %v4406_v55 = vld [vmem:[#allocation2 + $0xa0] sm:$0xff] }
 0x26f   : > { %2342 = vst [vmem:[%s4592_s2 + $0x1e8] sm:$0xff] %v4387_v31  ;;  %2343 = vst [vmem:[%s4592_s2 + $0x1f0] sm:$0xff] %v4389_v26  ;;  %v2493_v26 = vadd.f32 %v2492_v0, %v2430_v42 }
 0x270   : > { %4599 = vst [vmem:[#allocation5_spill] sm:$0xff] %v4406_v55  ;;  %2344 = vst [vmem:[%s4592_s2 + $0x1f8] sm:$0xff] %v4406_v55  ;;  %v2358_v55 = vadd.f32 %v2357_v4, %v4084_v8  ;;  %v2433_v8 = vmul.f32 %v4116_v17, %v4116_v17 }
 0x271   : > { %2549 = vst [vmem:[%s4593_s3 + $0x2] sm:$0x3f] %v3344_v50  ;;  %v2494_v23 = vadd.f32 %v2493_v26, %v2431_v6 }
 0x272   : > { %v2359_v63 = vadd.f32 %v2358_v55, %v4098_v16  ;;  %v2434_v16 = vmul.f32 %v4118_v21, %v4118_v21 }
 0x273   : > { %v2495_v19 = vadd.f32 %v2494_v23, %v2432_v49 }
 0x274   : > { %v2360_v38 = vadd.f32 %v2359_v63, %v4100_v54  ;;  %v2435_v54 = vmul.f32 %v4120_v45, %v4120_v45 }
 0x275   : > { %v2496_v55 = vadd.f32 %v2495_v19, %v2433_v8 }
 0x276   : > { %v2361_v47 = vadd.f32 %v2360_v38, %v4102_v20  ;;  %v2436_v20 = vmul.f32 %v4134_v14, %v4134_v14 }
 0x277   : > { %v2497_v4 = vadd.f32 %v2496_v55, %v2434_v16 }
 0x278   : > { %v2362_v50 = vadd.f32 %v2361_v47, %v4116_v17  ;;  %v2437_v17 = vmul.f32 %v4136_v3, %v4136_v3 }
 0x279   : > { %v2498_v24 = vadd.f32 %v2497_v4, %v2435_v54 }
 0x27a   : > { %v2363_v1 = vadd.f32 %v2362_v50, %v4118_v21  ;;  %v2438_v21 = vmul.f32 %v4138_v25, %v4138_v25 }
 0x27b   : > { %v2499_v42 = vadd.f32 %v2498_v24, %v2436_v20 }
 0x27c   : > { %v2364_v26 = vadd.f32 %v2363_v1, %v4120_v45  ;;  %v2439_v45 = vmul.f32 %v4152_v27, %v4152_v27 }
 0x27d   : > { %v2500_v63 = vadd.f32 %v2499_v42, %v2437_v17 }
 0x27e   : > { %v2365_v46 = vadd.f32 %v2364_v26, %v4134_v14  ;;  %v2440_v14 = vmul.f32 %v4154_v29, %v4154_v29 }
 0x27f   : > { %v2501_v38 = vadd.f32 %v2500_v63, %v2438_v21 }
 0x280   : > { %v2366_v0 = vadd.f32 %v2365_v46, %v4136_v3  ;;  %v2441_v3 = vmul.f32 %v4156_v32, %v4156_v32 }
 0x281   : > { %v2502_v23 = vadd.f32 %v2501_v38, %v2439_v45 }
 0x282   : > { %v2367_v6 = vadd.f32 %v2366_v0, %v4138_v25  ;;  %v2442_v25 = vmul.f32 %v4172_v36, %v4172_v36 }
 0x283   : > { %v2503_v8 = vadd.f32 %v2502_v23, %v2440_v14 }
 0x284   : > { %v2368_v49 = vadd.f32 %v2367_v6, %v4152_v27  ;;  %v2443_v27 = vmul.f32 %v4174_v39, %v4174_v39 }
 0x285   : > { %v2504_v50 = vadd.f32 %v2503_v8, %v2441_v3 }
 0x286   : > { %v2369_v47 = vadd.f32 %v2368_v49, %v4154_v29  ;;  %v2444_v29 = vmul.f32 %v4176_v34, %v4176_v34 }
 0x287   : > { %v2505_v55 = vadd.f32 %v2504_v50, %v2442_v25 }
 0x288   : > { %v2370_v19 = vadd.f32 %v2369_v47, %v4156_v32  ;;  %v2445_v32 = vmul.f32 %v4190_v33, %v4190_v33 }
 0x289   : > { %v2506_v54 = vadd.f32 %v2505_v55, %v2443_v27 }
 0x28a   : > { %v2371_v16 = vadd.f32 %v2370_v19, %v4172_v36  ;;  %v2446_v36 = vmul.f32 %v4192_v60, %v4192_v60 }
 0x28b   : > { %v2507_v26 = vadd.f32 %v2506_v54, %v2444_v29 }
 0x28c   : > { %v2372_v1 = vadd.f32 %v2371_v16, %v4174_v39  ;;  %v2447_v39 = vmul.f32 %v4194_v37, %v4194_v37 }
 0x28d   : > { %v2508_v24 = vadd.f32 %v2507_v26, %v2445_v32 }
 0x28e   : > { %v2373_v4 = vadd.f32 %v2372_v1, %v4176_v34  ;;  %v2448_v34 = vmul.f32 %v4211_v40, %v4211_v40 }
 0x28f   : > { %v2509_v17 = vadd.f32 %v2508_v24, %v2446_v36 }
 0x290   : > { %v2374_v20 = vadd.f32 %v2373_v4, %v4190_v33  ;;  %v2449_v33 = vmul.f32 %v4213_v41, %v4213_v41 }
 0x291   : > { %v2510_v0 = vadd.f32 %v2509_v17, %v2447_v39 }
 0x292   : > { %v2375_v46 = vadd.f32 %v2374_v20, %v4192_v60  ;;  %v2450_v60 = vmul.f32 %v4215_v22, %v4215_v22 }
 0x293   : > { %v2511_v63 = vadd.f32 %v2510_v0, %v2448_v34 }
 0x294   : > { %v2376_v42 = vadd.f32 %v2375_v46, %v4194_v37  ;;  %v2451_v37 = vmul.f32 %v4229_v44, %v4229_v44 }
 0x295   : > { %v2512_v45 = vadd.f32 %v2511_v63, %v2449_v33 }
 0x296   : > { %v2377_v21 = vadd.f32 %v2376_v42, %v4211_v40  ;;  %v2452_v40 = vmul.f32 %v4231_v48, %v4231_v48 }
 0x297   : > { %v2513_v49 = vadd.f32 %v2512_v45, %v2450_v60 }
 0x298   : > { %v2378_v6 = vadd.f32 %v2377_v21, %v4213_v41  ;;  %v2453_v41 = vmul.f32 %v4233_v51, %v4233_v51 }
 0x299   : > { %v2514_v23 = vadd.f32 %v2513_v49, %v2451_v37 }
 0x29a   : > { %v2379_v38 = vadd.f32 %v2378_v6, %v4215_v22  ;;  %v2454_v22 = vmul.f32 %v4250_v52, %v4250_v52 }
 0x29b   : > { %v2515_v3 = vadd.f32 %v2514_v23, %v2452_v40 }
 0x29c   : > { %v2380_v14 = vadd.f32 %v2379_v38, %v4229_v44  ;;  %v2455_v44 = vmul.f32 %v4252_v13, %v4252_v13 }
 0x29d   : > { %v2516_v19 = vadd.f32 %v2515_v3, %v2453_v41 }
 0x29e   : > { %v2381_v47 = vadd.f32 %v2380_v14, %v4231_v48  ;;  %v2456_v48 = vmul.f32 %v4254_v43, %v4254_v43 }
 0x29f   : > { %v2517_v50 = vadd.f32 %v2516_v19, %v2454_v22 }
 0x2a0   : > { %v2382_v8 = vadd.f32 %v2381_v47, %v4233_v51  ;;  %v2457_v51 = vmul.f32 %v4268_v53, %v4268_v53 }
 0x2a1   : > { %v2518_v27 = vadd.f32 %v2517_v50, %v2455_v44 }
 0x2a2   : > { %v2383_v25 = vadd.f32 %v2382_v8, %v4250_v52  ;;  %v2458_v52 = vmul.f32 %v4270_v28, %v4270_v28 }
 0x2a3   : > { %v2519_v1 = vadd.f32 %v2518_v27, %v2456_v48 }
 0x2a4   : > { %v2384_v16 = vadd.f32 %v2383_v25, %v4252_v13  ;;  %v2459_v13 = vmul.f32 %v4272_v62, %v4272_v62 }
 0x2a5   : > { %v2520_v54 = vadd.f32 %v2519_v1, %v2457_v51  ;;  %v4600_v51 = vld [vmem:[#allocation4_spill] sm:$0xff] }
 0x2a6   : > { %v2385_v55 = vadd.f32 %v2384_v16, %v4254_v43  ;;  %v2460_v43 = vmul.f32 %v4289_v30, %v4289_v30 }
 0x2a7   : > { %v2521_v32 = vadd.f32 %v2520_v54, %v2458_v52  ;;  %v4601_v52 = vld [vmem:[#allocation5_spill] sm:$0xff] }
 0x2a8   : > { %v2386_v29 = vadd.f32 %v2385_v55, %v4268_v53  ;;  %v2461_v53 = vmul.f32 %v4291_v56, %v4291_v56 }
 0x2a9   : > { %v2522_v20 = vadd.f32 %v2521_v32, %v2459_v13 }
 0x2aa   : > { %v2387_v4 = vadd.f32 %v2386_v29, %v4270_v28  ;;  %v2462_v28 = vmul.f32 %v4293_v57, %v4293_v57 }
 0x2ab   : > { %v2523_v24 = vadd.f32 %v2522_v20, %v2460_v43 }
 0x2ac   : > { %v2388_v26 = vadd.f32 %v2387_v4, %v4272_v62  ;;  %v2463_v62 = vmul.f32 %v4307_v61, %v4307_v61 }
 0x2ad   : > { %v2524_v39 = vadd.f32 %v2523_v24, %v2461_v53 }
 0x2ae   : > { %v2389_v36 = vadd.f32 %v2388_v26, %v4289_v30  ;;  %v2464_v30 = vmul.f32 %v4309_v18, %v4309_v18 }
 0x2af   : > { %v2525_v42 = vadd.f32 %v2524_v39, %v2462_v28 }
 0x2b0   : > { %v2390_v46 = vadd.f32 %v2389_v36, %v4291_v56  ;;  %v2465_v56 = vmul.f32 %v4311_v11, %v4311_v11 }
 0x2b1   : > { %v2526_v0 = vadd.f32 %v2525_v42, %v2463_v62 }
 0x2b2   : > { %v2391_v17 = vadd.f32 %v2390_v46, %v4293_v57  ;;  %v2466_v57 = vmul.f32 %v4328_v5, %v4328_v5 }
 0x2b3   : > { %v2527_v33 = vadd.f32 %v2526_v0, %v2464_v30 }
 0x2b4   : > { %v2392_v34 = vadd.f32 %v2391_v17, %v4307_v61  ;;  %v2467_v61 = vmul.f32 %v4330_v10, %v4330_v10 }
 0x2b5   : > { %v2528_v6 = vadd.f32 %v2527_v33, %v2465_v56 }
 0x2b6   : > { %v2393_v21 = vadd.f32 %v2392_v34, %v4309_v18  ;;  %v2468_v18 = vmul.f32 %v4332_v9, %v4332_v9 }
 0x2b7   : > { %v2529_v45 = vadd.f32 %v2528_v6, %v2466_v57 }
 0x2b8   : > { %v2394_v63 = vadd.f32 %v2393_v21, %v4311_v11  ;;  %v2469_v11 = vmul.f32 %v4346_v12, %v4346_v12 }
 0x2b9   : > { %v2530_v37 = vadd.f32 %v2529_v45, %v2467_v61 }
 0x2ba   : > { %v2395_v60 = vadd.f32 %v2394_v63, %v4328_v5  ;;  %v2470_v5 = vmul.f32 %v4348_v15, %v4348_v15 }
 0x2bb   : > { %v2531_v14 = vadd.f32 %v2530_v37, %v2468_v18 }
 0x2bc   : > { %v2396_v38 = vadd.f32 %v2395_v60, %v4330_v10  ;;  %v2471_v10 = vmul.f32 %v4350_v35, %v4350_v35 }
 0x2bd   : > { %v2532_v23 = vadd.f32 %v2531_v14, %v2469_v11 }
 0x2be   : > { %v2397_v49 = vadd.f32 %v2396_v38, %v4332_v9  ;;  %v2472_v9 = vmul.f32 %v4367_v59, %v4367_v59 }
 0x2bf   : > { %v2533_v41 = vadd.f32 %v2532_v23, %v2470_v5 }
 0x2c0   : > { %v2398_v40 = vadd.f32 %v2397_v49, %v4346_v12  ;;  %v2473_v12 = vmul.f32 %v4369_v58, %v4369_v58 }
 0x2c1   : > { %v2534_v8 = vadd.f32 %v2533_v41, %v2471_v10 }
 0x2c2   : > { %v2399_v47 = vadd.f32 %v2398_v40, %v4348_v15  ;;  %v2474_v15 = vmul.f32 %v4371_v2, %v4371_v2 }
 0x2c3   : > { %v2535_v19 = vadd.f32 %v2534_v8, %v2472_v9 }
 0x2c4   : > { %v2400_v3 = vadd.f32 %v2399_v47, %v4350_v35  ;;  %v2475_v35 = vmul.f32 %v4385_v7, %v4385_v7 }
 0x2c5   : > { %v2536_v44 = vadd.f32 %v2535_v19, %v2473_v12 }
 0x2c6   : > { %v2401_v22 = vadd.f32 %v2400_v3, %v4367_v59  ;;  %v2476_v59 = vmul.f32 %v4387_v31, %v4387_v31 }
 0x2c7   : > { %v2537_v16 = vadd.f32 %v2536_v44, %v2474_v15 }
 0x2c8   : > { %v2402_v25 = vadd.f32 %v2401_v22, %v4369_v58  ;;  %v2477_v58 = vmul.f32 %v4600_v51, %v4600_v51 }
 0x2c9   : > { %v2538_v27 = vadd.f32 %v2537_v16, %v2475_v35 }
 0x2ca   : > { %v2403_v50 = vadd.f32 %v2402_v25, %v4371_v2  ;;  %v2478_v2 = vmul.f32 %v4601_v52, %v4601_v52 }
 0x2cb   : > { %v2539_v1 = vadd.f32 %v2538_v27, %v2476_v59 }
 0x2cc   : > { %v2404_v48 = vadd.f32 %v2403_v50, %v4385_v7 }
 0x2cd   : > { %v2540_v54 = vadd.f32 %v2539_v1, %v2477_v58 }
 0x2ce   : > { %v2405_v55 = vadd.f32 %v2404_v48, %v4387_v31 }
 0x2cf   : > { %v2541_v7 = vadd.f32 %v2540_v54, %v2478_v2 }
 0x2d0   : > { %v2406_v29 = vadd.f32 %v2405_v55, %v4600_v51 }
 0x2d1   : > { %v2542_v26 = vrot.slane %v2541_v7, 4 }
 0x2d2   : > { %v2407_v4 = vadd.f32 %v2406_v29, %v4601_v52 }
 0x2d3   : > { %v2543_v20 = vadd.f32 %v2542_v26, %v2541_v7 }
 0x2d4   : > { %v2408_v13 = vrot.slane %v2407_v4, 4 }
 0x2d5   : > { %v2544_v31 = vrot.slane %v2543_v20, 2 }
 0x2d6   : > { %v2409_v32 = vadd.f32 %v2408_v13, %v2407_v4 }
 0x2d7   : > { %v2545_v24 = vadd.f32 %v2544_v31, %v2543_v20 }
 0x2d8   : > { %v2410_v43 = vrot.slane %v2409_v32, 2 }
 0x2d9   : > { %v2546_v28 = vrot.slane %v2545_v24, 1 }
 0x2da   : > { %v2411_v36 = vadd.f32 %v2410_v43, %v2409_v32 }
 0x2db   : > { %v2547_v39 = vadd.f32 %v2546_v28, %v2545_v24 }
 0x2dc   : > { %v2412_v53 = vrot.slane %v2411_v36, 1 }
 0x2dd   : > { %2548 = vst [vmem:[%s4593_s3 + $0x1] sm:$0x1] %v2547_v39 }
 0x2de   : > { %v2413_v46 = vadd.f32 %v2412_v53, %v2411_v36 }
 0x2e0   : > { %2414 = vst [vmem:[%s4593_s3] sm:$0x1] %v2413_v46 }
 0x2e1 PF: > { %s14_s16 = sadd.s32 1, %s3340_s16   ;;  %s4602_s12 = smov %s3328_s13 }
 0x2e2   : > { %p11_p12 = scmp.ge.s32.totalorder %s14_s16, 5   ;;  %s4603_s13 = smov %s3400_s20 }
 0x2e3   : > { %s4604_s14 = smov %s3336_s15  ;;  %s4605_s15 = smov %s4607_s17 }
 0x2e4   :  { %13 = sbr.rel (!%p11_p12) target bundleno = 3 (0x3), region = 118 }

// kernel: residual_forward.9
= control target key start
LH: loop header
LB: loop body
LE: loop exit
PB: predicated region body
PF: predicated region fallthrough
CT: control target
= control target key end

     0   :  { %s1510_s0 = inlined_call_operand.vmem [shape: f32[512,128], index: 0, kind: input, shape index: {}]   ;;  %s1511_s1 = inlined_call_operand.vmem [shape: f32[512,128], index: 1, kind: input, shape index: {}]   ;;  %s1512_s2 = inlined_call_operand.vmem [shape: f32[1,128], index: 2, kind: input, shape index: {}]   ;;  %s1513_s3 = inlined_call_operand.vmem [shape: f32[1,128], index: 3, kind: input, shape index: {}]   ;;  %s1514_s4 = inlined_call_operand.vmem [shape: f32[1,128], index: 4, kind: input, shape index: {}]   ;;  %s1515_s5 = inlined_call_operand.vmem [shape: f32[1,128], index: 5, kind: input, shape index: {}]   ;;  %s1516_s6 = inlined_call_operand.vmem [shape: f32[512,128], index: 6, kind: output, shape index: {}]  }
   0x1   :  { %v23_v0 = vld [vmem:[%s1510_s0] sm:$0xff]  ;;  %v24_v8 = vld [vmem:[%s1510_s0 + $0x8] sm:$0xff]  ;;  %v25_v10 = vld [vmem:[%s1510_s0 + $0x10] sm:$0xff] }
   0x2   :  { %v680_v1 = vld [vmem:[%s1512_s2] ss:$0 sm:$0xff]  ;;  %v230_v9 = vld [vmem:[%s1511_s1 + $0x8] sm:$0xff]  ;;  %v231_v15 = vld [vmem:[%s1511_s1 + $0x10] sm:$0xff] }
   0x3   :  { %v685_v2 = vld [vmem:[%s1513_s3] ss:$0 sm:$0xff]  ;;  %v94_v3 = vmul.f32 %v680_v1, %v23_v0  ;;  %v95_v12 = vmul.f32 %v680_v1, %v24_v8  ;;  %v96_v14 = vmul.f32 %v680_v1, %v25_v10  ;;  %v26_v16 = vld [vmem:[%s1510_s0 + $0x18] sm:$0xff]  ;;  %v28_v23 = vld [vmem:[%s1510_s0 + $0x28] sm:$0xff] }
   0x4   :  { %v229_v4 = vld [vmem:[%s1511_s1] sm:$0xff]  ;;  %v232_v17 = vld [vmem:[%s1511_s1 + $0x18] sm:$0xff]  ;;  %v97_v19 = vmul.f32 %v680_v1, %v26_v16  ;;  %v234_v28 = vld [vmem:[%s1511_s1 + $0x28] sm:$0xff]  ;;  %v99_v33 = vmul.f32 %v680_v1, %v28_v23 }
   0x5   :  { %v694_v5 = vld [vmem:[%s1514_s4] ss:$0 sm:$0xff]  ;;  %v165_v11 = vadd.f32 %v685_v2, %v94_v3  ;;  %v166_v25 = vadd.f32 %v685_v2, %v95_v12  ;;  %v167_v26 = vadd.f32 %v685_v2, %v96_v14  ;;  %v29_v29 = vld [vmem:[%s1510_s0 + $0x30] sm:$0xff]  ;;  %v30_v39 = vld [vmem:[%s1510_s0 + $0x38] sm:$0xff] }
   0x6   :  { %v300_v6 = vmul.f32 %v694_v5, %v229_v4  ;;  %v700_v7 = vld [vmem:[%s1515_s5] ss:$0 sm:$0xff]  ;;  %v301_v13 = vmul.f32 %v694_v5, %v230_v9  ;;  %v302_v18 = vmul.f32 %v694_v5, %v231_v15  ;;  %v303_v20 = vmul.f32 %v694_v5, %v232_v17  ;;  %v235_v30 = vld [vmem:[%s1511_s1 + $0x30] sm:$0xff]  ;;  %v236_v44 = vld [vmem:[%s1511_s1 + $0x38] sm:$0xff] }
   0x7   :  { %v27_v21 = vld [vmem:[%s1510_s0 + $0x20] sm:$0xff]  ;;  %v168_v31 = vadd.f32 %v685_v2, %v97_v19  ;;  %v305_v34 = vmul.f32 %v694_v5, %v234_v28  ;;  %v170_v41 = vadd.f32 %v685_v2, %v99_v33  ;;  %v100_v42 = vmul.f32 %v680_v1, %v29_v29  ;;  %v32_v55 = vld [vmem:[%s1510_s0 + $0x48] sm:$0xff]  ;;  %v33_v3 = vld [vmem:[%s1510_s0 + $0x50] sm:$0xff] }
   0x8   :  { %v233_v22 = vld [vmem:[%s1511_s1 + $0x20] sm:$0xff]  ;;  %v364_v24 = vadd.f32 %v300_v6, %v165_v11  ;;  %v98_v27 = vmul.f32 %v680_v1, %v27_v21  ;;  %v365_v36 = vadd.f32 %v301_v13, %v166_v25  ;;  %v366_v37 = vadd.f32 %v302_v18, %v167_v26  ;;  %v238_v60 = vld [vmem:[%s1511_s1 + $0x48] sm:$0xff]  ;;  %v239_v4 = vld [vmem:[%s1511_s1 + $0x50] sm:$0xff] }
   0x9   :  { %v304_v32 = vmul.f32 %v694_v5, %v233_v22  ;;  %v367_v40 = vadd.f32 %v303_v20, %v168_v31  ;;  %v306_v43 = vmul.f32 %v694_v5, %v235_v30  ;;  %v369_v50 = vadd.f32 %v305_v34, %v170_v41  ;;  %v31_v53 = vld [vmem:[%s1510_s0 + $0x40] sm:$0xff]  ;;  %v34_v11 = vld [vmem:[%s1510_s0 + $0x58] sm:$0xff]  ;;  %v36_v23 = vld [vmem:[%s1510_s0 + $0x68] sm:$0xff] }
   0xa   :  { %v435_v35 = vadd.f32 %v700_v7, %v364_v24  ;;  %v169_v38 = vadd.f32 %v685_v2, %v98_v27  ;;  %v436_v46 = vadd.f32 %v700_v7, %v365_v36  ;;  %v437_v47 = vadd.f32 %v700_v7, %v366_v37  ;;  %v237_v54 = vld [vmem:[%s1511_s1 + $0x40] sm:$0xff]  ;;  %v240_v12 = vld [vmem:[%s1511_s1 + $0x58] sm:$0xff]  ;;  %v37_v33 = vld [vmem:[%s1510_s0 + $0x70] sm:$0xff] }
   0xb   :  { %v438_v49 = vadd.f32 %v700_v7, %v367_v40  ;;  %v171_v51 = vadd.f32 %v685_v2, %v100_v42  ;;  %v101_v52 = vmul.f32 %v680_v1, %v30_v39  ;;  %v307_v59 = vmul.f32 %v694_v5, %v236_v44  ;;  %v35_v17 = vld [vmem:[%s1510_s0 + $0x60] sm:$0xff]  ;;  %v243_v42 = vld [vmem:[%s1511_s1 + $0x70] sm:$0xff] }
   0xc   :  { %v499_v45 = vmax.f32 %v435_v35, 0.0  ;;  %v368_v48 = vadd.f32 %v304_v32, %v169_v38  ;;  %v500_v56 = vmax.f32 %v436_v46, 0.0  ;;  %v501_v57 = vmax.f32 %v437_v47, 0.0  ;;  %v241_v22 = vld [vmem:[%s1511_s1 + $0x60] sm:$0xff]  ;;  %v242_v32 = vld [vmem:[%s1511_s1 + $0x68] sm:$0xff]  ;;  %v38_v47 = vld [vmem:[%s1510_s0 + $0x78] sm:$0xff] }
   0xd   :  { %v502_v61 = vmax.f32 %v438_v49, 0.0  ;;  %v440_v62 = vadd.f32 %v700_v7, %v369_v50  ;;  %v370_v63 = vadd.f32 %v306_v43, %v171_v51  ;;  %v172_v0 = vadd.f32 %v685_v2, %v101_v52 }
   0xe   :  { %563 = vst [vmem:[%s1516_s6] sm:$0xff] %v499_v45  ;;  %v439_v58 = vadd.f32 %v700_v7, %v368_v48  ;;  %564 = vst [vmem:[%s1516_s6 + $0x8] sm:$0xff] %v500_v56  ;;  %v102_v8 = vmul.f32 %v680_v1, %v31_v53  ;;  %v308_v9 = vmul.f32 %v694_v5, %v237_v54  ;;  %v244_v48 = vld [vmem:[%s1511_s1 + $0x78] sm:$0xff]  ;;  %v39_v53 = vld [vmem:[%s1510_s0 + $0x80] sm:$0xff] }
   0xf   :  { %565 = vst [vmem:[%s1516_s6 + $0x10] sm:$0xff] %v501_v57  ;;  %v103_v10 = vmul.f32 %v680_v1, %v32_v55  ;;  %566 = vst [vmem:[%s1516_s6 + $0x18] sm:$0xff] %v502_v61  ;;  %v504_v13 = vmax.f32 %v440_v62, 0.0  ;;  %v441_v14 = vadd.f32 %v700_v7, %v370_v63  ;;  %v371_v15 = vadd.f32 %v307_v59, %v172_v0  ;;  %v40_v59 = vld [vmem:[%s1510_s0 + $0x88] sm:$0xff] }
  0x10   :  { %v503_v6 = vmax.f32 %v439_v58, 0.0  ;;  %v309_v16 = vmul.f32 %v694_v5, %v238_v60  ;;  %v173_v18 = vadd.f32 %v685_v2, %v102_v8  ;;  %v104_v20 = vmul.f32 %v680_v1, %v33_v3  ;;  %v245_v58 = vld [vmem:[%s1511_s1 + $0x80] sm:$0xff]  ;;  %v246_v0 = vld [vmem:[%s1511_s1 + $0x88] sm:$0xff] }
  0x11   :  { %v174_v19 = vadd.f32 %v685_v2, %v103_v10  ;;  %v310_v21 = vmul.f32 %v694_v5, %v239_v4  ;;  %568 = vst [vmem:[%s1516_s6 + $0x28] sm:$0xff] %v504_v13  ;;  %v505_v24 = vmax.f32 %v441_v14, 0.0  ;;  %v442_v25 = vadd.f32 %v700_v7, %v371_v15  ;;  %v247_v10 = vld [vmem:[%s1511_s1 + $0x90] sm:$0xff]  ;;  %v42_v15 = vld [vmem:[%s1510_s0 + $0x98] sm:$0xff] }
  0x12   :  { %567 = vst [vmem:[%s1516_s6 + $0x20] sm:$0xff] %v503_v6  ;;  %v105_v26 = vmul.f32 %v680_v1, %v34_v11  ;;  %v311_v27 = vmul.f32 %v694_v5, %v240_v12  ;;  %v372_v28 = vadd.f32 %v308_v9, %v173_v18  ;;  %v175_v30 = vadd.f32 %v685_v2, %v104_v20  ;;  %v41_v9 = vld [vmem:[%s1510_s0 + $0x90] sm:$0xff] }
  0x13   :  { %v373_v29 = vadd.f32 %v309_v16, %v174_v19  ;;  %v106_v31 = vmul.f32 %v680_v1, %v35_v17  ;;  %569 = vst [vmem:[%s1516_s6 + $0x30] sm:$0xff] %v505_v24  ;;  %v506_v34 = vmax.f32 %v442_v25, 0.0  ;;  %v312_v36 = vmul.f32 %v694_v5, %v241_v22  ;;  %v248_v16 = vld [vmem:[%s1511_s1 + $0x98] sm:$0xff] }
  0x14   :  { %v176_v35 = vadd.f32 %v685_v2, %v105_v26  ;;  %v107_v37 = vmul.f32 %v680_v1, %v36_v23  ;;  %v443_v38 = vadd.f32 %v700_v7, %v372_v28  ;;  %v374_v40 = vadd.f32 %v310_v21, %v175_v30  ;;  %v43_v21 = vld [vmem:[%s1510_s0 + $0xa0] sm:$0xff] }
  0x15   :  { %v444_v39 = vadd.f32 %v700_v7, %v373_v29  ;;  %v177_v41 = vadd.f32 %v685_v2, %v106_v31  ;;  %570 = vst [vmem:[%s1516_s6 + $0x38] sm:$0xff] %v506_v34  ;;  %v313_v45 = vmul.f32 %v694_v5, %v242_v32  ;;  %v108_v46 = vmul.f32 %v680_v1, %v37_v33  ;;  %v249_v26 = vld [vmem:[%s1511_s1 + $0xa0] sm:$0xff] }
  0x16   :  { %v375_v43 = vadd.f32 %v311_v27, %v176_v35  ;;  %v178_v44 = vadd.f32 %v685_v2, %v107_v37  ;;  %v507_v49 = vmax.f32 %v443_v38, 0.0  ;;  %v445_v51 = vadd.f32 %v700_v7, %v374_v40  ;;  %v44_v27 = vld [vmem:[%s1510_s0 + $0xa8] sm:$0xff] }
  0x17   :  { %v508_v50 = vmax.f32 %v444_v39, 0.0  ;;  %v376_v52 = vadd.f32 %v312_v36, %v177_v41  ;;  %v179_v56 = vadd.f32 %v685_v2, %v108_v46  ;;  %v314_v57 = vmul.f32 %v694_v5, %v243_v42  ;;  %v250_v36 = vld [vmem:[%s1511_s1 + $0xa8] sm:$0xff]  ;;  %v45_v41 = vld [vmem:[%s1510_s0 + $0xb0] sm:$0xff] }
  0x18   :  { %v446_v54 = vadd.f32 %v700_v7, %v375_v43  ;;  %v377_v55 = vadd.f32 %v313_v45, %v178_v44  ;;  %571 = vst [vmem:[%s1516_s6 + $0x40] sm:$0xff] %v507_v49  ;;  %v509_v60 = vmax.f32 %v445_v51, 0.0  ;;  %v109_v62 = vmul.f32 %v680_v1, %v38_v47  ;;  %v251_v46 = vld [vmem:[%s1511_s1 + $0xb0] sm:$0xff]  ;;  %v46_v47 = vld [vmem:[%s1510_s0 + $0xb8] sm:$0xff] }
  0x19   :  { %572 = vst [vmem:[%s1516_s6 + $0x48] sm:$0xff] %v508_v50  ;;  %v447_v61 = vadd.f32 %v700_v7, %v376_v52  ;;  %v315_v63 = vmul.f32 %v694_v5, %v244_v48  ;;  %v378_v6 = vadd.f32 %v314_v57, %v179_v56  ;;  %v110_v8 = vmul.f32 %v680_v1, %v39_v53  ;;  %v252_v52 = vld [vmem:[%s1511_s1 + $0xb8] sm:$0xff]  ;;  %v47_v57 = vld [vmem:[%s1510_s0 + $0xc0] sm:$0xff] }
  0x1a   :  { %v510_v3 = vmax.f32 %v446_v54, 0.0  ;;  %v448_v4 = vadd.f32 %v700_v7, %v377_v55  ;;  %573 = vst [vmem:[%s1516_s6 + $0x50] sm:$0xff] %v509_v60  ;;  %v180_v12 = vadd.f32 %v685_v2, %v109_v62  ;;  %v316_v13 = vmul.f32 %v694_v5, %v245_v58  ;;  %v253_v62 = vld [vmem:[%s1511_s1 + $0xc0] sm:$0xff] }
  0x1b   :  { %v511_v11 = vmax.f32 %v447_v61, 0.0  ;;  %v111_v14 = vmul.f32 %v680_v1, %v40_v59  ;;  %v449_v18 = vadd.f32 %v700_v7, %v378_v6  ;;  %v181_v19 = vadd.f32 %v685_v2, %v110_v8  ;;  %v254_v8 = vld [vmem:[%s1511_s1 + $0xc8] sm:$0xff] }
  0x1c   :  { %574 = vst [vmem:[%s1516_s6 + $0x58] sm:$0xff] %v510_v3  ;;  %v512_v17 = vmax.f32 %v448_v4, 0.0  ;;  %v317_v20 = vmul.f32 %v694_v5, %v246_v0  ;;  %v379_v22 = vadd.f32 %v315_v63, %v180_v12  ;;  %v112_v24 = vmul.f32 %v680_v1, %v41_v9  ;;  %v48_v63 = vld [vmem:[%s1510_s0 + $0xc8] sm:$0xff] }
  0x1d   :  { %575 = vst [vmem:[%s1516_s6 + $0x60] sm:$0xff] %v511_v11  ;;  %v182_v23 = vadd.f32 %v685_v2, %v111_v14  ;;  %v318_v25 = vmul.f32 %v694_v5, %v247_v10  ;;  %v513_v28 = vmax.f32 %v449_v18, 0.0  ;;  %v380_v29 = vadd.f32 %v316_v13, %v181_v19  ;;  %v49_v13 = vld [vmem:[%s1510_s0 + $0xd0] sm:$0xff]  ;;  %v50_v19 = vld [vmem:[%s1510_s0 + $0xd8] sm:$0xff] }
  0x1e   :  { %576 = vst [vmem:[%s1516_s6 + $0x68] sm:$0xff] %v512_v17  ;;  %v113_v30 = vmul.f32 %v680_v1, %v42_v15  ;;  %v319_v31 = vmul.f32 %v694_v5, %v248_v16  ;;  %v450_v32 = vadd.f32 %v700_v7, %v379_v22  ;;  %v183_v34 = vadd.f32 %v685_v2, %v112_v24  ;;  %v255_v14 = vld [vmem:[%s1511_s1 + $0xd0] sm:$0xff] }
  0x1f   :  { %v381_v33 = vadd.f32 %v317_v20, %v182_v23  ;;  %v114_v35 = vmul.f32 %v680_v1, %v43_v21  ;;  %577 = vst [vmem:[%s1516_s6 + $0x70] sm:$0xff] %v513_v28  ;;  %v451_v37 = vadd.f32 %v700_v7, %v380_v29  ;;  %v320_v39 = vmul.f32 %v694_v5, %v249_v26  ;;  %v256_v20 = vld [vmem:[%s1511_s1 + $0xd8] sm:$0xff] }
  0x20   :  { %v184_v38 = vadd.f32 %v685_v2, %v113_v30  ;;  %v115_v40 = vmul.f32 %v680_v1, %v44_v27  ;;  %v514_v42 = vmax.f32 %v450_v32, 0.0  ;;  %v382_v44 = vadd.f32 %v318_v25, %v183_v34  ;;  %v51_v25 = vld [vmem:[%s1510_s0 + $0xe0] sm:$0xff] }
  0x21   :  { %v452_v43 = vadd.f32 %v700_v7, %v381_v33  ;;  %v185_v45 = vadd.f32 %v685_v2, %v114_v35  ;;  %v515_v48 = vmax.f32 %v451_v37, 0.0  ;;  %v321_v51 = vmul.f32 %v694_v5, %v250_v36  ;;  %v257_v30 = vld [vmem:[%s1511_s1 + $0xe0] sm:$0xff]  ;;  %v52_v35 = vld [vmem:[%s1510_s0 + $0xe8] sm:$0xff] }
  0x22   :  { %v383_v49 = vadd.f32 %v319_v31, %v184_v38  ;;  %v186_v50 = vadd.f32 %v685_v2, %v115_v40  ;;  %578 = vst [vmem:[%s1516_s6 + $0x78] sm:$0xff] %v514_v42  ;;  %v453_v54 = vadd.f32 %v700_v7, %v382_v44  ;;  %v116_v56 = vmul.f32 %v680_v1, %v45_v41  ;;  %v258_v40 = vld [vmem:[%s1511_s1 + $0xe8] sm:$0xff]  ;;  %v53_v41 = vld [vmem:[%s1510_s0 + $0xf0] sm:$0xff] }
  0x23   :  { %v516_v53 = vmax.f32 %v452_v43, 0.0  ;;  %v384_v55 = vadd.f32 %v320_v39, %v185_v45  ;;  %579 = vst [vmem:[%s1516_s6 + $0x80] sm:$0xff] %v515_v48  ;;  %v322_v60 = vmul.f32 %v694_v5, %v251_v46  ;;  %v117_v61 = vmul.f32 %v680_v1, %v46_v47 }
  0x24   :  { %v454_v58 = vadd.f32 %v700_v7, %v383_v49  ;;  %v385_v59 = vadd.f32 %v321_v51, %v186_v50  ;;  %v517_v0 = vmax.f32 %v453_v54, 0.0  ;;  %v187_v4 = vadd.f32 %v685_v2, %v116_v56  ;;  %v259_v50 = vld [vmem:[%s1511_s1 + $0xf0] sm:$0xff]  ;;  %v54_v51 = vld [vmem:[%s1510_s0 + $0xf8] sm:$0xff] }
  0x25   :  { %580 = vst [vmem:[%s1516_s6 + $0x88] sm:$0xff] %v516_v53  ;;  %v455_v3 = vadd.f32 %v700_v7, %v384_v55  ;;  %v323_v6 = vmul.f32 %v694_v5, %v252_v52  ;;  %v188_v11 = vadd.f32 %v685_v2, %v117_v61  ;;  %v118_v12 = vmul.f32 %v680_v1, %v47_v57  ;;  %v260_v56 = vld [vmem:[%s1511_s1 + $0xf8] sm:$0xff]  ;;  %v55_v61 = vld [vmem:[%s1510_s0 + $0x100] sm:$0xff] }
  0x26   :  { %v518_v9 = vmax.f32 %v454_v58, 0.0  ;;  %v456_v10 = vadd.f32 %v700_v7, %v385_v59  ;;  %581 = vst [vmem:[%s1516_s6 + $0x90] sm:$0xff] %v517_v0  ;;  %v386_v16 = vadd.f32 %v322_v60, %v187_v4  ;;  %v324_v17 = vmul.f32 %v694_v5, %v253_v62  ;;  %v261_v4 = vld [vmem:[%s1511_s1 + $0x100] sm:$0xff] }
  0x27   :  { %v519_v15 = vmax.f32 %v455_v3, 0.0  ;;  %v119_v18 = vmul.f32 %v680_v1, %v48_v63  ;;  %v387_v22 = vadd.f32 %v323_v6, %v188_v11  ;;  %v189_v23 = vadd.f32 %v685_v2, %v118_v12  ;;  %v56_v6 = vld [vmem:[%s1510_s0 + $0x108] sm:$0xff] }
  0x28   :  { %582 = vst [vmem:[%s1516_s6 + $0x98] sm:$0xff] %v518_v9  ;;  %v520_v21 = vmax.f32 %v456_v10, 0.0  ;;  %v325_v24 = vmul.f32 %v694_v5, %v254_v8  ;;  %v457_v26 = vadd.f32 %v700_v7, %v386_v16  ;;  %v120_v28 = vmul.f32 %v680_v1, %v49_v13  ;;  %v262_v12 = vld [vmem:[%s1511_s1 + $0x108] sm:$0xff] }
  0x29   :  { %583 = vst [vmem:[%s1516_s6 + $0xa0] sm:$0xff] %v519_v15  ;;  %v190_v27 = vadd.f32 %v685_v2, %v119_v18  ;;  %v326_v29 = vmul.f32 %v694_v5, %v255_v14  ;;  %v458_v31 = vadd.f32 %v700_v7, %v387_v22  ;;  %v388_v32 = vadd.f32 %v324_v17, %v189_v23  ;;  %v57_v17 = vld [vmem:[%s1510_s0 + $0x110] sm:$0xff]  ;;  %v58_v23 = vld [vmem:[%s1510_s0 + $0x118] sm:$0xff] }
  0x2a   :  { %584 = vst [vmem:[%s1516_s6 + $0xa8] sm:$0xff] %v520_v21  ;;  %v121_v33 = vmul.f32 %v680_v1, %v50_v19  ;;  %v327_v34 = vmul.f32 %v694_v5, %v256_v20  ;;  %v521_v36 = vmax.f32 %v457_v26, 0.0  ;;  %v191_v38 = vadd.f32 %v685_v2, %v120_v28  ;;  %v263_v18 = vld [vmem:[%s1511_s1 + $0x110] sm:$0xff]  ;;  %v264_v28 = vld [vmem:[%s1511_s1 + $0x118] sm:$0xff] }
  0x2b   :  { %v389_v37 = vadd.f32 %v325_v24, %v190_v27  ;;  %v122_v39 = vmul.f32 %v680_v1, %v51_v25  ;;  %v522_v42 = vmax.f32 %v458_v31, 0.0  ;;  %v459_v43 = vadd.f32 %v700_v7, %v388_v32 }
  0x2c   :  { %v192_v44 = vadd.f32 %v685_v2, %v121_v33  ;;  %v328_v45 = vmul.f32 %v694_v5, %v257_v30  ;;  %585 = vst [vmem:[%s1516_s6 + $0xb0] sm:$0xff] %v521_v36  ;;  %v390_v47 = vadd.f32 %v326_v29, %v191_v38  ;;  %v123_v49 = vmul.f32 %v680_v1, %v52_v35  ;;  %v59_v29 = vld [vmem:[%s1510_s0 + $0x120] sm:$0xff] }
  0x2d   :  { %v460_v46 = vadd.f32 %v700_v7, %v389_v37  ;;  %v193_v48 = vadd.f32 %v685_v2, %v122_v39  ;;  %586 = vst [vmem:[%s1516_s6 + $0xb8] sm:$0xff] %v522_v42  ;;  %v523_v52 = vmax.f32 %v459_v43, 0.0  ;;  %v329_v54 = vmul.f32 %v694_v5, %v258_v40  ;;  %v60_v39 = vld [vmem:[%s1510_s0 + $0x128] sm:$0xff] }
  0x2e   :  { %v391_v53 = vadd.f32 %v327_v34, %v192_v44  ;;  %v124_v55 = vmul.f32 %v680_v1, %v53_v41  ;;  %v461_v58 = vadd.f32 %v700_v7, %v390_v47  ;;  %v194_v60 = vadd.f32 %v685_v2, %v123_v49  ;;  %v265_v34 = vld [vmem:[%s1511_s1 + $0x120] sm:$0xff]  ;;  %v266_v44 = vld [vmem:[%s1511_s1 + $0x128] sm:$0xff] }
  0x2f   :  { %v524_v57 = vmax.f32 %v460_v46, 0.0  ;;  %v392_v59 = vadd.f32 %v328_v45, %v193_v48  ;;  %587 = vst [vmem:[%s1516_s6 + $0xc0] sm:$0xff] %v523_v52  ;;  %v330_v0 = vmul.f32 %v694_v5, %v259_v50  ;;  %v125_v3 = vmul.f32 %v680_v1, %v54_v51  ;;  %v61_v45 = vld [vmem:[%s1510_s0 + $0x130] sm:$0xff] }
  0x30   :  { %v462_v62 = vadd.f32 %v700_v7, %v391_v53  ;;  %v195_v63 = vadd.f32 %v685_v2, %v124_v55  ;;  %v525_v8 = vmax.f32 %v461_v58, 0.0  ;;  %v393_v10 = vadd.f32 %v329_v54, %v194_v60  ;;  %v267_v54 = vld [vmem:[%s1511_s1 + $0x130] sm:$0xff]  ;;  %v62_v55 = vld [vmem:[%s1510_s0 + $0x138] sm:$0xff] }
  0x31   :  { %588 = vst [vmem:[%s1516_s6 + $0xc8] sm:$0xff] %v524_v57  ;;  %v463_v9 = vadd.f32 %v700_v7, %v392_v59  ;;  %v331_v11 = vmul.f32 %v694_v5, %v260_v56  ;;  %v196_v15 = vadd.f32 %v685_v2, %v125_v3  ;;  %v126_v16 = vmul.f32 %v680_v1, %v55_v61  ;;  %v268_v60 = vld [vmem:[%s1511_s1 + $0x138] sm:$0xff]  ;;  %v63_v3 = vld [vmem:[%s1510_s0 + $0x140] sm:$0xff] }
  0x32   :  { %v526_v13 = vmax.f32 %v462_v62, 0.0  ;;  %v394_v14 = vadd.f32 %v330_v0, %v195_v63  ;;  %589 = vst [vmem:[%s1516_s6 + $0xd0] sm:$0xff] %v525_v8  ;;  %v464_v20 = vadd.f32 %v700_v7, %v393_v10  ;;  %v332_v21 = vmul.f32 %v694_v5, %v261_v4  ;;  %v269_v10 = vld [vmem:[%s1511_s1 + $0x140] sm:$0xff] }
  0x33   :  { %v527_v19 = vmax.f32 %v463_v9, 0.0  ;;  %v127_v22 = vmul.f32 %v680_v1, %v56_v6  ;;  %v395_v25 = vadd.f32 %v331_v11, %v196_v15  ;;  %v197_v26 = vadd.f32 %v685_v2, %v126_v16  ;;  %v64_v11 = vld [vmem:[%s1510_s0 + $0x148] sm:$0xff] }
  0x34   :  { %590 = vst [vmem:[%s1516_s6 + $0xd8] sm:$0xff] %v526_v13  ;;  %v465_v24 = vadd.f32 %v700_v7, %v394_v14  ;;  %v333_v27 = vmul.f32 %v694_v5, %v262_v12  ;;  %v528_v30 = vmax.f32 %v464_v20, 0.0  ;;  %v128_v32 = vmul.f32 %v680_v1, %v57_v17  ;;  %v270_v16 = vld [vmem:[%s1511_s1 + $0x148] sm:$0xff] }
  0x35   :  { %591 = vst [vmem:[%s1516_s6 + $0xe0] sm:$0xff] %v527_v19  ;;  %v198_v31 = vadd.f32 %v685_v2, %v127_v22  ;;  %v334_v33 = vmul.f32 %v694_v5, %v263_v18  ;;  %v466_v36 = vadd.f32 %v700_v7, %v395_v25  ;;  %v396_v37 = vadd.f32 %v332_v21, %v197_v26  ;;  %v65_v21 = vld [vmem:[%s1510_s0 + $0x150] sm:$0xff] }
  0x36   :  { %v529_v35 = vmax.f32 %v465_v24, 0.0  ;;  %v129_v38 = vmul.f32 %v680_v1, %v58_v23  ;;  %592 = vst [vmem:[%s1516_s6 + $0xe8] sm:$0xff] %v528_v30  ;;  %v199_v41 = vadd.f32 %v685_v2, %v128_v32  ;;  %v335_v42 = vmul.f32 %v694_v5, %v264_v28  ;;  %v271_v22 = vld [vmem:[%s1511_s1 + $0x150] sm:$0xff]  ;;  %v272_v32 = vld [vmem:[%s1511_s1 + $0x158] sm:$0xff] }
  0x37   :  { %v397_v40 = vadd.f32 %v333_v27, %v198_v31  ;;  %v130_v43 = vmul.f32 %v680_v1, %v59_v29  ;;  %v530_v46 = vmax.f32 %v466_v36, 0.0  ;;  %v467_v47 = vadd.f32 %v700_v7, %v396_v37  ;;  %v66_v27 = vld [vmem:[%s1510_s0 + $0x158] sm:$0xff] }
  0x38   :  { %593 = vst [vmem:[%s1516_s6 + $0xf0] sm:$0xff] %v529_v35  ;;  %v200_v48 = vadd.f32 %v685_v2, %v129_v38  ;;  %v336_v49 = vmul.f32 %v694_v5, %v265_v34  ;;  %v398_v51 = vadd.f32 %v334_v33, %v199_v41  ;;  %v131_v53 = vmul.f32 %v680_v1, %v60_v39  ;;  %v67_v33 = vld [vmem:[%s1510_s0 + $0x160] sm:$0xff] }
  0x39   :  { %v468_v50 = vadd.f32 %v700_v7, %v397_v40  ;;  %v201_v52 = vadd.f32 %v685_v2, %v130_v43  ;;  %594 = vst [vmem:[%s1516_s6 + $0xf8] sm:$0xff] %v530_v46  ;;  %v531_v56 = vmax.f32 %v467_v47, 0.0  ;;  %v337_v58 = vmul.f32 %v694_v5, %v266_v44  ;;  %v273_v38 = vld [vmem:[%s1511_s1 + $0x160] sm:$0xff]  ;;  %v68_v43 = vld [vmem:[%s1510_s0 + $0x168] sm:$0xff] }
  0x3a   :  { %v399_v57 = vadd.f32 %v335_v42, %v200_v48  ;;  %v132_v59 = vmul.f32 %v680_v1, %v61_v45  ;;  %v469_v62 = vadd.f32 %v700_v7, %v398_v51  ;;  %v202_v0 = vadd.f32 %v685_v2, %v131_v53  ;;  %v274_v48 = vld [vmem:[%s1511_s1 + $0x168] sm:$0xff] }
  0x3b   :  { %v532_v61 = vmax.f32 %v468_v50, 0.0  ;;  %v400_v63 = vadd.f32 %v336_v49, %v201_v52  ;;  %595 = vst [vmem:[%s1516_s6 + $0x100] sm:$0xff] %v531_v56  ;;  %v338_v8 = vmul.f32 %v694_v5, %v267_v54  ;;  %v133_v9 = vmul.f32 %v680_v1, %v62_v55  ;;  %v69_v49 = vld [vmem:[%s1510_s0 + $0x170] sm:$0xff] }
  0x3c   :  { %v470_v4 = vadd.f32 %v700_v7, %v399_v57  ;;  %v203_v6 = vadd.f32 %v685_v2, %v132_v59  ;;  %v533_v12 = vmax.f32 %v469_v62, 0.0  ;;  %v401_v14 = vadd.f32 %v337_v58, %v202_v0  ;;  %v275_v58 = vld [vmem:[%s1511_s1 + $0x170] sm:$0xff]  ;;  %v70_v59 = vld [vmem:[%s1510_s0 + $0x178] sm:$0xff] }
  0x3d   :  { %596 = vst [vmem:[%s1516_s6 + $0x108] sm:$0xff] %v532_v61  ;;  %v471_v13 = vadd.f32 %v700_v7, %v400_v63  ;;  %v339_v15 = vmul.f32 %v694_v5, %v268_v60  ;;  %v204_v19 = vadd.f32 %v685_v2, %v133_v9  ;;  %v134_v20 = vmul.f32 %v680_v1, %v63_v3  ;;  %v276_v0 = vld [vmem:[%s1511_s1 + $0x178] sm:$0xff]  ;;  %v71_v9 = vld [vmem:[%s1510_s0 + $0x180] sm:$0xff] }
  0x3e   :  { %v534_v17 = vmax.f32 %v470_v4, 0.0  ;;  %v402_v18 = vadd.f32 %v338_v8, %v203_v6  ;;  %597 = vst [vmem:[%s1516_s6 + $0x110] sm:$0xff] %v533_v12  ;;  %v472_v24 = vadd.f32 %v700_v7, %v401_v14  ;;  %v340_v25 = vmul.f32 %v694_v5, %v269_v10  ;;  %v277_v14 = vld [vmem:[%s1511_s1 + $0x180] sm:$0xff] }
  0x3f   :  { %v535_v23 = vmax.f32 %v471_v13, 0.0  ;;  %v135_v26 = vmul.f32 %v680_v1, %v64_v11  ;;  %v403_v29 = vadd.f32 %v339_v15, %v204_v19  ;;  %v205_v30 = vadd.f32 %v685_v2, %v134_v20  ;;  %v72_v15 = vld [vmem:[%s1510_s0 + $0x188] sm:$0xff] }
  0x40   :  { %598 = vst [vmem:[%s1516_s6 + $0x118] sm:$0xff] %v534_v17  ;;  %v473_v28 = vadd.f32 %v700_v7, %v402_v18  ;;  %v341_v31 = vmul.f32 %v694_v5, %v270_v16  ;;  %v536_v34 = vmax.f32 %v472_v24, 0.0  ;;  %v136_v36 = vmul.f32 %v680_v1, %v65_v21  ;;  %v278_v20 = vld [vmem:[%s1511_s1 + $0x188] sm:$0xff] }
  0x41   :  { %599 = vst [vmem:[%s1516_s6 + $0x120] sm:$0xff] %v535_v23  ;;  %v206_v35 = vadd.f32 %v685_v2, %v135_v26  ;;  %v342_v37 = vmul.f32 %v694_v5, %v271_v22  ;;  %v474_v40 = vadd.f32 %v700_v7, %v403_v29  ;;  %v404_v41 = vadd.f32 %v340_v25, %v205_v30  ;;  %v73_v25 = vld [vmem:[%s1510_s0 + $0x190] sm:$0xff] }
  0x42   :  { %v537_v39 = vmax.f32 %v473_v28, 0.0  ;;  %v137_v42 = vmul.f32 %v680_v1, %v66_v27  ;;  %600 = vst [vmem:[%s1516_s6 + $0x128] sm:$0xff] %v536_v34  ;;  %v207_v45 = vadd.f32 %v685_v2, %v136_v36  ;;  %v343_v46 = vmul.f32 %v694_v5, %v272_v32  ;;  %v279_v26 = vld [vmem:[%s1511_s1 + $0x190] sm:$0xff]  ;;  %v280_v36 = vld [vmem:[%s1511_s1 + $0x198] sm:$0xff] }
  0x43   :  { %v405_v44 = vadd.f32 %v341_v31, %v206_v35  ;;  %v138_v47 = vmul.f32 %v680_v1, %v67_v33  ;;  %v538_v50 = vmax.f32 %v474_v40, 0.0  ;;  %v475_v51 = vadd.f32 %v700_v7, %v404_v41  ;;  %v74_v31 = vld [vmem:[%s1510_s0 + $0x198] sm:$0xff] }
  0x44   :  { %601 = vst [vmem:[%s1516_s6 + $0x130] sm:$0xff] %v537_v39  ;;  %v208_v52 = vadd.f32 %v685_v2, %v137_v42  ;;  %v344_v53 = vmul.f32 %v694_v5, %v273_v38  ;;  %v406_v55 = vadd.f32 %v342_v37, %v207_v45  ;;  %v139_v57 = vmul.f32 %v680_v1, %v68_v43  ;;  %v75_v37 = vld [vmem:[%s1510_s0 + $0x1a0] sm:$0xff] }
  0x45   :  { %v476_v54 = vadd.f32 %v700_v7, %v405_v44  ;;  %v209_v56 = vadd.f32 %v685_v2, %v138_v47  ;;  %602 = vst [vmem:[%s1516_s6 + $0x138] sm:$0xff] %v538_v50  ;;  %v539_v60 = vmax.f32 %v475_v51, 0.0  ;;  %v345_v62 = vmul.f32 %v694_v5, %v274_v48  ;;  %v281_v42 = vld [vmem:[%s1511_s1 + $0x1a0] sm:$0xff]  ;;  %v76_v47 = vld [vmem:[%s1510_s0 + $0x1a8] sm:$0xff] }
  0x46   :  { %v407_v61 = vadd.f32 %v343_v46, %v208_v52  ;;  %v140_v63 = vmul.f32 %v680_v1, %v69_v49  ;;  %v477_v4 = vadd.f32 %v700_v7, %v406_v55  ;;  %v210_v8 = vadd.f32 %v685_v2, %v139_v57  ;;  %v282_v52 = vld [vmem:[%s1511_s1 + $0x1a8] sm:$0xff] }
  0x47   :  { %v540_v3 = vmax.f32 %v476_v54, 0.0  ;;  %v408_v6 = vadd.f32 %v344_v53, %v209_v56  ;;  %603 = vst [vmem:[%s1516_s6 + $0x140] sm:$0xff] %v539_v60  ;;  %v346_v12 = vmul.f32 %v694_v5, %v275_v58  ;;  %v141_v13 = vmul.f32 %v680_v1, %v70_v59  ;;  %v77_v53 = vld [vmem:[%s1510_s0 + $0x1b0] sm:$0xff] }
  0x48   :  { %v478_v10 = vadd.f32 %v700_v7, %v407_v61  ;;  %v211_v11 = vadd.f32 %v685_v2, %v140_v63  ;;  %v541_v16 = vmax.f32 %v477_v4, 0.0  ;;  %v409_v18 = vadd.f32 %v345_v62, %v210_v8  ;;  %v283_v62 = vld [vmem:[%s1511_s1 + $0x1b0] sm:$0xff]  ;;  %v78_v63 = vld [vmem:[%s1510_s0 + $0x1b8] sm:$0xff] }
  0x49   :  { %604 = vst [vmem:[%s1516_s6 + $0x148] sm:$0xff] %v540_v3  ;;  %v479_v17 = vadd.f32 %v700_v7, %v408_v6  ;;  %v347_v19 = vmul.f32 %v694_v5, %v276_v0  ;;  %v212_v23 = vadd.f32 %v685_v2, %v141_v13  ;;  %v142_v24 = vmul.f32 %v680_v1, %v71_v9  ;;  %v284_v8 = vld [vmem:[%s1511_s1 + $0x1b8] sm:$0xff]  ;;  %v79_v13 = vld [vmem:[%s1510_s0 + $0x1c0] sm:$0xff] }
  0x4a   :  { %v542_v21 = vmax.f32 %v478_v10, 0.0  ;;  %v410_v22 = vadd.f32 %v346_v12, %v211_v11  ;;  %605 = vst [vmem:[%s1516_s6 + $0x150] sm:$0xff] %v541_v16  ;;  %v480_v28 = vadd.f32 %v700_v7, %v409_v18  ;;  %v348_v29 = vmul.f32 %v694_v5, %v277_v14  ;;  %v285_v18 = vld [vmem:[%s1511_s1 + $0x1c0] sm:$0xff] }
  0x4b   :  { %v543_v27 = vmax.f32 %v479_v17, 0.0  ;;  %v143_v30 = vmul.f32 %v680_v1, %v72_v15  ;;  %v411_v33 = vadd.f32 %v347_v19, %v212_v23  ;;  %v213_v34 = vadd.f32 %v685_v2, %v142_v24  ;;  %v80_v19 = vld [vmem:[%s1510_s0 + $0x1c8] sm:$0xff] }
  0x4c   :  { %606 = vst [vmem:[%s1516_s6 + $0x158] sm:$0xff] %v542_v21  ;;  %v481_v32 = vadd.f32 %v700_v7, %v410_v22  ;;  %v349_v35 = vmul.f32 %v694_v5, %v278_v20  ;;  %v544_v38 = vmax.f32 %v480_v28, 0.0  ;;  %v144_v40 = vmul.f32 %v680_v1, %v73_v25  ;;  %v286_v24 = vld [vmem:[%s1511_s1 + $0x1c8] sm:$0xff] }
  0x4d   :  { %607 = vst [vmem:[%s1516_s6 + $0x160] sm:$0xff] %v543_v27  ;;  %v214_v39 = vadd.f32 %v685_v2, %v143_v30  ;;  %v350_v41 = vmul.f32 %v694_v5, %v279_v26  ;;  %v482_v44 = vadd.f32 %v700_v7, %v411_v33  ;;  %v412_v45 = vadd.f32 %v348_v29, %v213_v34  ;;  %v81_v29 = vld [vmem:[%s1510_s0 + $0x1d0] sm:$0xff] }
  0x4e   :  { %v545_v43 = vmax.f32 %v481_v32, 0.0  ;;  %v145_v46 = vmul.f32 %v680_v1, %v74_v31  ;;  %608 = vst [vmem:[%s1516_s6 + $0x168] sm:$0xff] %v544_v38  ;;  %v215_v49 = vadd.f32 %v685_v2, %v144_v40  ;;  %v351_v50 = vmul.f32 %v694_v5, %v280_v36  ;;  %v287_v30 = vld [vmem:[%s1511_s1 + $0x1d0] sm:$0xff]  ;;  %v288_v40 = vld [vmem:[%s1511_s1 + $0x1d8] sm:$0xff] }
  0x4f   :  { %v413_v48 = vadd.f32 %v349_v35, %v214_v39  ;;  %v146_v51 = vmul.f32 %v680_v1, %v75_v37  ;;  %v546_v54 = vmax.f32 %v482_v44, 0.0  ;;  %v483_v55 = vadd.f32 %v700_v7, %v412_v45  ;;  %v82_v35 = vld [vmem:[%s1510_s0 + $0x1d8] sm:$0xff]  ;;  %v289_v45 = vld [vmem:[%s1511_s1 + $0x1e0] sm:$0xff] }
  0x50   :  { %609 = vst [vmem:[%s1516_s6 + $0x170] sm:$0xff] %v545_v43  ;;  %v216_v56 = vadd.f32 %v685_v2, %v145_v46  ;;  %v352_v57 = vmul.f32 %v694_v5, %v281_v42  ;;  %v414_v59 = vadd.f32 %v350_v41, %v215_v49  ;;  %v147_v61 = vmul.f32 %v680_v1, %v76_v47  ;;  %v637_v43 = vld [vmem:[%s1514_s4] ss:$0 sm:$0xff] }
  0x51   :  { %v484_v58 = vadd.f32 %v700_v7, %v413_v48  ;;  %v217_v60 = vadd.f32 %v685_v2, %v146_v51  ;;  %610 = vst [vmem:[%s1516_s6 + $0x178] sm:$0xff] %v546_v54  ;;  %v547_v0 = vmax.f32 %v483_v55, 0.0  ;;  %v353_v4 = vmul.f32 %v694_v5, %v282_v52  ;;  %v638_v47 = vld [vmem:[%s1515_s5] ss:$0 sm:$0xff]  ;;  %v84_v51 = vld [vmem:[%s1510_s0 + $0x1e8] sm:$0xff] }
  0x52   :  { %v415_v3 = vadd.f32 %v351_v50, %v216_v56  ;;  %v148_v6 = vmul.f32 %v680_v1, %v77_v53  ;;  %v485_v10 = vadd.f32 %v700_v7, %v414_v59  ;;  %v218_v12 = vadd.f32 %v685_v2, %v147_v61  ;;  %v290_v56 = vld [vmem:[%s1511_s1 + $0x1e8] sm:$0xff] }
  0x53   :  { %v548_v9 = vmax.f32 %v484_v58, 0.0  ;;  %v416_v11 = vadd.f32 %v352_v57, %v217_v60  ;;  %611 = vst [vmem:[%s1516_s6 + $0x180] sm:$0xff] %v547_v0  ;;  %v354_v16 = vmul.f32 %v694_v5, %v283_v62  ;;  %v149_v17 = vmul.f32 %v680_v1, %v78_v63  ;;  %v85_v57 = vld [vmem:[%s1510_s0 + $0x1f0] sm:$0xff] }
  0x54   :  { %v486_v14 = vadd.f32 %v700_v7, %v415_v3  ;;  %v219_v15 = vadd.f32 %v685_v2, %v148_v6  ;;  %v549_v20 = vmax.f32 %v485_v10, 0.0  ;;  %v417_v22 = vadd.f32 %v353_v4, %v218_v12  ;;  %v291_v4 = vld [vmem:[%s1511_s1 + $0x1f0] sm:$0xff]  ;;  %v86_v6 = vld [vmem:[%s1510_s0 + $0x1f8] sm:$0xff] }
  0x55   :  { %612 = vst [vmem:[%s1516_s6 + $0x188] sm:$0xff] %v548_v9  ;;  %v487_v21 = vadd.f32 %v700_v7, %v416_v11  ;;  %v355_v23 = vmul.f32 %v694_v5, %v284_v8  ;;  %v220_v27 = vadd.f32 %v685_v2, %v149_v17  ;;  %v150_v28 = vmul.f32 %v680_v1, %v79_v13  ;;  %v292_v12 = vld [vmem:[%s1511_s1 + $0x1f8] sm:$0xff] }
  0x56   :  { %v550_v25 = vmax.f32 %v486_v14, 0.0  ;;  %v418_v26 = vadd.f32 %v354_v16, %v219_v15  ;;  %613 = vst [vmem:[%s1516_s6 + $0x190] sm:$0xff] %v549_v20  ;;  %v488_v32 = vadd.f32 %v700_v7, %v417_v22  ;;  %v356_v33 = vmul.f32 %v694_v5, %v285_v18 }
  0x57   :  { %v551_v31 = vmax.f32 %v487_v21, 0.0  ;;  %v151_v34 = vmul.f32 %v680_v1, %v80_v19  ;;  %v419_v37 = vadd.f32 %v355_v23, %v220_v27  ;;  %v221_v38 = vadd.f32 %v685_v2, %v150_v28  ;;  %v83_v1 = vld [vmem:[%s1510_s0 + $0x1e0] sm:$0xff] }
  0x58   :  { %614 = vst [vmem:[%s1516_s6 + $0x198] sm:$0xff] %v550_v25  ;;  %v489_v36 = vadd.f32 %v700_v7, %v418_v26  ;;  %v357_v39 = vmul.f32 %v694_v5, %v286_v24  ;;  %v552_v41 = vmax.f32 %v488_v32, 0.0  ;;  %v635_v7 = vld [vmem:[%s1513_s3] ss:$0 sm:$0xff]  ;;  %v358_v44 = vmul.f32 %v637_v43, %v287_v30 }
  0x59   :  { %615 = vst [vmem:[%s1516_s6 + $0x1a0] sm:$0xff] %v551_v31  ;;  %v222_v2 = vadd.f32 %v635_v7, %v151_v34  ;;  %v636_v5 = vld [vmem:[%s1512_s2] ss:$0 sm:$0xff]  ;;  %v490_v48 = vadd.f32 %v638_v47, %v419_v37  ;;  %v420_v49 = vadd.f32 %v356_v33, %v221_v38  ;;  %v359_v54 = vmul.f32 %v637_v43, %v288_v40 }
  0x5a   :  { %v152_v42 = vmul.f32 %v636_v5, %v81_v29  ;;  %v553_v46 = vmax.f32 %v489_v36, 0.0  ;;  %v153_v50 = vmul.f32 %v636_v5, %v82_v35  ;;  %616 = vst [vmem:[%s1516_s6 + $0x1a8] sm:$0xff] %v552_v41  ;;  %v154_v55 = vmul.f32 %v636_v5, %v83_v1 }
  0x5b   :  { %v421_v52 = vadd.f32 %v357_v39, %v222_v2  ;;  %v554_v58 = vmax.f32 %v490_v48, 0.0  ;;  %v491_v59 = vadd.f32 %v638_v47, %v420_v49  ;;  %v360_v61 = vmul.f32 %v637_v43, %v289_v45 }
  0x5c   :  { %v223_v53 = vadd.f32 %v635_v7, %v152_v42  ;;  %617 = vst [vmem:[%s1516_s6 + $0x1b0] sm:$0xff] %v553_v46  ;;  %v224_v60 = vadd.f32 %v635_v7, %v153_v50  ;;  %v225_v0 = vadd.f32 %v635_v7, %v154_v55  ;;  %v155_v3 = vmul.f32 %v636_v5, %v84_v51 }
  0x5d   :  { %v492_v62 = vadd.f32 %v638_v47, %v421_v52  ;;  %618 = vst [vmem:[%s1516_s6 + $0x1b8] sm:$0xff] %v554_v58  ;;  %v555_v8 = vmax.f32 %v491_v59, 0.0  ;;  %v361_v10 = vmul.f32 %v637_v43, %v290_v56  ;;  %v156_v11 = vmul.f32 %v636_v5, %v85_v57 }
  0x5e   :  { %v422_v63 = vadd.f32 %v358_v44, %v223_v53  ;;  %v423_v9 = vadd.f32 %v359_v54, %v224_v60  ;;  %v424_v15 = vadd.f32 %v360_v61, %v225_v0  ;;  %v226_v16 = vadd.f32 %v635_v7, %v155_v3 }
  0x5f   :  { %v556_v13 = vmax.f32 %v492_v62, 0.0  ;;  %619 = vst [vmem:[%s1516_s6 + $0x1c0] sm:$0xff] %v555_v8  ;;  %v227_v18 = vadd.f32 %v635_v7, %v156_v11  ;;  %v362_v19 = vmul.f32 %v637_v43, %v291_v4  ;;  %v157_v20 = vmul.f32 %v636_v5, %v86_v6 }
  0x60   :  { %v493_v14 = vadd.f32 %v638_v47, %v422_v63  ;;  %v494_v17 = vadd.f32 %v638_v47, %v423_v9  ;;  %v495_v22 = vadd.f32 %v638_v47, %v424_v15  ;;  %v425_v23 = vadd.f32 %v361_v10, %v226_v16 }
  0x61   :  { %620 = vst [vmem:[%s1516_s6 + $0x1c8] sm:$0xff] %v556_v13  ;;  %v363_v24 = vmul.f32 %v637_v43, %v292_v12  ;;  %v426_v26 = vadd.f32 %v362_v19, %v227_v18  ;;  %v228_v27 = vadd.f32 %v635_v7, %v157_v20 }
  0x62   :  { %v557_v21 = vmax.f32 %v493_v14, 0.0  ;;  %v558_v25 = vmax.f32 %v494_v17, 0.0  ;;  %v559_v28 = vmax.f32 %v495_v22, 0.0  ;;  %v496_v29 = vadd.f32 %v638_v47, %v425_v23 }
  0x63   :  { %v497_v30 = vadd.f32 %v638_v47, %v426_v26  ;;  %v427_v31 = vadd.f32 %v363_v24, %v228_v27 }
  0x64   :  { %621 = vst [vmem:[%s1516_s6 + $0x1d0] sm:$0xff] %v557_v21  ;;  %622 = vst [vmem:[%s1516_s6 + $0x1d8] sm:$0xff] %v558_v25  ;;  %v560_v32 = vmax.f32 %v496_v29, 0.0 }
  0x65   :  { %623 = vst [vmem:[%s1516_s6 + $0x1e0] sm:$0xff] %v559_v28  ;;  %v561_v33 = vmax.f32 %v497_v30, 0.0  ;;  %v498_v34 = vadd.f32 %v638_v47, %v427_v31 }
  0x66   :  { %624 = vst [vmem:[%s1516_s6 + $0x1e8] sm:$0xff] %v560_v32 }
  0x67   :  { %625 = vst [vmem:[%s1516_s6 + $0x1f0] sm:$0xff] %v561_v33  ;;  %v562_v35 = vmax.f32 %v498_v34, 0.0 }
  0x69   :  { %626 = vst [vmem:[%s1516_s6 + $0x1f8] sm:$0xff] %v562_v35 }

// kernel: residual_forward.8
= control target key start
LH: loop header
LB: loop body
LE: loop exit
PB: predicated region body
PF: predicated region fallthrough
CT: control target
= control target key end

     0   :  { %s1978_s1 = inlined_call_operand.vmem [shape: bf16[128,128], index: 1, kind: input, shape index: {}]   ;;  %s1979_s0 = inlined_call_operand.vmem [shape: bf16[512,128], index: 0, kind: input, shape index: {}]   ;;  %s1980_s2 = inlined_call_operand.vmem [shape: f32[512,128], index: 2, kind: output, shape index: {0}]   ;;  %s1981_s3 = inlined_call_operand.vmem [shape: f32[8,128], index: 3, kind: output, shape index: {1}]  }
   0x1   :  { %v1404_v0 = vld [vmem:[%s1978_s1 + $0x38] sm:$0xff]   ;;  %v1405_v1 = vld [vmem:[%s1978_s1 + $0x30] sm:$0xff]   ;;  %v1406_v2 = vld [vmem:[%s1978_s1 + $0x28] sm:$0xff]  }
   0x2   :  { %1307 = vmatprep.subr.bf16.mxu0 %v1404_v0  ;;  %1387 = vmatprep.subr.bf16.mxu1 %v1404_v0  ;;  %v1407_v3 = vld [vmem:[%s1978_s1 + $0x20] sm:$0xff]   ;;  %v1408_v5 = vld [vmem:[%s1978_s1 + $0x18] sm:$0xff]   ;;  %v1409_v6 = vld [vmem:[%s1978_s1 + $0x10] sm:$0xff]  }
   0x3   :  { %1308 = vmatpush3.bf16.msra.mxu0 %v1404_v0  ;;  %1395 = vmatpush3.bf16.msra.mxu1 %v1404_v0  ;;  %v1412_v4 = vld [vmem:[%s1979_s0] sm:$0xff]   ;;  %v1410_v7 = vld [vmem:[%s1978_s1 + $0x8] sm:$0xff]   ;;  %v1414_v11 = vld [vmem:[%s1979_s0 + $0x10] sm:$0xff]  }
   0x4   :  { %1309 = vmatprep.subr.bf16.mxu0 %v1405_v1  ;;  %1388 = vmatprep.subr.bf16.mxu1 %v1405_v1  ;;  %v1411_v8 = vld [vmem:[%s1978_s1] sm:$0xff]   ;;  %v1413_v10 = vld [vmem:[%s1979_s0 + $0x8] sm:$0xff]   ;;  %v1430_v13 = vld [vmem:[%s1979_s0 + $0x90] sm:$0xff]  }
   0x5   :  { %1323 = vmatprep.mubr.bf16.mxu0 %v1412_v4  ;;  %v1428_v9 = vld [vmem:[%s1979_s0 + $0x80] sm:$0xff]   ;;  %v1429_v12 = vld [vmem:[%s1979_s0 + $0x88] sm:$0xff]   ;;  %v1415_v14 = vld [vmem:[%s1979_s0 + $0x18] sm:$0xff]  }
   0x6   :  { %1355 = vmatprep.mubr.bf16.mxu1 %v1428_v9  ;;  %v1416_v15 = vld [vmem:[%s1979_s0 + $0x20] sm:$0xff]   ;;  %v1431_v16 = vld [vmem:[%s1979_s0 + $0x98] sm:$0xff]   ;;  %v1417_v18 = vld [vmem:[%s1979_s0 + $0x28] sm:$0xff]  }
   0x7   :  { %1310 = vmatpush3.bf16.msra.mxu0 %v1405_v1  ;;  %1396 = vmatpush3.bf16.msra.mxu1 %v1405_v1  ;;  %v1432_v17 = vld [vmem:[%s1979_s0 + $0xa0] sm:$0xff]   ;;  %v1433_v19 = vld [vmem:[%s1979_s0 + $0xa8] sm:$0xff]   ;;  %v1418_v20 = vld [vmem:[%s1979_s0 + $0x30] sm:$0xff]  }
   0x8   :  { %1311 = vmatprep.subr.bf16.mxu0 %v1406_v2  ;;  %1389 = vmatprep.subr.bf16.mxu1 %v1406_v2  ;;  %v1434_v21 = vld [vmem:[%s1979_s0 + $0xb0] sm:$0xff]   ;;  %v1419_v22 = vld [vmem:[%s1979_s0 + $0x38] sm:$0xff]   ;;  %v1420_v24 = vld [vmem:[%s1979_s0 + $0x40] sm:$0xff]  }
   0x9   :  { %v1435_v23 = vld [vmem:[%s1979_s0 + $0xb8] sm:$0xff]   ;;  %v1436_v25 = vld [vmem:[%s1979_s0 + $0xc0] sm:$0xff]   ;;  %v1421_v26 = vld [vmem:[%s1979_s0 + $0x48] sm:$0xff]  }
   0xa   :  { %v1437_v27 = vld [vmem:[%s1979_s0 + $0xc8] sm:$0xff]   ;;  %v1422_v28 = vld [vmem:[%s1979_s0 + $0x50] sm:$0xff]   ;;  %v1423_v30 = vld [vmem:[%s1979_s0 + $0x58] sm:$0xff]  }
   0xb   :  { %1312 = vmatpush3.bf16.msra.mxu0 %v1406_v2  ;;  %1397 = vmatpush3.bf16.msra.mxu1 %v1406_v2  ;;  %v1438_v29 = vld [vmem:[%s1979_s0 + $0xd0] sm:$0xff]   ;;  %v1439_v31 = vld [vmem:[%s1979_s0 + $0xd8] sm:$0xff]   ;;  %v1424_v32 = vld [vmem:[%s1979_s0 + $0x60] sm:$0xff]  }
   0xc   :  { %1313 = vmatprep.subr.bf16.mxu0 %v1407_v3  ;;  %1390 = vmatprep.subr.bf16.mxu1 %v1407_v3  ;;  %v1440_v33 = vld [vmem:[%s1979_s0 + $0xe0] sm:$0xff]   ;;  %v1425_v34 = vld [vmem:[%s1979_s0 + $0x68] sm:$0xff]   ;;  %v1426_v36 = vld [vmem:[%s1979_s0 + $0x70] sm:$0xff]  }
   0xd   :  { %v1441_v35 = vld [vmem:[%s1979_s0 + $0xe8] sm:$0xff]   ;;  %v1442_v37 = vld [vmem:[%s1979_s0 + $0xf0] sm:$0xff]   ;;  %v1427_v38 = vld [vmem:[%s1979_s0 + $0x78] sm:$0xff]  }
   0xe   :  { %v1443_v39 = vld [vmem:[%s1979_s0 + $0xf8] sm:$0xff]  }
   0xf   :  { %1314 = vmatpush3.bf16.msra.mxu0 %v1407_v3  ;;  %1398 = vmatpush3.bf16.msra.mxu1 %v1407_v3 }
  0x10   :  { %1315 = vmatprep.subr.bf16.mxu0 %v1408_v5  ;;  %1391 = vmatprep.subr.bf16.mxu1 %v1408_v5 }
  0x13   :  { %1316 = vmatpush3.bf16.msra.mxu0 %v1408_v5  ;;  %1399 = vmatpush3.bf16.msra.mxu1 %v1408_v5 }
  0x14   :  { %1317 = vmatprep.subr.bf16.mxu0 %v1409_v6  ;;  %1392 = vmatprep.subr.bf16.mxu1 %v1409_v6 }
  0x17   :  { %1318 = vmatpush3.bf16.msra.mxu0 %v1409_v6  ;;  %1400 = vmatpush3.bf16.msra.mxu1 %v1409_v6 }
  0x18   :  { %1319 = vmatprep.subr.bf16.mxu0 %v1410_v7  ;;  %1393 = vmatprep.subr.bf16.mxu1 %v1410_v7 }
  0x1b   :  { %1320 = vmatpush3.bf16.msra.mxu0 %v1410_v7  ;;  %1401 = vmatpush3.bf16.msra.mxu1 %v1410_v7 }
  0x1c   :  { %1321 = vmatprep.subr.bf16.mxu0 %v1411_v8  ;;  %1394 = vmatprep.subr.bf16.mxu1 %v1411_v8 }
  0x1f   :  { %1322 = vmatpush3.bf16.msra.mxu0 %v1411_v8  ;;  %1402 = vmatpush3.bf16.msra.mxu1 %v1411_v8 }
  0x22   :  { %1324 = vmatmul.mubr.bf16.vlgmr.msra.gmra.mxu0 %v1413_v10  ;;  %1356 = vmatmul.mubr.bf16.vlgmr.msra.gmra.mxu1 %v1429_v12 }
  0x23   :  { %1327 = vmatprep.mubr.bf16.mxu0 %v1414_v11  ;;  %1359 = vmatprep.mubr.bf16.mxu1 %v1430_v13 }
  0x2a   :  { %1328 = vmatmul.mubr.bf16.gmra.mxu0 %v1415_v14  ;;  %1360 = vmatmul.mubr.bf16.gmra.mxu1 %v1431_v16 }
  0x2b   :  { %1331 = vmatprep.mubr.bf16.mxu0 %v1416_v15  ;;  %1363 = vmatprep.mubr.bf16.mxu1 %v1432_v17  ;;  %v1444_v17 = vmov 0.0  }
  0x2c   :  { %1218 = vst [vmem:[%s1981_s3 + $0x2] sm:$0x3f] %v1444_v17 }
  0x32   :  { %1332 = vmatmul.mubr.bf16.gmra.mxu0 %v1417_v18  ;;  %1364 = vmatmul.mubr.bf16.gmra.mxu1 %v1433_v19 }
  0x33   :  { %1335 = vmatprep.mubr.bf16.mxu0 %v1418_v20  ;;  %1367 = vmatprep.mubr.bf16.mxu1 %v1434_v21 }
  0x3a   :  { %1336 = vmatmul.mubr.bf16.gmra.mxu0 %v1419_v22  ;;  %1368 = vmatmul.mubr.bf16.gmra.mxu1 %v1435_v23 }
  0x3b   :  { %1339 = vmatprep.mubr.bf16.mxu0 %v1420_v24  ;;  %1371 = vmatprep.mubr.bf16.mxu1 %v1436_v25 }
  0x42   :  { %1340 = vmatmul.mubr.bf16.gmra.mxu0 %v1421_v26  ;;  %1372 = vmatmul.mubr.bf16.gmra.mxu1 %v1437_v27 }
  0x43   :  { %1343 = vmatprep.mubr.bf16.mxu0 %v1422_v28  ;;  %1375 = vmatprep.mubr.bf16.mxu1 %v1438_v29 }
  0x4a   :  { %1344 = vmatmul.mubr.bf16.gmra.mxu0 %v1423_v30  ;;  %1376 = vmatmul.mubr.bf16.gmra.mxu1 %v1439_v31 }
  0x4b   :  { %1347 = vmatprep.mubr.bf16.mxu0 %v1424_v32  ;;  %1379 = vmatprep.mubr.bf16.mxu1 %v1440_v33 }
  0x52   :  { %1348 = vmatmul.mubr.bf16.gmra.mxu0 %v1425_v34  ;;  %1380 = vmatmul.mubr.bf16.gmra.mxu1 %v1441_v35 }
  0x53   :  { %1351 = vmatprep.mubr.bf16.mxu0 %v1426_v36  ;;  %1383 = vmatprep.mubr.bf16.mxu1 %v1442_v37 }
  0x5a   :  { %1352 = vmatmul.mubr.bf16.gmra.mxu0 %v1427_v38  ;;  %1384 = vmatmul.mubr.bf16.gmra.mxu1 %v1443_v39 }
  0xe2   :  { %v1325_v40 = vpop.f32.mrf.mxu0  ;;  %v1585_v41 = vpop.f32.mrf.mxu1 }
  0xe3   :  { %952 = vst [vmem:[%s1980_s2 + $0x10] sm:$0xff] %v1325_v40  ;;  %984 = vst [vmem:[%s1980_s2 + $0x110] sm:$0xff] %v1585_v41  ;;  %v1086_v53 = vmul.f32 %v1325_v40, %v1325_v40 }
  0xe4   :  { %v500_v42 = vpop.f32.mrf.mxu0  ;;  %v1594_v43 = vpop.f32.mrf.mxu1 }
  0xe5   :  { %950 = vst [vmem:[%s1980_s2] sm:$0xff] %v500_v42  ;;  %982 = vst [vmem:[%s1980_s2 + $0x100] sm:$0xff] %v1594_v43  ;;  %v1084_v48 = vmul.f32 %v500_v42, %v500_v42 }
  0xe6   :  { %v1326_v44 = vpop.f32.mrf.mxu0  ;;  %v1603_v45 = vpop.f32.mrf.mxu1 }
  0xe7   :  { %953 = vst [vmem:[%s1980_s2 + $0x18] sm:$0xff] %v1326_v44  ;;  %985 = vst [vmem:[%s1980_s2 + $0x118] sm:$0xff] %v1603_v45  ;;  %v1087_v58 = vmul.f32 %v1326_v44, %v1326_v44 }
  0xe8   :  { %v503_v46 = vpop.f32.mrf.mxu0  ;;  %v1612_v47 = vpop.f32.mrf.mxu1 }
  0xe9   :  { %951 = vst [vmem:[%s1980_s2 + $0x8] sm:$0xff] %v503_v46  ;;  %v1014_v49 = vadd.f32 %v503_v46, %v500_v42  ;;  %v1085_v50 = vmul.f32 %v503_v46, %v503_v46  ;;  %983 = vst [vmem:[%s1980_s2 + $0x108] sm:$0xff] %v1612_v47 }
  0xea   :  { %v1329_v51 = vpop.f32.mrf.mxu0  ;;  %v1621_v52 = vpop.f32.mrf.mxu1 }
  0xeb   :  { %v1015_v54 = vadd.f32 %v1325_v40, %v1014_v49  ;;  %v1148_v55 = vadd.f32 %v1085_v50, %v1084_v48  ;;  %956 = vst [vmem:[%s1980_s2 + $0x30] sm:$0xff] %v1329_v51  ;;  %988 = vst [vmem:[%s1980_s2 + $0x130] sm:$0xff] %v1621_v52  ;;  %v1090_v9 = vmul.f32 %v1329_v51, %v1329_v51 }
  0xec   :  { %v516_v56 = vpop.f32.mrf.mxu0  ;;  %v1630_v57 = vpop.f32.mrf.mxu1 }
  0xed   :  { %v1149_v59 = vadd.f32 %v1148_v55, %v1086_v53  ;;  %954 = vst [vmem:[%s1980_s2 + $0x20] sm:$0xff] %v516_v56  ;;  %v1016_v60 = vadd.f32 %v1326_v44, %v1015_v54  ;;  %986 = vst [vmem:[%s1980_s2 + $0x120] sm:$0xff] %v1630_v57  ;;  %v1088_v0 = vmul.f32 %v516_v56, %v516_v56 }
  0xee   :  { %v1330_v61 = vpop.f32.mrf.mxu0  ;;  %v1639_v62 = vpop.f32.mrf.mxu1 }
  0xef   :  { %v1017_v63 = vadd.f32 %v1016_v60, %v516_v56  ;;  %v1150_v1 = vadd.f32 %v1149_v59, %v1087_v58  ;;  %957 = vst [vmem:[%s1980_s2 + $0x38] sm:$0xff] %v1330_v61  ;;  %989 = vst [vmem:[%s1980_s2 + $0x138] sm:$0xff] %v1639_v62  ;;  %v1091_v14 = vmul.f32 %v1330_v61, %v1330_v61 }
  0xf0   :  { %v519_v2 = vpop.f32.mrf.mxu0  ;;  %v1648_v3 = vpop.f32.mrf.mxu1 }
  0xf1   :  { %v1151_v4 = vadd.f32 %v1150_v1, %v1088_v0  ;;  %955 = vst [vmem:[%s1980_s2 + $0x28] sm:$0xff] %v519_v2  ;;  %v1018_v5 = vadd.f32 %v1017_v63, %v519_v2  ;;  %v1089_v6 = vmul.f32 %v519_v2, %v519_v2  ;;  %987 = vst [vmem:[%s1980_s2 + $0x128] sm:$0xff] %v1648_v3 }
  0xf2   :  { %v1333_v7 = vpop.f32.mrf.mxu0  ;;  %v1657_v8 = vpop.f32.mrf.mxu1 }
  0xf3   :  { %v1019_v10 = vadd.f32 %v1329_v51, %v1018_v5  ;;  %v1152_v11 = vadd.f32 %v1151_v4, %v1089_v6  ;;  %960 = vst [vmem:[%s1980_s2 + $0x50] sm:$0xff] %v1333_v7  ;;  %992 = vst [vmem:[%s1980_s2 + $0x150] sm:$0xff] %v1657_v8  ;;  %v1094_v30 = vmul.f32 %v1333_v7, %v1333_v7 }
  0xf4   :  { %v532_v12 = vpop.f32.mrf.mxu0  ;;  %v1666_v13 = vpop.f32.mrf.mxu1 }
  0xf5   :  { %v1153_v15 = vadd.f32 %v1152_v11, %v1090_v9  ;;  %958 = vst [vmem:[%s1980_s2 + $0x40] sm:$0xff] %v532_v12  ;;  %v1020_v16 = vadd.f32 %v1330_v61, %v1019_v10  ;;  %990 = vst [vmem:[%s1980_s2 + $0x140] sm:$0xff] %v1666_v13  ;;  %v1092_v21 = vmul.f32 %v532_v12, %v532_v12 }
  0xf6   :  { %v1334_v18 = vpop.f32.mrf.mxu0  ;;  %v1678_v19 = vpop.f32.mrf.mxu1 }
  0xf7   :  { %v1021_v20 = vadd.f32 %v1020_v16, %v532_v12  ;;  %v1154_v22 = vadd.f32 %v1153_v15, %v1091_v14  ;;  %961 = vst [vmem:[%s1980_s2 + $0x58] sm:$0xff] %v1334_v18  ;;  %993 = vst [vmem:[%s1980_s2 + $0x158] sm:$0xff] %v1678_v19  ;;  %v1095_v35 = vmul.f32 %v1334_v18, %v1334_v18 }
  0xf8   :  { %v535_v23 = vpop.f32.mrf.mxu0  ;;  %v1687_v24 = vpop.f32.mrf.mxu1 }
  0xf9   :  { %v1155_v25 = vadd.f32 %v1154_v22, %v1092_v21  ;;  %959 = vst [vmem:[%s1980_s2 + $0x48] sm:$0xff] %v535_v23  ;;  %v1022_v26 = vadd.f32 %v1021_v20, %v535_v23  ;;  %v1093_v27 = vmul.f32 %v535_v23, %v535_v23  ;;  %991 = vst [vmem:[%s1980_s2 + $0x148] sm:$0xff] %v1687_v24 }
  0xfa   :  { %v1337_v28 = vpop.f32.mrf.mxu0  ;;  %v1696_v29 = vpop.f32.mrf.mxu1 }
  0xfb   :  { %v1023_v31 = vadd.f32 %v1333_v7, %v1022_v26  ;;  %v1156_v32 = vadd.f32 %v1155_v25, %v1093_v27  ;;  %964 = vst [vmem:[%s1980_s2 + $0x70] sm:$0xff] %v1337_v28  ;;  %996 = vst [vmem:[%s1980_s2 + $0x170] sm:$0xff] %v1696_v29  ;;  %v1098_v55 = vmul.f32 %v1337_v28, %v1337_v28 }
  0xfc   :  { %v548_v33 = vpop.f32.mrf.mxu0  ;;  %v1705_v34 = vpop.f32.mrf.mxu1 }
  0xfd   :  { %v1157_v36 = vadd.f32 %v1156_v32, %v1094_v30  ;;  %962 = vst [vmem:[%s1980_s2 + $0x60] sm:$0xff] %v548_v33  ;;  %v1024_v37 = vadd.f32 %v1334_v18, %v1023_v31  ;;  %994 = vst [vmem:[%s1980_s2 + $0x160] sm:$0xff] %v1705_v34  ;;  %v1096_v42 = vmul.f32 %v548_v33, %v548_v33 }
  0xfe   :  { %v1338_v38 = vpop.f32.mrf.mxu0  ;;  %v1714_v39 = vpop.f32.mrf.mxu1 }
  0xff   :  { %v1025_v40 = vadd.f32 %v1024_v37, %v548_v33  ;;  %v1158_v44 = vadd.f32 %v1157_v36, %v1095_v35  ;;  %965 = vst [vmem:[%s1980_s2 + $0x78] sm:$0xff] %v1338_v38  ;;  %997 = vst [vmem:[%s1980_s2 + $0x178] sm:$0xff] %v1714_v39  ;;  %v1099_v61 = vmul.f32 %v1338_v38, %v1338_v38 }
 0x100   :  { %v551_v46 = vpop.f32.mrf.mxu0  ;;  %v1723_v48 = vpop.f32.mrf.mxu1 }
 0x101   :  { %v1159_v49 = vadd.f32 %v1158_v44, %v1096_v42  ;;  %963 = vst [vmem:[%s1980_s2 + $0x68] sm:$0xff] %v551_v46  ;;  %v1026_v50 = vadd.f32 %v1025_v40, %v551_v46  ;;  %v1097_v51 = vmul.f32 %v551_v46, %v551_v46  ;;  %995 = vst [vmem:[%s1980_s2 + $0x168] sm:$0xff] %v1723_v48 }
 0x102   :  { %v1341_v53 = vpop.f32.mrf.mxu0  ;;  %v1732_v54 = vpop.f32.mrf.mxu1 }
 0x103   :  { %v1027_v56 = vadd.f32 %v1337_v28, %v1026_v50  ;;  %v1160_v58 = vadd.f32 %v1159_v49, %v1097_v51  ;;  %968 = vst [vmem:[%s1980_s2 + $0x90] sm:$0xff] %v1341_v53  ;;  %1000 = vst [vmem:[%s1980_s2 + $0x190] sm:$0xff] %v1732_v54  ;;  %v1102_v16 = vmul.f32 %v1341_v53, %v1341_v53 }
 0x104   :  { %v564_v59 = vpop.f32.mrf.mxu0  ;;  %v1741_v60 = vpop.f32.mrf.mxu1 }
 0x105   :  { %v1161_v63 = vadd.f32 %v1160_v58, %v1098_v55  ;;  %966 = vst [vmem:[%s1980_s2 + $0x80] sm:$0xff] %v564_v59  ;;  %v1028_v0 = vadd.f32 %v1338_v38, %v1027_v56  ;;  %998 = vst [vmem:[%s1980_s2 + $0x180] sm:$0xff] %v1741_v60  ;;  %v1100_v5 = vmul.f32 %v564_v59, %v564_v59 }
 0x106   :  { %v1342_v1 = vpop.f32.mrf.mxu0  ;;  %v1750_v2 = vpop.f32.mrf.mxu1 }
 0x107   :  { %v1029_v4 = vadd.f32 %v1028_v0, %v564_v59  ;;  %v1162_v6 = vadd.f32 %v1161_v63, %v1099_v61  ;;  %969 = vst [vmem:[%s1980_s2 + $0x98] sm:$0xff] %v1342_v1  ;;  %1001 = vst [vmem:[%s1980_s2 + $0x198] sm:$0xff] %v1750_v2  ;;  %v1103_v22 = vmul.f32 %v1342_v1, %v1342_v1 }
 0x108   :  { %v567_v7 = vpop.f32.mrf.mxu0  ;;  %v1759_v9 = vpop.f32.mrf.mxu1 }
 0x109   :  { %v1163_v10 = vadd.f32 %v1162_v6, %v1100_v5  ;;  %967 = vst [vmem:[%s1980_s2 + $0x88] sm:$0xff] %v567_v7  ;;  %v1030_v11 = vadd.f32 %v1029_v4, %v567_v7  ;;  %v1101_v12 = vmul.f32 %v567_v7, %v567_v7  ;;  %999 = vst [vmem:[%s1980_s2 + $0x188] sm:$0xff] %v1759_v9 }
 0x10a   :  { %v1345_v14 = vpop.f32.mrf.mxu0  ;;  %v1768_v15 = vpop.f32.mrf.mxu1 }
 0x10b   :  { %v1031_v17 = vadd.f32 %v1341_v53, %v1030_v11  ;;  %v1164_v18 = vadd.f32 %v1163_v10, %v1101_v12  ;;  %972 = vst [vmem:[%s1980_s2 + $0xb0] sm:$0xff] %v1345_v14  ;;  %1004 = vst [vmem:[%s1980_s2 + $0x1b0] sm:$0xff] %v1768_v15  ;;  %v1106_v42 = vmul.f32 %v1345_v14, %v1345_v14 }
 0x10c   :  { %v580_v20 = vpop.f32.mrf.mxu0  ;;  %v1777_v21 = vpop.f32.mrf.mxu1 }
 0x10d   :  { %v1165_v23 = vadd.f32 %v1164_v18, %v1102_v16  ;;  %970 = vst [vmem:[%s1980_s2 + $0xa0] sm:$0xff] %v580_v20  ;;  %v1032_v25 = vadd.f32 %v1342_v1, %v1031_v17  ;;  %1002 = vst [vmem:[%s1980_s2 + $0x1a0] sm:$0xff] %v1777_v21  ;;  %v1104_v30 = vmul.f32 %v580_v20, %v580_v20 }
 0x10e   :  { %v1346_v26 = vpop.f32.mrf.mxu0  ;;  %v1786_v27 = vpop.f32.mrf.mxu1 }
 0x10f   :  { %v1033_v28 = vadd.f32 %v1032_v25, %v580_v20  ;;  %v1166_v31 = vadd.f32 %v1165_v23, %v1103_v22  ;;  %973 = vst [vmem:[%s1980_s2 + $0xb8] sm:$0xff] %v1346_v26  ;;  %1005 = vst [vmem:[%s1980_s2 + $0x1b8] sm:$0xff] %v1786_v27  ;;  %v1107_v51 = vmul.f32 %v1346_v26, %v1346_v26 }
 0x110   :  { %v583_v32 = vpop.f32.mrf.mxu0  ;;  %v1795_v33 = vpop.f32.mrf.mxu1 }
 0x111   :  { %v1167_v35 = vadd.f32 %v1166_v31, %v1104_v30  ;;  %971 = vst [vmem:[%s1980_s2 + $0xa8] sm:$0xff] %v583_v32  ;;  %v1034_v36 = vadd.f32 %v1033_v28, %v583_v32  ;;  %v1105_v37 = vmul.f32 %v583_v32, %v583_v32  ;;  %1003 = vst [vmem:[%s1980_s2 + $0x1a8] sm:$0xff] %v1795_v33 }
 0x112   :  { %v1349_v38 = vpop.f32.mrf.mxu0  ;;  %v1804_v40 = vpop.f32.mrf.mxu1 }
 0x113   :  { %v1035_v44 = vadd.f32 %v1345_v14, %v1034_v36  ;;  %v1168_v46 = vadd.f32 %v1167_v35, %v1105_v37  ;;  %976 = vst [vmem:[%s1980_s2 + $0xd0] sm:$0xff] %v1349_v38  ;;  %1008 = vst [vmem:[%s1980_s2 + $0x1d0] sm:$0xff] %v1804_v40  ;;  %v1110_v11 = vmul.f32 %v1349_v38, %v1349_v38 }
 0x114   :  { %v596_v49 = vpop.f32.mrf.mxu0  ;;  %v1813_v50 = vpop.f32.mrf.mxu1 }
 0x115   :  { %v1169_v53 = vadd.f32 %v1168_v46, %v1106_v42  ;;  %974 = vst [vmem:[%s1980_s2 + $0xc0] sm:$0xff] %v596_v49  ;;  %v1036_v55 = vadd.f32 %v1346_v26, %v1035_v44  ;;  %1006 = vst [vmem:[%s1980_s2 + $0x1c0] sm:$0xff] %v1813_v50  ;;  %v1108_v61 = vmul.f32 %v596_v49, %v596_v49 }
 0x116   :  { %v1350_v56 = vpop.f32.mrf.mxu0  ;;  %v1822_v58 = vpop.f32.mrf.mxu1 }
 0x117   :  { %v1037_v59 = vadd.f32 %v1036_v55, %v596_v49  ;;  %v1170_v63 = vadd.f32 %v1169_v53, %v1107_v51  ;;  %977 = vst [vmem:[%s1980_s2 + $0xd8] sm:$0xff] %v1350_v56  ;;  %1009 = vst [vmem:[%s1980_s2 + $0x1d8] sm:$0xff] %v1822_v58  ;;  %v1111_v18 = vmul.f32 %v1350_v56, %v1350_v56 }
 0x118   :  { %v599_v0 = vpop.f32.mrf.mxu0  ;;  %v1831_v1 = vpop.f32.mrf.mxu1  ;;  %v1116_v53 = vmul.f32 %v1594_v43, %v1594_v43 }
 0x119   :  { %v1171_v4 = vadd.f32 %v1170_v63, %v1108_v61  ;;  %975 = vst [vmem:[%s1980_s2 + $0xc8] sm:$0xff] %v599_v0  ;;  %v1038_v5 = vadd.f32 %v1037_v59, %v599_v0  ;;  %v1109_v6 = vmul.f32 %v599_v0, %v599_v0  ;;  %1007 = vst [vmem:[%s1980_s2 + $0x1c8] sm:$0xff] %v1831_v1 }
 0x11a   :  { %v1353_v7 = vpop.f32.mrf.mxu0  ;;  %v1840_v10 = vpop.f32.mrf.mxu1  ;;  %v1117_v61 = vmul.f32 %v1612_v47, %v1612_v47  ;;  %v1118_v0 = vmul.f32 %v1585_v41, %v1585_v41 }
 0x11b   :  { %v1039_v12 = vadd.f32 %v1349_v38, %v1038_v5  ;;  %v1172_v14 = vadd.f32 %v1171_v4, %v1109_v6  ;;  %980 = vst [vmem:[%s1980_s2 + $0xf0] sm:$0xff] %v1353_v7  ;;  %1012 = vst [vmem:[%s1980_s2 + $0x1f0] sm:$0xff] %v1840_v10  ;;  %v1114_v38 = vmul.f32 %v1353_v7, %v1353_v7 }
 0x11c   :  { %v612_v16 = vpop.f32.mrf.mxu0  ;;  %v1849_v17 = vpop.f32.mrf.mxu1  ;;  %v1119_v6 = vmul.f32 %v1603_v45, %v1603_v45 }
 0x11d   :  { %v1173_v20 = vadd.f32 %v1172_v14, %v1110_v11  ;;  %978 = vst [vmem:[%s1980_s2 + $0xe0] sm:$0xff] %v612_v16  ;;  %v1040_v22 = vadd.f32 %v1350_v56, %v1039_v12  ;;  %1010 = vst [vmem:[%s1980_s2 + $0x1e0] sm:$0xff] %v1849_v17  ;;  %v1112_v28 = vmul.f32 %v612_v16, %v612_v16 }
 0x11e   :  { %v1354_v23 = vpop.f32.mrf.mxu0  ;;  %v1858_v25 = vpop.f32.mrf.mxu1  ;;  %v1120_v12 = vmul.f32 %v1630_v57, %v1630_v57 }
 0x11f   :  { %v1041_v26 = vadd.f32 %v1040_v22, %v612_v16  ;;  %v1174_v30 = vadd.f32 %v1173_v20, %v1111_v18  ;;  %981 = vst [vmem:[%s1980_s2 + $0xf8] sm:$0xff] %v1354_v23  ;;  %1013 = vst [vmem:[%s1980_s2 + $0x1f8] sm:$0xff] %v1858_v25  ;;  %v1115_v46 = vmul.f32 %v1354_v23, %v1354_v23 }
 0x120   :  { %v615_v31 = vpop.f32.mrf.mxu0  ;;  %v1867_v32 = vpop.f32.mrf.mxu1  ;;  %v1121_v18 = vmul.f32 %v1648_v3, %v1648_v3 }
 0x121   :  { %v1175_v35 = vadd.f32 %v1174_v30, %v1112_v28  ;;  %979 = vst [vmem:[%s1980_s2 + $0xe8] sm:$0xff] %v615_v31  ;;  %v1042_v36 = vadd.f32 %v1041_v26, %v615_v31  ;;  %v1113_v37 = vmul.f32 %v615_v31, %v615_v31  ;;  %1011 = vst [vmem:[%s1980_s2 + $0x1e8] sm:$0xff] %v1867_v32 }
 0x122   :  { %v1124_v28 = vmul.f32 %v1666_v13, %v1666_v13 }
 0x123   :  { %v1043_v42 = vadd.f32 %v1353_v7, %v1042_v36  ;;  %v1176_v44 = vadd.f32 %v1175_v35, %v1113_v37  ;;  %v1125_v35 = vmul.f32 %v1687_v24, %v1687_v24 }
 0x125   :  { %v1044_v49 = vadd.f32 %v1354_v23, %v1043_v42  ;;  %v1177_v51 = vadd.f32 %v1176_v44, %v1114_v38  ;;  %v1128_v44 = vmul.f32 %v1705_v34, %v1705_v34 }
 0x127   :  { %v1178_v55 = vadd.f32 %v1177_v51, %v1115_v46  ;;  %v1045_v56 = vadd.f32 %v1044_v49, %v1594_v43  ;;  %v1129_v51 = vmul.f32 %v1723_v48, %v1723_v48 }
 0x129   :  { %v1046_v59 = vadd.f32 %v1045_v56, %v1612_v47  ;;  %v1179_v63 = vadd.f32 %v1178_v55, %v1116_v53 }
 0x12b   :  { %v1047_v4 = vadd.f32 %v1585_v41, %v1046_v59  ;;  %v1180_v5 = vadd.f32 %v1179_v63, %v1117_v61  ;;  %v1122_v41 = vmul.f32 %v1621_v52, %v1621_v52  ;;  %v1132_v61 = vmul.f32 %v1741_v60, %v1741_v60 }
 0x12d   :  { %v1181_v7 = vadd.f32 %v1180_v5, %v1118_v0  ;;  %v1048_v11 = vadd.f32 %v1603_v45, %v1047_v4  ;;  %v1123_v45 = vmul.f32 %v1639_v62, %v1639_v62  ;;  %v1133_v4 = vmul.f32 %v1759_v9, %v1759_v9 }
 0x12f   :  { %v1049_v43 = vadd.f32 %v1048_v11, %v1630_v57  ;;  %v1182_v14 = vadd.f32 %v1181_v7, %v1119_v6 }
 0x131   :  { %v1183_v47 = vadd.f32 %v1182_v14, %v1120_v12  ;;  %v1050_v16 = vadd.f32 %v1049_v43, %v1648_v3  ;;  %v1136_v43 = vmul.f32 %v1777_v21, %v1777_v21 }
 0x133   :  { %v1051_v20 = vadd.f32 %v1621_v52, %v1050_v16  ;;  %v1184_v22 = vadd.f32 %v1183_v47, %v1121_v18  ;;  %v1126_v52 = vmul.f32 %v1657_v8, %v1657_v8  ;;  %v1137_v47 = vmul.f32 %v1795_v33, %v1795_v33 }
 0x135   :  { %v1185_v23 = vadd.f32 %v1184_v22, %v1122_v41  ;;  %v1052_v26 = vadd.f32 %v1639_v62, %v1051_v20  ;;  %v1127_v62 = vmul.f32 %v1678_v19, %v1678_v19  ;;  %v1140_v22 = vmul.f32 %v1813_v50, %v1813_v50 }
 0x137   :  { %v1053_v57 = vadd.f32 %v1052_v26, %v1666_v13  ;;  %v1186_v30 = vadd.f32 %v1185_v23, %v1123_v45  ;;  %v1141_v26 = vmul.f32 %v1831_v1, %v1831_v1 }
 0x139   :  { %v1187_v31 = vadd.f32 %v1186_v30, %v1124_v28  ;;  %v1054_v3 = vadd.f32 %v1053_v57, %v1687_v24 }
 0x13b   :  { %v1055_v36 = vadd.f32 %v1657_v8, %v1054_v3  ;;  %v1188_v37 = vadd.f32 %v1187_v31, %v1125_v35  ;;  %v1130_v8 = vmul.f32 %v1696_v29, %v1696_v29  ;;  %v1144_v3 = vmul.f32 %v1849_v17, %v1849_v17 }
 0x13d   :  { %v1189_v38 = vadd.f32 %v1188_v37, %v1126_v52  ;;  %v1056_v42 = vadd.f32 %v1678_v19, %v1055_v36  ;;  %v1131_v19 = vmul.f32 %v1714_v39, %v1714_v39  ;;  %v1145_v36 = vmul.f32 %v1867_v32, %v1867_v32 }
 0x13f   :  { %v1057_v13 = vadd.f32 %v1056_v42, %v1705_v34  ;;  %v1190_v46 = vadd.f32 %v1189_v38, %v1127_v62 }
 0x141   :  { %v1191_v49 = vadd.f32 %v1190_v46, %v1128_v44  ;;  %v1058_v24 = vadd.f32 %v1057_v13, %v1723_v48 }
 0x143   :  { %v1059_v53 = vadd.f32 %v1696_v29, %v1058_v24  ;;  %v1192_v55 = vadd.f32 %v1191_v49, %v1129_v51  ;;  %v1134_v29 = vmul.f32 %v1732_v54, %v1732_v54 }
 0x145   :  { %v1193_v56 = vadd.f32 %v1192_v55, %v1130_v8  ;;  %v1060_v59 = vadd.f32 %v1714_v39, %v1059_v53  ;;  %v1135_v39 = vmul.f32 %v1750_v2, %v1750_v2 }
 0x147   :  { %v1061_v34 = vadd.f32 %v1060_v59, %v1741_v60  ;;  %v1194_v63 = vadd.f32 %v1193_v56, %v1131_v19 }
 0x149   :  { %v1195_v0 = vadd.f32 %v1194_v63, %v1132_v61  ;;  %v1062_v48 = vadd.f32 %v1061_v34, %v1759_v9 }
 0x14b   :  { %v1063_v5 = vadd.f32 %v1732_v54, %v1062_v48  ;;  %v1196_v6 = vadd.f32 %v1195_v0, %v1133_v4  ;;  %v1138_v54 = vmul.f32 %v1768_v15, %v1768_v15 }
 0x14d   :  { %v1197_v7 = vadd.f32 %v1196_v6, %v1134_v29  ;;  %v1064_v11 = vadd.f32 %v1750_v2, %v1063_v5  ;;  %v1139_v2 = vmul.f32 %v1786_v27, %v1786_v27 }
 0x14f   :  { %v1065_v60 = vadd.f32 %v1064_v11, %v1777_v21  ;;  %v1198_v12 = vadd.f32 %v1197_v7, %v1135_v39 }
 0x151   :  { %v1199_v14 = vadd.f32 %v1198_v12, %v1136_v43  ;;  %v1066_v9 = vadd.f32 %v1065_v60, %v1795_v33 }
 0x153   :  { %v1067_v16 = vadd.f32 %v1768_v15, %v1066_v9  ;;  %v1200_v18 = vadd.f32 %v1199_v14, %v1137_v47  ;;  %v1142_v15 = vmul.f32 %v1804_v40, %v1804_v40 }
 0x155   :  { %v1201_v41 = vadd.f32 %v1200_v18, %v1138_v54  ;;  %v1068_v20 = vadd.f32 %v1786_v27, %v1067_v16  ;;  %v1143_v27 = vmul.f32 %v1822_v58, %v1822_v58 }
 0x157   :  { %v1069_v21 = vadd.f32 %v1068_v20, %v1813_v50  ;;  %v1202_v45 = vadd.f32 %v1201_v41, %v1139_v2 }
 0x159   :  { %v1203_v23 = vadd.f32 %v1202_v45, %v1140_v22  ;;  %v1070_v33 = vadd.f32 %v1069_v21, %v1831_v1 }
 0x15b   :  { %v1071_v57 = vadd.f32 %v1804_v40, %v1070_v33  ;;  %v1204_v28 = vadd.f32 %v1203_v23, %v1141_v26  ;;  %v1146_v40 = vmul.f32 %v1840_v10, %v1840_v10 }
 0x15d   :  { %v1205_v30 = vadd.f32 %v1204_v28, %v1142_v15  ;;  %v1072_v31 = vadd.f32 %v1822_v58, %v1071_v57  ;;  %v1147_v58 = vmul.f32 %v1858_v25, %v1858_v25 }
 0x15f   :  { %v1073_v50 = vadd.f32 %v1072_v31, %v1849_v17  ;;  %v1206_v35 = vadd.f32 %v1205_v30, %v1143_v27 }
 0x161   :  { %v1207_v52 = vadd.f32 %v1206_v35, %v1144_v3  ;;  %v1074_v1 = vadd.f32 %v1073_v50, %v1867_v32 }
 0x163   :  { %v1075_v37 = vadd.f32 %v1840_v10, %v1074_v1  ;;  %v1208_v62 = vadd.f32 %v1207_v52, %v1145_v36 }
 0x165   :  { %v1076_v38 = vadd.f32 %v1858_v25, %v1075_v37  ;;  %v1209_v42 = vadd.f32 %v1208_v62, %v1146_v40 }
 0x167   :  { %v1077_v17 = vrot.slane %v1076_v38, 4  ;;  %v1210_v13 = vadd.f32 %v1209_v42, %v1147_v58 }
 0x169   :  { %v1078_v44 = vadd.f32 %v1077_v17, %v1076_v38  ;;  %v1211_v46 = vrot.slane %v1210_v13, 4 }
 0x16b   :  { %v1079_v49 = vrot.slane %v1078_v44, 2  ;;  %v1212_v24 = vadd.f32 %v1211_v46, %v1210_v13 }
 0x16d   :  { %v1080_v51 = vadd.f32 %v1079_v49, %v1078_v44  ;;  %v1213_v32 = vrot.slane %v1212_v24, 2 }
 0x16f   :  { %v1081_v8 = vrot.slane %v1080_v51, 1  ;;  %v1214_v53 = vadd.f32 %v1213_v32, %v1212_v24 }
 0x171   :  { %v1082_v55 = vadd.f32 %v1081_v8, %v1080_v51  ;;  %v1215_v19 = vrot.slane %v1214_v53, 1 }
 0x173   :  { %1083 = vst [vmem:[%s1981_s3] sm:$0x1] %v1082_v55  ;;  %v1216_v10 = vadd.f32 %v1215_v19, %v1214_v53 }
 0x175   :  { %1217 = vst [vmem:[%s1981_s3 + $0x1] sm:$0x1] %v1216_v10 }

</bundles_post_ra>
